<compile_context>
chip_gen: v7x
topology: tpu7x:2x2x1
jax: 0.10.0
libtpu: 0.0.40
codegen_flags: <defaults>
</compile_context>

<pallas_src>
import functools

import jax
import jax.numpy as jnp
from jax.experimental import pallas as pl
from jax.experimental.pallas import tpu as pltpu

KSIZE = 4        # conv kernel size (both convs)
IMG_HW = 11      # spatial size implied by fc1 in-features: 11 -> 8 -> 5, 5*5*32 = 800
BLK = 128        # lanes reserved per image (>= 11*11); keeps per-batch lane blocks aligned


def _dqn_kernel(x_ref, w1_ref, b1_ref, w2_ref, b2_ref,
                wfc1_ref, bfc1_ref, wfc2_ref, bfc2_ref, o_ref,
                *, img_w, ksize, blk):
    lanes = x_ref.shape[1]            # batch * blk
    batch = o_ref.shape[0]
    oc1 = b1_ref.shape[0]             # 16
    oc2 = b2_ref.shape[0]             # 32
    hid = bfc1_ref.shape[1]           # 64
    o2 = img_w - 2 * (ksize - 1)      # conv2 output spatial size (5)

    def shifted(v, s):
        # pltpu.roll follows jnp.roll semantics (out[i] = in[(i - shift) % n]);
        # with shift = lanes - s we get out[:, m] = in[:, m + s].  The circular
        # wrap only ever lands on padding / invalid columns (max valid m + s is
        # < the end of that image's 128-lane block), so it never corrupts
        # columns we later read.
        return v if s == 0 else pltpu.roll(v, lanes - s, axis=1)

    # ---- conv1 + ReLU: k*k shifted matmuls, lane-dense (oc1, lanes) output ---
    x = x_ref[...]                                        # (C_in, lanes)
    acc1 = jnp.zeros((oc1, lanes), jnp.float32)
    for t in range(ksize * ksize):
        s = (t // ksize) * img_w + (t % ksize)
        acc1 = acc1 + jnp.dot(w1_ref[t * oc1:(t + 1) * oc1, :], shifted(x, s),
                              preferred_element_type=jnp.float32)
    y1 = jnp.maximum(acc1 + b1_ref[...], 0.0)             # (oc1, lanes)

    # ---- conv2 + ReLU (y1 keeps the stride-img_w layout -> same shift table) -
    acc2 = jnp.zeros((oc2, lanes), jnp.float32)
    for t in range(ksize * ksize):
        s = (t // ksize) * img_w + (t % ksize)
        acc2 = acc2 + jnp.dot(w2_ref[t * oc2:(t + 1) * oc2, :], shifted(y1, s),
                              preferred_element_type=jnp.float32)
    y2 = jnp.maximum(acc2 + b2_ref[...], 0.0)             # (oc2, lanes)

    # ---- fc1 + ReLU: gather the o2*o2 valid spatial positions per image ------
    y2t = y2.T                                            # (lanes, oc2)
    accf = jnp.zeros((batch, hid), jnp.float32)
    for p in range(o2 * o2):
        off = (p // o2) * img_w + (p % o2)
        rows = jnp.concatenate(
            [y2t[b * blk + off:b * blk + off + 1, :] for b in range(batch)],
            axis=0)                                       # (batch, oc2)
        accf = accf + jnp.dot(rows, wfc1_ref[p * oc2:(p + 1) * oc2, :],
                              preferred_element_type=jnp.float32)
    h = jnp.maximum(accf + bfc1_ref[...], 0.0)            # (batch, hid)

    # ---- fc2 ------------------------------------------------------------------
    out = jnp.dot(h, wfc2_ref[...], preferred_element_type=jnp.float32)
    o_ref[...] = (out + bfc2_ref[...]).astype(o_ref.dtype)


# ----------------------------------------------------------------------------
# Parameters: PyTorch-layout init + one-time re-layout for the fused kernel.
# ----------------------------------------------------------------------------
def init_dqn_params(key, state_space_dim, action_space_dim):
    """Parameters with the same shapes/layout as the PyTorch nn.Module."""
    ks = jax.random.split(key, 8)
    return {
        "conv1_w": jax.random.normal(ks[0], (16, state_space_dim, KSIZE, KSIZE), jnp.float32) * 0.1,
        "conv1_b": jax.random.normal(ks[1], (16,), jnp.float32) * 0.1,
        "conv2_w": jax.random.normal(ks[2], (32, 16, KSIZE, KSIZE), jnp.float32) * 0.05,
        "conv2_b": jax.random.normal(ks[3], (32,), jnp.float32) * 0.05,
        "fc1_w": jax.random.normal(ks[4], (64, 5 * 5 * 32), jnp.float32) * 0.02,   # (out, in)
        "fc1_b": jax.random.normal(ks[5], (64,), jnp.float32) * 0.02,
        "fc2_w": jax.random.normal(ks[6], (action_space_dim, 64), jnp.float32) * 0.05,
        "fc2_b": jax.random.normal(ks[7], (action_space_dim,), jnp.float32) * 0.05,
    }


def pack_params(p):
    """One-time weight re-layout (done at init, NOT per forward call)."""
    k = KSIZE
    w1 = jnp.asarray(p["conv1_w"], jnp.float32)            # (16, C, k, k)
    oc1, cin = w1.shape[0], w1.shape[1]
    w2 = jnp.asarray(p["conv2_w"], jnp.float32)            # (32, 16, k, k)
    oc2 = w2.shape[0]
    o2 = IMG_HW - 2 * (k - 1)                               # 5
    fc1 = jnp.asarray(p["fc1_w"], jnp.float32).reshape(-1, oc2, o2, o2)  # (64, 32, 5, 5)
    hid = fc1.shape[0]
    act = p["fc2_w"].shape[0]
    return {
        # conv weights: row ((i*k+j)*OC + oc), col = input channel
        "w1": w1.transpose(2, 3, 0, 1).reshape(k * k * oc1, cin),
        "b1": jnp.asarray(p["conv1_b"], jnp.float32).reshape(oc1, 1),
        "w2": w2.transpose(2, 3, 0, 1).reshape(k * k * oc2, oc1),
        "b2": jnp.asarray(p["conv2_b"], jnp.float32).reshape(oc2, 1),
        # fc1: row ((oh*o2+ow)*oc2 + c) to match the in-kernel conv-output gather
        "wfc1": fc1.transpose(2, 3, 1, 0).reshape(o2 * o2 * oc2, hid),
        "bfc1": jnp.asarray(p["fc1_b"], jnp.float32).reshape(1, hid),
        "wfc2": jnp.asarray(p["fc2_w"], jnp.float32).T,     # (64, A)
        "bfc2": jnp.asarray(p["fc2_b"], jnp.float32).reshape(1, act),
    }


# ----------------------------------------------------------------------------
# Forward wrapper
# ----------------------------------------------------------------------------
def _full_spec(shape):
    return pl.BlockSpec(shape, lambda: (0,) * len(shape))


def _prep_input(x):
    """NCHW -> (C, B*BLK): channels on sublanes, one 128-lane block per image."""
    b, c, h, w = x.shape
    x = jnp.asarray(x, jnp.float32).transpose(1, 0, 2, 3).reshape(c, b, h * w)
    x = jnp.pad(x, ((0, 0), (0, 0), (0, BLK - h * w)))
    return x.reshape(c, b * BLK)


@jax.jit
def dqn_forward(packed, x):
    b, c, h, w = x.shape
    assert h == IMG_HW and w == IMG_HW, "fc1 (5*5*32) implies an 11x11 input"
    act = packed["wfc2"].shape[1]
    x_lay = _prep_input(x)                                  # (C, B*128)
    args = (x_lay, packed["w1"], packed["b1"], packed["w2"], packed["b2"],
            packed["wfc1"], packed["bfc1"], packed["wfc2"], packed["bfc2"])
    kernel = functools.partial(_dqn_kernel, img_w=IMG_HW, ksize=KSIZE, blk=BLK)
    return pl.pallas_call(
        kernel,
        out_shape=jax.ShapeDtypeStruct((b, act), jnp.float32),
        in_specs=[_full_spec(a.shape) for a in args],
        out_specs=_full_spec((b, act)),
    )(*args)


if __name__ == "__main__":
    key = jax.random.PRNGKey(0)
    k_param, k_x = jax.random.split(key)

    state_space_dim = 4      # input channels
    action_space_dim = 4
    batch = 2

    params = init_dqn_params(k_param, state_space_dim, action_space_dim)
    packed = pack_params(params)          # one-time weight re-layout
    x = jax.random.normal(k_x, (batch, state_space_dim, IMG_HW, IMG_HW), jnp.float32)

    out = dqn_forward(packed, x)
    out = jax.block_until_ready(out)
    assert out.shape == (batch, action_space_dim), out.shape
    print("KERNEL_OK")
</pallas_src>

<mosaic_0001>
module attributes {stable_mosaic.version = 11 : i64} {
  func.func @_dqn_kernel(%arg0: memref<4x256xf32, #tpu.memory_space<vmem>>, %arg1: memref<256x4xf32, #tpu.memory_space<vmem>>, %arg2: memref<16x1xf32, #tpu.memory_space<vmem>>, %arg3: memref<512x16xf32, #tpu.memory_space<vmem>>, %arg4: memref<32x1xf32, #tpu.memory_space<vmem>>, %arg5: memref<800x64xf32, #tpu.memory_space<vmem>>, %arg6: memref<1x64xf32, #tpu.memory_space<vmem>>, %arg7: memref<64x4xf32, #tpu.memory_space<vmem>>, %arg8: memref<1x4xf32, #tpu.memory_space<vmem>>, %arg9: memref<2x4xf32, #tpu.memory_space<vmem>>) attributes {dimension_semantics = [], scalar_prefetch = 0 : i64, scratch_operands = 0 : i64, tpu.core_type = #tpu.core_type<tc>} {
    %c0 = arith.constant 0 : index
    %c0_0 = arith.constant 0 : index
    %0 = vector.load %arg0[%c0, %c0_0] : memref<4x256xf32, #tpu.memory_space<vmem>>, vector<4x256xf32>
    %cst = arith.constant 0.000000e+00 : f32
    %1 = vector.broadcast %cst : f32 to vector<16x256xf32>
    %c0_1 = arith.constant 0 : index
    %c0_2 = arith.constant 0 : index
    %2 = vector.load %arg1[%c0_1, %c0_2] : memref<256x4xf32, #tpu.memory_space<vmem>>, vector<16x4xf32>
    %cst_3 = arith.constant dense<0.000000e+00> : vector<16x256xf32>
    %3 = tpu.matmul %2, %0, %cst_3 {dimension_numbers = #tpu.dot_dimension_numbers<[1], [0], [0], [1], [0, 0, 1, 1], [], []>} : vector<16x4xf32>, vector<4x256xf32>, vector<16x256xf32> -> vector<16x256xf32>
    %4 = arith.addf %1, %3 : vector<16x256xf32>
    %c16 = arith.constant 16 : index
    %c0_4 = arith.constant 0 : index
    %5 = vector.load %arg1[%c16, %c0_4] : memref<256x4xf32, #tpu.memory_space<vmem>>, vector<16x4xf32>
    %c255_i32 = arith.constant 255 : i32
    %6 = tpu.dynamic_rotate %0 by %c255_i32 dim 1 : vector<4x256xf32>, i32 -> vector<4x256xf32>
    %cst_5 = arith.constant dense<0.000000e+00> : vector<16x256xf32>
    %7 = tpu.matmul %5, %6, %cst_5 {dimension_numbers = #tpu.dot_dimension_numbers<[1], [0], [0], [1], [0, 0, 1, 1], [], []>} : vector<16x4xf32>, vector<4x256xf32>, vector<16x256xf32> -> vector<16x256xf32>
    %8 = arith.addf %4, %7 : vector<16x256xf32>
    %c32 = arith.constant 32 : index
    %c0_6 = arith.constant 0 : index
    %9 = vector.load %arg1[%c32, %c0_6] : memref<256x4xf32, #tpu.memory_space<vmem>>, vector<16x4xf32>
    %c254_i32 = arith.constant 254 : i32
    %10 = tpu.dynamic_rotate %0 by %c254_i32 dim 1 : vector<4x256xf32>, i32 -> vector<4x256xf32>
    %cst_7 = arith.constant dense<0.000000e+00> : vector<16x256xf32>
    %11 = tpu.matmul %9, %10, %cst_7 {dimension_numbers = #tpu.dot_dimension_numbers<[1], [0], [0], [1], [0, 0, 1, 1], [], []>} : vector<16x4xf32>, vector<4x256xf32>, vector<16x256xf32> -> vector<16x256xf32>
    %12 = arith.addf %8, %11 : vector<16x256xf32>
    %c48 = arith.constant 48 : index
    %c0_8 = arith.constant 0 : index
    %13 = vector.load %arg1[%c48, %c0_8] : memref<256x4xf32, #tpu.memory_space<vmem>>, vector<16x4xf32>
    %c253_i32 = arith.constant 253 : i32
    %14 = tpu.dynamic_rotate %0 by %c253_i32 dim 1 : vector<4x256xf32>, i32 -> vector<4x256xf32>
    %cst_9 = arith.constant dense<0.000000e+00> : vector<16x256xf32>
    %15 = tpu.matmul %13, %14, %cst_9 {dimension_numbers = #tpu.dot_dimension_numbers<[1], [0], [0], [1], [0, 0, 1, 1], [], []>} : vector<16x4xf32>, vector<4x256xf32>, vector<16x256xf32> -> vector<16x256xf32>
    %16 = arith.addf %12, %15 : vector<16x256xf32>
    %c64 = arith.constant 64 : index
    %c0_10 = arith.constant 0 : index
    %17 = vector.load %arg1[%c64, %c0_10] : memref<256x4xf32, #tpu.memory_space<vmem>>, vector<16x4xf32>
    %c245_i32 = arith.constant 245 : i32
    %18 = tpu.dynamic_rotate %0 by %c245_i32 dim 1 : vector<4x256xf32>, i32 -> vector<4x256xf32>
    %cst_11 = arith.constant dense<0.000000e+00> : vector<16x256xf32>
    %19 = tpu.matmul %17, %18, %cst_11 {dimension_numbers = #tpu.dot_dimension_numbers<[1], [0], [0], [1], [0, 0, 1, 1], [], []>} : vector<16x4xf32>, vector<4x256xf32>, vector<16x256xf32> -> vector<16x256xf32>
    %20 = arith.addf %16, %19 : vector<16x256xf32>
    %c80 = arith.constant 80 : index
    %c0_12 = arith.constant 0 : index
    %21 = vector.load %arg1[%c80, %c0_12] : memref<256x4xf32, #tpu.memory_space<vmem>>, vector<16x4xf32>
    %c244_i32 = arith.constant 244 : i32
    %22 = tpu.dynamic_rotate %0 by %c244_i32 dim 1 : vector<4x256xf32>, i32 -> vector<4x256xf32>
    %cst_13 = arith.constant dense<0.000000e+00> : vector<16x256xf32>
    %23 = tpu.matmul %21, %22, %cst_13 {dimension_numbers = #tpu.dot_dimension_numbers<[1], [0], [0], [1], [0, 0, 1, 1], [], []>} : vector<16x4xf32>, vector<4x256xf32>, vector<16x256xf32> -> vector<16x256xf32>
    %24 = arith.addf %20, %23 : vector<16x256xf32>
    %c96 = arith.constant 96 : index
    %c0_14 = arith.constant 0 : index
    %25 = vector.load %arg1[%c96, %c0_14] : memref<256x4xf32, #tpu.memory_space<vmem>>, vector<16x4xf32>
    %c243_i32 = arith.constant 243 : i32
    %26 = tpu.dynamic_rotate %0 by %c243_i32 dim 1 : vector<4x256xf32>, i32 -> vector<4x256xf32>
    %cst_15 = arith.constant dense<0.000000e+00> : vector<16x256xf32>
    %27 = tpu.matmul %25, %26, %cst_15 {dimension_numbers = #tpu.dot_dimension_numbers<[1], [0], [0], [1], [0, 0, 1, 1], [], []>} : vector<16x4xf32>, vector<4x256xf32>, vector<16x256xf32> -> vector<16x256xf32>
    %28 = arith.addf %24, %27 : vector<16x256xf32>
    %c112 = arith.constant 112 : index
    %c0_16 = arith.constant 0 : index
    %29 = vector.load %arg1[%c112, %c0_16] : memref<256x4xf32, #tpu.memory_space<vmem>>, vector<16x4xf32>
    %c242_i32 = arith.constant 242 : i32
    %30 = tpu.dynamic_rotate %0 by %c242_i32 dim 1 : vector<4x256xf32>, i32 -> vector<4x256xf32>
    %cst_17 = arith.constant dense<0.000000e+00> : vector<16x256xf32>
    %31 = tpu.matmul %29, %30, %cst_17 {dimension_numbers = #tpu.dot_dimension_numbers<[1], [0], [0], [1], [0, 0, 1, 1], [], []>} : vector<16x4xf32>, vector<4x256xf32>, vector<16x256xf32> -> vector<16x256xf32>
    %32 = arith.addf %28, %31 : vector<16x256xf32>
    %c128 = arith.constant 128 : index
    %c0_18 = arith.constant 0 : index
    %33 = vector.load %arg1[%c128, %c0_18] : memref<256x4xf32, #tpu.memory_space<vmem>>, vector<16x4xf32>
    %c234_i32 = arith.constant 234 : i32
    %34 = tpu.dynamic_rotate %0 by %c234_i32 dim 1 : vector<4x256xf32>, i32 -> vector<4x256xf32>
    %cst_19 = arith.constant dense<0.000000e+00> : vector<16x256xf32>
    %35 = tpu.matmul %33, %34, %cst_19 {dimension_numbers = #tpu.dot_dimension_numbers<[1], [0], [0], [1], [0, 0, 1, 1], [], []>} : vector<16x4xf32>, vector<4x256xf32>, vector<16x256xf32> -> vector<16x256xf32>
    %36 = arith.addf %32, %35 : vector<16x256xf32>
    %c144 = arith.constant 144 : index
    %c0_20 = arith.constant 0 : index
    %37 = vector.load %arg1[%c144, %c0_20] : memref<256x4xf32, #tpu.memory_space<vmem>>, vector<16x4xf32>
    %c233_i32 = arith.constant 233 : i32
    %38 = tpu.dynamic_rotate %0 by %c233_i32 dim 1 : vector<4x256xf32>, i32 -> vector<4x256xf32>
    %cst_21 = arith.constant dense<0.000000e+00> : vector<16x256xf32>
    %39 = tpu.matmul %37, %38, %cst_21 {dimension_numbers = #tpu.dot_dimension_numbers<[1], [0], [0], [1], [0, 0, 1, 1], [], []>} : vector<16x4xf32>, vector<4x256xf32>, vector<16x256xf32> -> vector<16x256xf32>
    %40 = arith.addf %36, %39 : vector<16x256xf32>
    %c160 = arith.constant 160 : index
    %c0_22 = arith.constant 0 : index
    %41 = vector.load %arg1[%c160, %c0_22] : memref<256x4xf32, #tpu.memory_space<vmem>>, vector<16x4xf32>
    %c232_i32 = arith.constant 232 : i32
    %42 = tpu.dynamic_rotate %0 by %c232_i32 dim 1 : vector<4x256xf32>, i32 -> vector<4x256xf32>
    %cst_23 = arith.constant dense<0.000000e+00> : vector<16x256xf32>
    %43 = tpu.matmul %41, %42, %cst_23 {dimension_numbers = #tpu.dot_dimension_numbers<[1], [0], [0], [1], [0, 0, 1, 1], [], []>} : vector<16x4xf32>, vector<4x256xf32>, vector<16x256xf32> -> vector<16x256xf32>
    %44 = arith.addf %40, %43 : vector<16x256xf32>
    %c176 = arith.constant 176 : index
    %c0_24 = arith.constant 0 : index
    %45 = vector.load %arg1[%c176, %c0_24] : memref<256x4xf32, #tpu.memory_space<vmem>>, vector<16x4xf32>
    %c231_i32 = arith.constant 231 : i32
    %46 = tpu.dynamic_rotate %0 by %c231_i32 dim 1 : vector<4x256xf32>, i32 -> vector<4x256xf32>
    %cst_25 = arith.constant dense<0.000000e+00> : vector<16x256xf32>
    %47 = tpu.matmul %45, %46, %cst_25 {dimension_numbers = #tpu.dot_dimension_numbers<[1], [0], [0], [1], [0, 0, 1, 1], [], []>} : vector<16x4xf32>, vector<4x256xf32>, vector<16x256xf32> -> vector<16x256xf32>
    %48 = arith.addf %44, %47 : vector<16x256xf32>
    %c192 = arith.constant 192 : index
    %c0_26 = arith.constant 0 : index
    %49 = vector.load %arg1[%c192, %c0_26] : memref<256x4xf32, #tpu.memory_space<vmem>>, vector<16x4xf32>
    %c223_i32 = arith.constant 223 : i32
    %50 = tpu.dynamic_rotate %0 by %c223_i32 dim 1 : vector<4x256xf32>, i32 -> vector<4x256xf32>
    %cst_27 = arith.constant dense<0.000000e+00> : vector<16x256xf32>
    %51 = tpu.matmul %49, %50, %cst_27 {dimension_numbers = #tpu.dot_dimension_numbers<[1], [0], [0], [1], [0, 0, 1, 1], [], []>} : vector<16x4xf32>, vector<4x256xf32>, vector<16x256xf32> -> vector<16x256xf32>
    %52 = arith.addf %48, %51 : vector<16x256xf32>
    %c208 = arith.constant 208 : index
    %c0_28 = arith.constant 0 : index
    %53 = vector.load %arg1[%c208, %c0_28] : memref<256x4xf32, #tpu.memory_space<vmem>>, vector<16x4xf32>
    %c222_i32 = arith.constant 222 : i32
    %54 = tpu.dynamic_rotate %0 by %c222_i32 dim 1 : vector<4x256xf32>, i32 -> vector<4x256xf32>
    %cst_29 = arith.constant dense<0.000000e+00> : vector<16x256xf32>
    %55 = tpu.matmul %53, %54, %cst_29 {dimension_numbers = #tpu.dot_dimension_numbers<[1], [0], [0], [1], [0, 0, 1, 1], [], []>} : vector<16x4xf32>, vector<4x256xf32>, vector<16x256xf32> -> vector<16x256xf32>
    %56 = arith.addf %52, %55 : vector<16x256xf32>
    %c224 = arith.constant 224 : index
    %c0_30 = arith.constant 0 : index
    %57 = vector.load %arg1[%c224, %c0_30] : memref<256x4xf32, #tpu.memory_space<vmem>>, vector<16x4xf32>
    %c221_i32 = arith.constant 221 : i32
    %58 = tpu.dynamic_rotate %0 by %c221_i32 dim 1 : vector<4x256xf32>, i32 -> vector<4x256xf32>
    %cst_31 = arith.constant dense<0.000000e+00> : vector<16x256xf32>
    %59 = tpu.matmul %57, %58, %cst_31 {dimension_numbers = #tpu.dot_dimension_numbers<[1], [0], [0], [1], [0, 0, 1, 1], [], []>} : vector<16x4xf32>, vector<4x256xf32>, vector<16x256xf32> -> vector<16x256xf32>
    %60 = arith.addf %56, %59 : vector<16x256xf32>
    %c240 = arith.constant 240 : index
    %c0_32 = arith.constant 0 : index
    %61 = vector.load %arg1[%c240, %c0_32] : memref<256x4xf32, #tpu.memory_space<vmem>>, vector<16x4xf32>
    %c220_i32 = arith.constant 220 : i32
    %62 = tpu.dynamic_rotate %0 by %c220_i32 dim 1 : vector<4x256xf32>, i32 -> vector<4x256xf32>
    %cst_33 = arith.constant dense<0.000000e+00> : vector<16x256xf32>
    %63 = tpu.matmul %61, %62, %cst_33 {dimension_numbers = #tpu.dot_dimension_numbers<[1], [0], [0], [1], [0, 0, 1, 1], [], []>} : vector<16x4xf32>, vector<4x256xf32>, vector<16x256xf32> -> vector<16x256xf32>
    %64 = arith.addf %60, %63 : vector<16x256xf32>
    %c0_34 = arith.constant 0 : index
    %c0_35 = arith.constant 0 : index
    %65 = vector.load %arg2[%c0_34, %c0_35] : memref<16x1xf32, #tpu.memory_space<vmem>>, vector<16x1xf32>
    %66 = vector.broadcast %65 : vector<16x1xf32> to vector<16x256xf32>
    %67 = arith.addf %64, %66 : vector<16x256xf32>
    %cst_36 = arith.constant 0.000000e+00 : f32
    %68 = vector.broadcast %cst_36 : f32 to vector<16x256xf32>
    %69 = arith.maximumf %67, %68 : vector<16x256xf32>
    %cst_37 = arith.constant 0.000000e+00 : f32
    %70 = vector.broadcast %cst_37 : f32 to vector<32x256xf32>
    %c0_38 = arith.constant 0 : index
    %c0_39 = arith.constant 0 : index
    %71 = vector.load %arg3[%c0_38, %c0_39] : memref<512x16xf32, #tpu.memory_space<vmem>>, vector<32x16xf32>
    %cst_40 = arith.constant dense<0.000000e+00> : vector<32x256xf32>
    %72 = tpu.matmul %71, %69, %cst_40 {dimension_numbers = #tpu.dot_dimension_numbers<[1], [0], [0], [1], [0, 0, 1, 1], [], []>} : vector<32x16xf32>, vector<16x256xf32>, vector<32x256xf32> -> vector<32x256xf32>
    %73 = arith.addf %70, %72 : vector<32x256xf32>
    %c32_41 = arith.constant 32 : index
    %c0_42 = arith.constant 0 : index
    %74 = vector.load %arg3[%c32_41, %c0_42] : memref<512x16xf32, #tpu.memory_space<vmem>>, vector<32x16xf32>
    %c255_i32_43 = arith.constant 255 : i32
    %75 = tpu.dynamic_rotate %69 by %c255_i32_43 dim 1 : vector<16x256xf32>, i32 -> vector<16x256xf32>
    %cst_44 = arith.constant dense<0.000000e+00> : vector<32x256xf32>
    %76 = tpu.matmul %74, %75, %cst_44 {dimension_numbers = #tpu.dot_dimension_numbers<[1], [0], [0], [1], [0, 0, 1, 1], [], []>} : vector<32x16xf32>, vector<16x256xf32>, vector<32x256xf32> -> vector<32x256xf32>
    %77 = arith.addf %73, %76 : vector<32x256xf32>
    %c64_45 = arith.constant 64 : index
    %c0_46 = arith.constant 0 : index
    %78 = vector.load %arg3[%c64_45, %c0_46] : memref<512x16xf32, #tpu.memory_space<vmem>>, vector<32x16xf32>
    %c254_i32_47 = arith.constant 254 : i32
    %79 = tpu.dynamic_rotate %69 by %c254_i32_47 dim 1 : vector<16x256xf32>, i32 -> vector<16x256xf32>
    %cst_48 = arith.constant dense<0.000000e+00> : vector<32x256xf32>
    %80 = tpu.matmul %78, %79, %cst_48 {dimension_numbers = #tpu.dot_dimension_numbers<[1], [0], [0], [1], [0, 0, 1, 1], [], []>} : vector<32x16xf32>, vector<16x256xf32>, vector<32x256xf32> -> vector<32x256xf32>
    %81 = arith.addf %77, %80 : vector<32x256xf32>
    %c96_49 = arith.constant 96 : index
    %c0_50 = arith.constant 0 : index
    %82 = vector.load %arg3[%c96_49, %c0_50] : memref<512x16xf32, #tpu.memory_space<vmem>>, vector<32x16xf32>
    %c253_i32_51 = arith.constant 253 : i32
    %83 = tpu.dynamic_rotate %69 by %c253_i32_51 dim 1 : vector<16x256xf32>, i32 -> vector<16x256xf32>
    %cst_52 = arith.constant dense<0.000000e+00> : vector<32x256xf32>
    %84 = tpu.matmul %82, %83, %cst_52 {dimension_numbers = #tpu.dot_dimension_numbers<[1], [0], [0], [1], [0, 0, 1, 1], [], []>} : vector<32x16xf32>, vector<16x256xf32>, vector<32x256xf32> -> vector<32x256xf32>
    %85 = arith.addf %81, %84 : vector<32x256xf32>
    %c128_53 = arith.constant 128 : index
    %c0_54 = arith.constant 0 : index
    %86 = vector.load %arg3[%c128_53, %c0_54] : memref<512x16xf32, #tpu.memory_space<vmem>>, vector<32x16xf32>
    %c245_i32_55 = arith.constant 245 : i32
    %87 = tpu.dynamic_rotate %69 by %c245_i32_55 dim 1 : vector<16x256xf32>, i32 -> vector<16x256xf32>
    %cst_56 = arith.constant dense<0.000000e+00> : vector<32x256xf32>
    %88 = tpu.matmul %86, %87, %cst_56 {dimension_numbers = #tpu.dot_dimension_numbers<[1], [0], [0], [1], [0, 0, 1, 1], [], []>} : vector<32x16xf32>, vector<16x256xf32>, vector<32x256xf32> -> vector<32x256xf32>
    %89 = arith.addf %85, %88 : vector<32x256xf32>
    %c160_57 = arith.constant 160 : index
    %c0_58 = arith.constant 0 : index
    %90 = vector.load %arg3[%c160_57, %c0_58] : memref<512x16xf32, #tpu.memory_space<vmem>>, vector<32x16xf32>
    %c244_i32_59 = arith.constant 244 : i32
    %91 = tpu.dynamic_rotate %69 by %c244_i32_59 dim 1 : vector<16x256xf32>, i32 -> vector<16x256xf32>
    %cst_60 = arith.constant dense<0.000000e+00> : vector<32x256xf32>
    %92 = tpu.matmul %90, %91, %cst_60 {dimension_numbers = #tpu.dot_dimension_numbers<[1], [0], [0], [1], [0, 0, 1, 1], [], []>} : vector<32x16xf32>, vector<16x256xf32>, vector<32x256xf32> -> vector<32x256xf32>
    %93 = arith.addf %89, %92 : vector<32x256xf32>
    %c192_61 = arith.constant 192 : index
    %c0_62 = arith.constant 0 : index
    %94 = vector.load %arg3[%c192_61, %c0_62] : memref<512x16xf32, #tpu.memory_space<vmem>>, vector<32x16xf32>
    %c243_i32_63 = arith.constant 243 : i32
    %95 = tpu.dynamic_rotate %69 by %c243_i32_63 dim 1 : vector<16x256xf32>, i32 -> vector<16x256xf32>
    %cst_64 = arith.constant dense<0.000000e+00> : vector<32x256xf32>
    %96 = tpu.matmul %94, %95, %cst_64 {dimension_numbers = #tpu.dot_dimension_numbers<[1], [0], [0], [1], [0, 0, 1, 1], [], []>} : vector<32x16xf32>, vector<16x256xf32>, vector<32x256xf32> -> vector<32x256xf32>
    %97 = arith.addf %93, %96 : vector<32x256xf32>
    %c224_65 = arith.constant 224 : index
    %c0_66 = arith.constant 0 : index
    %98 = vector.load %arg3[%c224_65, %c0_66] : memref<512x16xf32, #tpu.memory_space<vmem>>, vector<32x16xf32>
    %c242_i32_67 = arith.constant 242 : i32
    %99 = tpu.dynamic_rotate %69 by %c242_i32_67 dim 1 : vector<16x256xf32>, i32 -> vector<16x256xf32>
    %cst_68 = arith.constant dense<0.000000e+00> : vector<32x256xf32>
    %100 = tpu.matmul %98, %99, %cst_68 {dimension_numbers = #tpu.dot_dimension_numbers<[1], [0], [0], [1], [0, 0, 1, 1], [], []>} : vector<32x16xf32>, vector<16x256xf32>, vector<32x256xf32> -> vector<32x256xf32>
    %101 = arith.addf %97, %100 : vector<32x256xf32>
    %c256 = arith.constant 256 : index
    %c0_69 = arith.constant 0 : index
    %102 = vector.load %arg3[%c256, %c0_69] : memref<512x16xf32, #tpu.memory_space<vmem>>, vector<32x16xf32>
    %c234_i32_70 = arith.constant 234 : i32
    %103 = tpu.dynamic_rotate %69 by %c234_i32_70 dim 1 : vector<16x256xf32>, i32 -> vector<16x256xf32>
    %cst_71 = arith.constant dense<0.000000e+00> : vector<32x256xf32>
    %104 = tpu.matmul %102, %103, %cst_71 {dimension_numbers = #tpu.dot_dimension_numbers<[1], [0], [0], [1], [0, 0, 1, 1], [], []>} : vector<32x16xf32>, vector<16x256xf32>, vector<32x256xf32> -> vector<32x256xf32>
    %105 = arith.addf %101, %104 : vector<32x256xf32>
    %c288 = arith.constant 288 : index
    %c0_72 = arith.constant 0 : index
    %106 = vector.load %arg3[%c288, %c0_72] : memref<512x16xf32, #tpu.memory_space<vmem>>, vector<32x16xf32>
    %c233_i32_73 = arith.constant 233 : i32
    %107 = tpu.dynamic_rotate %69 by %c233_i32_73 dim 1 : vector<16x256xf32>, i32 -> vector<16x256xf32>
    %cst_74 = arith.constant dense<0.000000e+00> : vector<32x256xf32>
    %108 = tpu.matmul %106, %107, %cst_74 {dimension_numbers = #tpu.dot_dimension_numbers<[1], [0], [0], [1], [0, 0, 1, 1], [], []>} : vector<32x16xf32>, vector<16x256xf32>, vector<32x256xf32> -> vector<32x256xf32>
    %109 = arith.addf %105, %108 : vector<32x256xf32>
    %c320 = arith.constant 320 : index
    %c0_75 = arith.constant 0 : index
    %110 = vector.load %arg3[%c320, %c0_75] : memref<512x16xf32, #tpu.memory_space<vmem>>, vector<32x16xf32>
    %c232_i32_76 = arith.constant 232 : i32
    %111 = tpu.dynamic_rotate %69 by %c232_i32_76 dim 1 : vector<16x256xf32>, i32 -> vector<16x256xf32>
    %cst_77 = arith.constant dense<0.000000e+00> : vector<32x256xf32>
    %112 = tpu.matmul %110, %111, %cst_77 {dimension_numbers = #tpu.dot_dimension_numbers<[1], [0], [0], [1], [0, 0, 1, 1], [], []>} : vector<32x16xf32>, vector<16x256xf32>, vector<32x256xf32> -> vector<32x256xf32>
    %113 = arith.addf %109, %112 : vector<32x256xf32>
    %c352 = arith.constant 352 : index
    %c0_78 = arith.constant 0 : index
    %114 = vector.load %arg3[%c352, %c0_78] : memref<512x16xf32, #tpu.memory_space<vmem>>, vector<32x16xf32>
    %c231_i32_79 = arith.constant 231 : i32
    %115 = tpu.dynamic_rotate %69 by %c231_i32_79 dim 1 : vector<16x256xf32>, i32 -> vector<16x256xf32>
    %cst_80 = arith.constant dense<0.000000e+00> : vector<32x256xf32>
    %116 = tpu.matmul %114, %115, %cst_80 {dimension_numbers = #tpu.dot_dimension_numbers<[1], [0], [0], [1], [0, 0, 1, 1], [], []>} : vector<32x16xf32>, vector<16x256xf32>, vector<32x256xf32> -> vector<32x256xf32>
    %117 = arith.addf %113, %116 : vector<32x256xf32>
    %c384 = arith.constant 384 : index
    %c0_81 = arith.constant 0 : index
    %118 = vector.load %arg3[%c384, %c0_81] : memref<512x16xf32, #tpu.memory_space<vmem>>, vector<32x16xf32>
    %c223_i32_82 = arith.constant 223 : i32
    %119 = tpu.dynamic_rotate %69 by %c223_i32_82 dim 1 : vector<16x256xf32>, i32 -> vector<16x256xf32>
    %cst_83 = arith.constant dense<0.000000e+00> : vector<32x256xf32>
    %120 = tpu.matmul %118, %119, %cst_83 {dimension_numbers = #tpu.dot_dimension_numbers<[1], [0], [0], [1], [0, 0, 1, 1], [], []>} : vector<32x16xf32>, vector<16x256xf32>, vector<32x256xf32> -> vector<32x256xf32>
    %121 = arith.addf %117, %120 : vector<32x256xf32>
    %c416 = arith.constant 416 : index
    %c0_84 = arith.constant 0 : index
    %122 = vector.load %arg3[%c416, %c0_84] : memref<512x16xf32, #tpu.memory_space<vmem>>, vector<32x16xf32>
    %c222_i32_85 = arith.constant 222 : i32
    %123 = tpu.dynamic_rotate %69 by %c222_i32_85 dim 1 : vector<16x256xf32>, i32 -> vector<16x256xf32>
    %cst_86 = arith.constant dense<0.000000e+00> : vector<32x256xf32>
    %124 = tpu.matmul %122, %123, %cst_86 {dimension_numbers = #tpu.dot_dimension_numbers<[1], [0], [0], [1], [0, 0, 1, 1], [], []>} : vector<32x16xf32>, vector<16x256xf32>, vector<32x256xf32> -> vector<32x256xf32>
    %125 = arith.addf %121, %124 : vector<32x256xf32>
    %c448 = arith.constant 448 : index
    %c0_87 = arith.constant 0 : index
    %126 = vector.load %arg3[%c448, %c0_87] : memref<512x16xf32, #tpu.memory_space<vmem>>, vector<32x16xf32>
    %c221_i32_88 = arith.constant 221 : i32
    %127 = tpu.dynamic_rotate %69 by %c221_i32_88 dim 1 : vector<16x256xf32>, i32 -> vector<16x256xf32>
    %cst_89 = arith.constant dense<0.000000e+00> : vector<32x256xf32>
    %128 = tpu.matmul %126, %127, %cst_89 {dimension_numbers = #tpu.dot_dimension_numbers<[1], [0], [0], [1], [0, 0, 1, 1], [], []>} : vector<32x16xf32>, vector<16x256xf32>, vector<32x256xf32> -> vector<32x256xf32>
    %129 = arith.addf %125, %128 : vector<32x256xf32>
    %c480 = arith.constant 480 : index
    %c0_90 = arith.constant 0 : index
    %130 = vector.load %arg3[%c480, %c0_90] : memref<512x16xf32, #tpu.memory_space<vmem>>, vector<32x16xf32>
    %c220_i32_91 = arith.constant 220 : i32
    %131 = tpu.dynamic_rotate %69 by %c220_i32_91 dim 1 : vector<16x256xf32>, i32 -> vector<16x256xf32>
    %cst_92 = arith.constant dense<0.000000e+00> : vector<32x256xf32>
    %132 = tpu.matmul %130, %131, %cst_92 {dimension_numbers = #tpu.dot_dimension_numbers<[1], [0], [0], [1], [0, 0, 1, 1], [], []>} : vector<32x16xf32>, vector<16x256xf32>, vector<32x256xf32> -> vector<32x256xf32>
    %133 = arith.addf %129, %132 : vector<32x256xf32>
    %c0_93 = arith.constant 0 : index
    %c0_94 = arith.constant 0 : index
    %134 = vector.load %arg4[%c0_93, %c0_94] : memref<32x1xf32, #tpu.memory_space<vmem>>, vector<32x1xf32>
    %135 = vector.broadcast %134 : vector<32x1xf32> to vector<32x256xf32>
    %136 = arith.addf %133, %135 : vector<32x256xf32>
    %cst_95 = arith.constant 0.000000e+00 : f32
    %137 = vector.broadcast %cst_95 : f32 to vector<32x256xf32>
    %138 = arith.maximumf %136, %137 : vector<32x256xf32>
    %139 = tpu.transpose %138, [1, 0] : vector<32x256xf32> -> vector<256x32xf32>
    %cst_96 = arith.constant 0.000000e+00 : f32
    %140 = vector.broadcast %cst_96 : f32 to vector<2x64xf32>
    %141 = vector.extract_strided_slice %139 {offsets = [0, 0], sizes = [1, 32], strides = [1, 1]} : vector<256x32xf32> to vector<1x32xf32>
    %142 = vector.extract_strided_slice %139 {offsets = [128, 0], sizes = [1, 32], strides = [1, 1]} : vector<256x32xf32> to vector<1x32xf32>
    %143 = tpu.concatenate %141, %142 in 0 : vector<1x32xf32>, vector<1x32xf32> -> vector<2x32xf32>
    %c0_97 = arith.constant 0 : index
    %c0_98 = arith.constant 0 : index
    %144 = vector.load %arg5[%c0_97, %c0_98] : memref<800x64xf32, #tpu.memory_space<vmem>>, vector<32x64xf32>
    %cst_99 = arith.constant dense<0.000000e+00> : vector<2x64xf32>
    %145 = tpu.matmul %143, %144, %cst_99 {dimension_numbers = #tpu.dot_dimension_numbers<[1], [0], [0], [1], [0, 0, 1, 1], [], []>} : vector<2x32xf32>, vector<32x64xf32>, vector<2x64xf32> -> vector<2x64xf32>
    %146 = arith.addf %140, %145 : vector<2x64xf32>
    %147 = vector.extract_strided_slice %139 {offsets = [1, 0], sizes = [1, 32], strides = [1, 1]} : vector<256x32xf32> to vector<1x32xf32>
    %148 = vector.extract_strided_slice %139 {offsets = [129, 0], sizes = [1, 32], strides = [1, 1]} : vector<256x32xf32> to vector<1x32xf32>
    %149 = tpu.concatenate %147, %148 in 0 : vector<1x32xf32>, vector<1x32xf32> -> vector<2x32xf32>
    %c32_100 = arith.constant 32 : index
    %c0_101 = arith.constant 0 : index
    %150 = vector.load %arg5[%c32_100, %c0_101] : memref<800x64xf32, #tpu.memory_space<vmem>>, vector<32x64xf32>
    %cst_102 = arith.constant dense<0.000000e+00> : vector<2x64xf32>
    %151 = tpu.matmul %149, %150, %cst_102 {dimension_numbers = #tpu.dot_dimension_numbers<[1], [0], [0], [1], [0, 0, 1, 1], [], []>} : vector<2x32xf32>, vector<32x64xf32>, vector<2x64xf32> -> vector<2x64xf32>
    %152 = arith.addf %146, %151 : vector<2x64xf32>
    %153 = vector.extract_strided_slice %139 {offsets = [2, 0], sizes = [1, 32], strides = [1, 1]} : vector<256x32xf32> to vector<1x32xf32>
    %154 = vector.extract_strided_slice %139 {offsets = [130, 0], sizes = [1, 32], strides = [1, 1]} : vector<256x32xf32> to vector<1x32xf32>
    %155 = tpu.concatenate %153, %154 in 0 : vector<1x32xf32>, vector<1x32xf32> -> vector<2x32xf32>
    %c64_103 = arith.constant 64 : index
    %c0_104 = arith.constant 0 : index
    %156 = vector.load %arg5[%c64_103, %c0_104] : memref<800x64xf32, #tpu.memory_space<vmem>>, vector<32x64xf32>
    %cst_105 = arith.constant dense<0.000000e+00> : vector<2x64xf32>
    %157 = tpu.matmul %155, %156, %cst_105 {dimension_numbers = #tpu.dot_dimension_numbers<[1], [0], [0], [1], [0, 0, 1, 1], [], []>} : vector<2x32xf32>, vector<32x64xf32>, vector<2x64xf32> -> vector<2x64xf32>
    %158 = arith.addf %152, %157 : vector<2x64xf32>
    %159 = vector.extract_strided_slice %139 {offsets = [3, 0], sizes = [1, 32], strides = [1, 1]} : vector<256x32xf32> to vector<1x32xf32>
    %160 = vector.extract_strided_slice %139 {offsets = [131, 0], sizes = [1, 32], strides = [1, 1]} : vector<256x32xf32> to vector<1x32xf32>
    %161 = tpu.concatenate %159, %160 in 0 : vector<1x32xf32>, vector<1x32xf32> -> vector<2x32xf32>
    %c96_106 = arith.constant 96 : index
    %c0_107 = arith.constant 0 : index
    %162 = vector.load %arg5[%c96_106, %c0_107] : memref<800x64xf32, #tpu.memory_space<vmem>>, vector<32x64xf32>
    %cst_108 = arith.constant dense<0.000000e+00> : vector<2x64xf32>
    %163 = tpu.matmul %161, %162, %cst_108 {dimension_numbers = #tpu.dot_dimension_numbers<[1], [0], [0], [1], [0, 0, 1, 1], [], []>} : vector<2x32xf32>, vector<32x64xf32>, vector<2x64xf32> -> vector<2x64xf32>
    %164 = arith.addf %158, %163 : vector<2x64xf32>
    %165 = vector.extract_strided_slice %139 {offsets = [4, 0], sizes = [1, 32], strides = [1, 1]} : vector<256x32xf32> to vector<1x32xf32>
    %166 = vector.extract_strided_slice %139 {offsets = [132, 0], sizes = [1, 32], strides = [1, 1]} : vector<256x32xf32> to vector<1x32xf32>
    %167 = tpu.concatenate %165, %166 in 0 : vector<1x32xf32>, vector<1x32xf32> -> vector<2x32xf32>
    %c128_109 = arith.constant 128 : index
    %c0_110 = arith.constant 0 : index
    %168 = vector.load %arg5[%c128_109, %c0_110] : memref<800x64xf32, #tpu.memory_space<vmem>>, vector<32x64xf32>
    %cst_111 = arith.constant dense<0.000000e+00> : vector<2x64xf32>
    %169 = tpu.matmul %167, %168, %cst_111 {dimension_numbers = #tpu.dot_dimension_numbers<[1], [0], [0], [1], [0, 0, 1, 1], [], []>} : vector<2x32xf32>, vector<32x64xf32>, vector<2x64xf32> -> vector<2x64xf32>
    %170 = arith.addf %164, %169 : vector<2x64xf32>
    %171 = vector.extract_strided_slice %139 {offsets = [11, 0], sizes = [1, 32], strides = [1, 1]} : vector<256x32xf32> to vector<1x32xf32>
    %172 = vector.extract_strided_slice %139 {offsets = [139, 0], sizes = [1, 32], strides = [1, 1]} : vector<256x32xf32> to vector<1x32xf32>
    %173 = tpu.concatenate %171, %172 in 0 : vector<1x32xf32>, vector<1x32xf32> -> vector<2x32xf32>
    %c160_112 = arith.constant 160 : index
    %c0_113 = arith.constant 0 : index
    %174 = vector.load %arg5[%c160_112, %c0_113] : memref<800x64xf32, #tpu.memory_space<vmem>>, vector<32x64xf32>
    %cst_114 = arith.constant dense<0.000000e+00> : vector<2x64xf32>
    %175 = tpu.matmul %173, %174, %cst_114 {dimension_numbers = #tpu.dot_dimension_numbers<[1], [0], [0], [1], [0, 0, 1, 1], [], []>} : vector<2x32xf32>, vector<32x64xf32>, vector<2x64xf32> -> vector<2x64xf32>
    %176 = arith.addf %170, %175 : vector<2x64xf32>
    %177 = vector.extract_strided_slice %139 {offsets = [12, 0], sizes = [1, 32], strides = [1, 1]} : vector<256x32xf32> to vector<1x32xf32>
    %178 = vector.extract_strided_slice %139 {offsets = [140, 0], sizes = [1, 32], strides = [1, 1]} : vector<256x32xf32> to vector<1x32xf32>
    %179 = tpu.concatenate %177, %178 in 0 : vector<1x32xf32>, vector<1x32xf32> -> vector<2x32xf32>
    %c192_115 = arith.constant 192 : index
    %c0_116 = arith.constant 0 : index
    %180 = vector.load %arg5[%c192_115, %c0_116] : memref<800x64xf32, #tpu.memory_space<vmem>>, vector<32x64xf32>
    %cst_117 = arith.constant dense<0.000000e+00> : vector<2x64xf32>
    %181 = tpu.matmul %179, %180, %cst_117 {dimension_numbers = #tpu.dot_dimension_numbers<[1], [0], [0], [1], [0, 0, 1, 1], [], []>} : vector<2x32xf32>, vector<32x64xf32>, vector<2x64xf32> -> vector<2x64xf32>
    %182 = arith.addf %176, %181 : vector<2x64xf32>
    %183 = vector.extract_strided_slice %139 {offsets = [13, 0], sizes = [1, 32], strides = [1, 1]} : vector<256x32xf32> to vector<1x32xf32>
    %184 = vector.extract_strided_slice %139 {offsets = [141, 0], sizes = [1, 32], strides = [1, 1]} : vector<256x32xf32> to vector<1x32xf32>
    %185 = tpu.concatenate %183, %184 in 0 : vector<1x32xf32>, vector<1x32xf32> -> vector<2x32xf32>
    %c224_118 = arith.constant 224 : index
    %c0_119 = arith.constant 0 : index
    %186 = vector.load %arg5[%c224_118, %c0_119] : memref<800x64xf32, #tpu.memory_space<vmem>>, vector<32x64xf32>
    %cst_120 = arith.constant dense<0.000000e+00> : vector<2x64xf32>
    %187 = tpu.matmul %185, %186, %cst_120 {dimension_numbers = #tpu.dot_dimension_numbers<[1], [0], [0], [1], [0, 0, 1, 1], [], []>} : vector<2x32xf32>, vector<32x64xf32>, vector<2x64xf32> -> vector<2x64xf32>
    %188 = arith.addf %182, %187 : vector<2x64xf32>
    %189 = vector.extract_strided_slice %139 {offsets = [14, 0], sizes = [1, 32], strides = [1, 1]} : vector<256x32xf32> to vector<1x32xf32>
    %190 = vector.extract_strided_slice %139 {offsets = [142, 0], sizes = [1, 32], strides = [1, 1]} : vector<256x32xf32> to vector<1x32xf32>
    %191 = tpu.concatenate %189, %190 in 0 : vector<1x32xf32>, vector<1x32xf32> -> vector<2x32xf32>
    %c256_121 = arith.constant 256 : index
    %c0_122 = arith.constant 0 : index
    %192 = vector.load %arg5[%c256_121, %c0_122] : memref<800x64xf32, #tpu.memory_space<vmem>>, vector<32x64xf32>
    %cst_123 = arith.constant dense<0.000000e+00> : vector<2x64xf32>
    %193 = tpu.matmul %191, %192, %cst_123 {dimension_numbers = #tpu.dot_dimension_numbers<[1], [0], [0], [1], [0, 0, 1, 1], [], []>} : vector<2x32xf32>, vector<32x64xf32>, vector<2x64xf32> -> vector<2x64xf32>
    %194 = arith.addf %188, %193 : vector<2x64xf32>
    %195 = vector.extract_strided_slice %139 {offsets = [15, 0], sizes = [1, 32], strides = [1, 1]} : vector<256x32xf32> to vector<1x32xf32>
    %196 = vector.extract_strided_slice %139 {offsets = [143, 0], sizes = [1, 32], strides = [1, 1]} : vector<256x32xf32> to vector<1x32xf32>
    %197 = tpu.concatenate %195, %196 in 0 : vector<1x32xf32>, vector<1x32xf32> -> vector<2x32xf32>
    %c288_124 = arith.constant 288 : index
    %c0_125 = arith.constant 0 : index
    %198 = vector.load %arg5[%c288_124, %c0_125] : memref<800x64xf32, #tpu.memory_space<vmem>>, vector<32x64xf32>
    %cst_126 = arith.constant dense<0.000000e+00> : vector<2x64xf32>
    %199 = tpu.matmul %197, %198, %cst_126 {dimension_numbers = #tpu.dot_dimension_numbers<[1], [0], [0], [1], [0, 0, 1, 1], [], []>} : vector<2x32xf32>, vector<32x64xf32>, vector<2x64xf32> -> vector<2x64xf32>
    %200 = arith.addf %194, %199 : vector<2x64xf32>
    %201 = vector.extract_strided_slice %139 {offsets = [22, 0], sizes = [1, 32], strides = [1, 1]} : vector<256x32xf32> to vector<1x32xf32>
    %202 = vector.extract_strided_slice %139 {offsets = [150, 0], sizes = [1, 32], strides = [1, 1]} : vector<256x32xf32> to vector<1x32xf32>
    %203 = tpu.concatenate %201, %202 in 0 : vector<1x32xf32>, vector<1x32xf32> -> vector<2x32xf32>
    %c320_127 = arith.constant 320 : index
    %c0_128 = arith.constant 0 : index
    %204 = vector.load %arg5[%c320_127, %c0_128] : memref<800x64xf32, #tpu.memory_space<vmem>>, vector<32x64xf32>
    %cst_129 = arith.constant dense<0.000000e+00> : vector<2x64xf32>
    %205 = tpu.matmul %203, %204, %cst_129 {dimension_numbers = #tpu.dot_dimension_numbers<[1], [0], [0], [1], [0, 0, 1, 1], [], []>} : vector<2x32xf32>, vector<32x64xf32>, vector<2x64xf32> -> vector<2x64xf32>
    %206 = arith.addf %200, %205 : vector<2x64xf32>
    %207 = vector.extract_strided_slice %139 {offsets = [23, 0], sizes = [1, 32], strides = [1, 1]} : vector<256x32xf32> to vector<1x32xf32>
    %208 = vector.extract_strided_slice %139 {offsets = [151, 0], sizes = [1, 32], strides = [1, 1]} : vector<256x32xf32> to vector<1x32xf32>
    %209 = tpu.concatenate %207, %208 in 0 : vector<1x32xf32>, vector<1x32xf32> -> vector<2x32xf32>
    %c352_130 = arith.constant 352 : index
    %c0_131 = arith.constant 0 : index
    %210 = vector.load %arg5[%c352_130, %c0_131] : memref<800x64xf32, #tpu.memory_space<vmem>>, vector<32x64xf32>
    %cst_132 = arith.constant dense<0.000000e+00> : vector<2x64xf32>
    %211 = tpu.matmul %209, %210, %cst_132 {dimension_numbers = #tpu.dot_dimension_numbers<[1], [0], [0], [1], [0, 0, 1, 1], [], []>} : vector<2x32xf32>, vector<32x64xf32>, vector<2x64xf32> -> vector<2x64xf32>
    %212 = arith.addf %206, %211 : vector<2x64xf32>
    %213 = vector.extract_strided_slice %139 {offsets = [24, 0], sizes = [1, 32], strides = [1, 1]} : vector<256x32xf32> to vector<1x32xf32>
    %214 = vector.extract_strided_slice %139 {offsets = [152, 0], sizes = [1, 32], strides = [1, 1]} : vector<256x32xf32> to vector<1x32xf32>
    %215 = tpu.concatenate %213, %214 in 0 : vector<1x32xf32>, vector<1x32xf32> -> vector<2x32xf32>
    %c384_133 = arith.constant 384 : index
    %c0_134 = arith.constant 0 : index
    %216 = vector.load %arg5[%c384_133, %c0_134] : memref<800x64xf32, #tpu.memory_space<vmem>>, vector<32x64xf32>
    %cst_135 = arith.constant dense<0.000000e+00> : vector<2x64xf32>
    %217 = tpu.matmul %215, %216, %cst_135 {dimension_numbers = #tpu.dot_dimension_numbers<[1], [0], [0], [1], [0, 0, 1, 1], [], []>} : vector<2x32xf32>, vector<32x64xf32>, vector<2x64xf32> -> vector<2x64xf32>
    %218 = arith.addf %212, %217 : vector<2x64xf32>
    %219 = vector.extract_strided_slice %139 {offsets = [25, 0], sizes = [1, 32], strides = [1, 1]} : vector<256x32xf32> to vector<1x32xf32>
    %220 = vector.extract_strided_slice %139 {offsets = [153, 0], sizes = [1, 32], strides = [1, 1]} : vector<256x32xf32> to vector<1x32xf32>
    %221 = tpu.concatenate %219, %220 in 0 : vector<1x32xf32>, vector<1x32xf32> -> vector<2x32xf32>
    %c416_136 = arith.constant 416 : index
    %c0_137 = arith.constant 0 : index
    %222 = vector.load %arg5[%c416_136, %c0_137] : memref<800x64xf32, #tpu.memory_space<vmem>>, vector<32x64xf32>
    %cst_138 = arith.constant dense<0.000000e+00> : vector<2x64xf32>
    %223 = tpu.matmul %221, %222, %cst_138 {dimension_numbers = #tpu.dot_dimension_numbers<[1], [0], [0], [1], [0, 0, 1, 1], [], []>} : vector<2x32xf32>, vector<32x64xf32>, vector<2x64xf32> -> vector<2x64xf32>
    %224 = arith.addf %218, %223 : vector<2x64xf32>
    %225 = vector.extract_strided_slice %139 {offsets = [26, 0], sizes = [1, 32], strides = [1, 1]} : vector<256x32xf32> to vector<1x32xf32>
    %226 = vector.extract_strided_slice %139 {offsets = [154, 0], sizes = [1, 32], strides = [1, 1]} : vector<256x32xf32> to vector<1x32xf32>
    %227 = tpu.concatenate %225, %226 in 0 : vector<1x32xf32>, vector<1x32xf32> -> vector<2x32xf32>
    %c448_139 = arith.constant 448 : index
    %c0_140 = arith.constant 0 : index
    %228 = vector.load %arg5[%c448_139, %c0_140] : memref<800x64xf32, #tpu.memory_space<vmem>>, vector<32x64xf32>
    %cst_141 = arith.constant dense<0.000000e+00> : vector<2x64xf32>
    %229 = tpu.matmul %227, %228, %cst_141 {dimension_numbers = #tpu.dot_dimension_numbers<[1], [0], [0], [1], [0, 0, 1, 1], [], []>} : vector<2x32xf32>, vector<32x64xf32>, vector<2x64xf32> -> vector<2x64xf32>
    %230 = arith.addf %224, %229 : vector<2x64xf32>
    %231 = vector.extract_strided_slice %139 {offsets = [33, 0], sizes = [1, 32], strides = [1, 1]} : vector<256x32xf32> to vector<1x32xf32>
    %232 = vector.extract_strided_slice %139 {offsets = [161, 0], sizes = [1, 32], strides = [1, 1]} : vector<256x32xf32> to vector<1x32xf32>
    %233 = tpu.concatenate %231, %232 in 0 : vector<1x32xf32>, vector<1x32xf32> -> vector<2x32xf32>
    %c480_142 = arith.constant 480 : index
    %c0_143 = arith.constant 0 : index
    %234 = vector.load %arg5[%c480_142, %c0_143] : memref<800x64xf32, #tpu.memory_space<vmem>>, vector<32x64xf32>
    %cst_144 = arith.constant dense<0.000000e+00> : vector<2x64xf32>
    %235 = tpu.matmul %233, %234, %cst_144 {dimension_numbers = #tpu.dot_dimension_numbers<[1], [0], [0], [1], [0, 0, 1, 1], [], []>} : vector<2x32xf32>, vector<32x64xf32>, vector<2x64xf32> -> vector<2x64xf32>
    %236 = arith.addf %230, %235 : vector<2x64xf32>
    %237 = vector.extract_strided_slice %139 {offsets = [34, 0], sizes = [1, 32], strides = [1, 1]} : vector<256x32xf32> to vector<1x32xf32>
    %238 = vector.extract_strided_slice %139 {offsets = [162, 0], sizes = [1, 32], strides = [1, 1]} : vector<256x32xf32> to vector<1x32xf32>
    %239 = tpu.concatenate %237, %238 in 0 : vector<1x32xf32>, vector<1x32xf32> -> vector<2x32xf32>
    %c512 = arith.constant 512 : index
    %c0_145 = arith.constant 0 : index
    %240 = vector.load %arg5[%c512, %c0_145] : memref<800x64xf32, #tpu.memory_space<vmem>>, vector<32x64xf32>
    %cst_146 = arith.constant dense<0.000000e+00> : vector<2x64xf32>
    %241 = tpu.matmul %239, %240, %cst_146 {dimension_numbers = #tpu.dot_dimension_numbers<[1], [0], [0], [1], [0, 0, 1, 1], [], []>} : vector<2x32xf32>, vector<32x64xf32>, vector<2x64xf32> -> vector<2x64xf32>
    %242 = arith.addf %236, %241 : vector<2x64xf32>
    %243 = vector.extract_strided_slice %139 {offsets = [35, 0], sizes = [1, 32], strides = [1, 1]} : vector<256x32xf32> to vector<1x32xf32>
    %244 = vector.extract_strided_slice %139 {offsets = [163, 0], sizes = [1, 32], strides = [1, 1]} : vector<256x32xf32> to vector<1x32xf32>
    %245 = tpu.concatenate %243, %244 in 0 : vector<1x32xf32>, vector<1x32xf32> -> vector<2x32xf32>
    %c544 = arith.constant 544 : index
    %c0_147 = arith.constant 0 : index
    %246 = vector.load %arg5[%c544, %c0_147] : memref<800x64xf32, #tpu.memory_space<vmem>>, vector<32x64xf32>
    %cst_148 = arith.constant dense<0.000000e+00> : vector<2x64xf32>
    %247 = tpu.matmul %245, %246, %cst_148 {dimension_numbers = #tpu.dot_dimension_numbers<[1], [0], [0], [1], [0, 0, 1, 1], [], []>} : vector<2x32xf32>, vector<32x64xf32>, vector<2x64xf32> -> vector<2x64xf32>
    %248 = arith.addf %242, %247 : vector<2x64xf32>
    %249 = vector.extract_strided_slice %139 {offsets = [36, 0], sizes = [1, 32], strides = [1, 1]} : vector<256x32xf32> to vector<1x32xf32>
    %250 = vector.extract_strided_slice %139 {offsets = [164, 0], sizes = [1, 32], strides = [1, 1]} : vector<256x32xf32> to vector<1x32xf32>
    %251 = tpu.concatenate %249, %250 in 0 : vector<1x32xf32>, vector<1x32xf32> -> vector<2x32xf32>
    %c576 = arith.constant 576 : index
    %c0_149 = arith.constant 0 : index
    %252 = vector.load %arg5[%c576, %c0_149] : memref<800x64xf32, #tpu.memory_space<vmem>>, vector<32x64xf32>
    %cst_150 = arith.constant dense<0.000000e+00> : vector<2x64xf32>
    %253 = tpu.matmul %251, %252, %cst_150 {dimension_numbers = #tpu.dot_dimension_numbers<[1], [0], [0], [1], [0, 0, 1, 1], [], []>} : vector<2x32xf32>, vector<32x64xf32>, vector<2x64xf32> -> vector<2x64xf32>
    %254 = arith.addf %248, %253 : vector<2x64xf32>
    %255 = vector.extract_strided_slice %139 {offsets = [37, 0], sizes = [1, 32], strides = [1, 1]} : vector<256x32xf32> to vector<1x32xf32>
    %256 = vector.extract_strided_slice %139 {offsets = [165, 0], sizes = [1, 32], strides = [1, 1]} : vector<256x32xf32> to vector<1x32xf32>
    %257 = tpu.concatenate %255, %256 in 0 : vector<1x32xf32>, vector<1x32xf32> -> vector<2x32xf32>
    %c608 = arith.constant 608 : index
    %c0_151 = arith.constant 0 : index
    %258 = vector.load %arg5[%c608, %c0_151] : memref<800x64xf32, #tpu.memory_space<vmem>>, vector<32x64xf32>
    %cst_152 = arith.constant dense<0.000000e+00> : vector<2x64xf32>
    %259 = tpu.matmul %257, %258, %cst_152 {dimension_numbers = #tpu.dot_dimension_numbers<[1], [0], [0], [1], [0, 0, 1, 1], [], []>} : vector<2x32xf32>, vector<32x64xf32>, vector<2x64xf32> -> vector<2x64xf32>
    %260 = arith.addf %254, %259 : vector<2x64xf32>
    %261 = vector.extract_strided_slice %139 {offsets = [44, 0], sizes = [1, 32], strides = [1, 1]} : vector<256x32xf32> to vector<1x32xf32>
    %262 = vector.extract_strided_slice %139 {offsets = [172, 0], sizes = [1, 32], strides = [1, 1]} : vector<256x32xf32> to vector<1x32xf32>
    %263 = tpu.concatenate %261, %262 in 0 : vector<1x32xf32>, vector<1x32xf32> -> vector<2x32xf32>
    %c640 = arith.constant 640 : index
    %c0_153 = arith.constant 0 : index
    %264 = vector.load %arg5[%c640, %c0_153] : memref<800x64xf32, #tpu.memory_space<vmem>>, vector<32x64xf32>
    %cst_154 = arith.constant dense<0.000000e+00> : vector<2x64xf32>
    %265 = tpu.matmul %263, %264, %cst_154 {dimension_numbers = #tpu.dot_dimension_numbers<[1], [0], [0], [1], [0, 0, 1, 1], [], []>} : vector<2x32xf32>, vector<32x64xf32>, vector<2x64xf32> -> vector<2x64xf32>
    %266 = arith.addf %260, %265 : vector<2x64xf32>
    %267 = vector.extract_strided_slice %139 {offsets = [45, 0], sizes = [1, 32], strides = [1, 1]} : vector<256x32xf32> to vector<1x32xf32>
    %268 = vector.extract_strided_slice %139 {offsets = [173, 0], sizes = [1, 32], strides = [1, 1]} : vector<256x32xf32> to vector<1x32xf32>
    %269 = tpu.concatenate %267, %268 in 0 : vector<1x32xf32>, vector<1x32xf32> -> vector<2x32xf32>
    %c672 = arith.constant 672 : index
    %c0_155 = arith.constant 0 : index
    %270 = vector.load %arg5[%c672, %c0_155] : memref<800x64xf32, #tpu.memory_space<vmem>>, vector<32x64xf32>
    %cst_156 = arith.constant dense<0.000000e+00> : vector<2x64xf32>
    %271 = tpu.matmul %269, %270, %cst_156 {dimension_numbers = #tpu.dot_dimension_numbers<[1], [0], [0], [1], [0, 0, 1, 1], [], []>} : vector<2x32xf32>, vector<32x64xf32>, vector<2x64xf32> -> vector<2x64xf32>
    %272 = arith.addf %266, %271 : vector<2x64xf32>
    %273 = vector.extract_strided_slice %139 {offsets = [46, 0], sizes = [1, 32], strides = [1, 1]} : vector<256x32xf32> to vector<1x32xf32>
    %274 = vector.extract_strided_slice %139 {offsets = [174, 0], sizes = [1, 32], strides = [1, 1]} : vector<256x32xf32> to vector<1x32xf32>
    %275 = tpu.concatenate %273, %274 in 0 : vector<1x32xf32>, vector<1x32xf32> -> vector<2x32xf32>
    %c704 = arith.constant 704 : index
    %c0_157 = arith.constant 0 : index
    %276 = vector.load %arg5[%c704, %c0_157] : memref<800x64xf32, #tpu.memory_space<vmem>>, vector<32x64xf32>
    %cst_158 = arith.constant dense<0.000000e+00> : vector<2x64xf32>
    %277 = tpu.matmul %275, %276, %cst_158 {dimension_numbers = #tpu.dot_dimension_numbers<[1], [0], [0], [1], [0, 0, 1, 1], [], []>} : vector<2x32xf32>, vector<32x64xf32>, vector<2x64xf32> -> vector<2x64xf32>
    %278 = arith.addf %272, %277 : vector<2x64xf32>
    %279 = vector.extract_strided_slice %139 {offsets = [47, 0], sizes = [1, 32], strides = [1, 1]} : vector<256x32xf32> to vector<1x32xf32>
    %280 = vector.extract_strided_slice %139 {offsets = [175, 0], sizes = [1, 32], strides = [1, 1]} : vector<256x32xf32> to vector<1x32xf32>
    %281 = tpu.concatenate %279, %280 in 0 : vector<1x32xf32>, vector<1x32xf32> -> vector<2x32xf32>
    %c736 = arith.constant 736 : index
    %c0_159 = arith.constant 0 : index
    %282 = vector.load %arg5[%c736, %c0_159] : memref<800x64xf32, #tpu.memory_space<vmem>>, vector<32x64xf32>
    %cst_160 = arith.constant dense<0.000000e+00> : vector<2x64xf32>
    %283 = tpu.matmul %281, %282, %cst_160 {dimension_numbers = #tpu.dot_dimension_numbers<[1], [0], [0], [1], [0, 0, 1, 1], [], []>} : vector<2x32xf32>, vector<32x64xf32>, vector<2x64xf32> -> vector<2x64xf32>
    %284 = arith.addf %278, %283 : vector<2x64xf32>
    %285 = vector.extract_strided_slice %139 {offsets = [48, 0], sizes = [1, 32], strides = [1, 1]} : vector<256x32xf32> to vector<1x32xf32>
    %286 = vector.extract_strided_slice %139 {offsets = [176, 0], sizes = [1, 32], strides = [1, 1]} : vector<256x32xf32> to vector<1x32xf32>
    %287 = tpu.concatenate %285, %286 in 0 : vector<1x32xf32>, vector<1x32xf32> -> vector<2x32xf32>
    %c768 = arith.constant 768 : index
    %c0_161 = arith.constant 0 : index
    %288 = vector.load %arg5[%c768, %c0_161] : memref<800x64xf32, #tpu.memory_space<vmem>>, vector<32x64xf32>
    %cst_162 = arith.constant dense<0.000000e+00> : vector<2x64xf32>
    %289 = tpu.matmul %287, %288, %cst_162 {dimension_numbers = #tpu.dot_dimension_numbers<[1], [0], [0], [1], [0, 0, 1, 1], [], []>} : vector<2x32xf32>, vector<32x64xf32>, vector<2x64xf32> -> vector<2x64xf32>
    %290 = arith.addf %284, %289 : vector<2x64xf32>
    %c0_163 = arith.constant 0 : index
    %c0_164 = arith.constant 0 : index
    %291 = vector.load %arg6[%c0_163, %c0_164] : memref<1x64xf32, #tpu.memory_space<vmem>>, vector<1x64xf32>
    %292 = vector.broadcast %291 : vector<1x64xf32> to vector<2x64xf32>
    %293 = arith.addf %290, %292 : vector<2x64xf32>
    %cst_165 = arith.constant 0.000000e+00 : f32
    %294 = vector.broadcast %cst_165 : f32 to vector<2x64xf32>
    %295 = arith.maximumf %293, %294 : vector<2x64xf32>
    %c0_166 = arith.constant 0 : index
    %c0_167 = arith.constant 0 : index
    %296 = vector.load %arg7[%c0_166, %c0_167] : memref<64x4xf32, #tpu.memory_space<vmem>>, vector<64x4xf32>
    %cst_168 = arith.constant dense<0.000000e+00> : vector<2x4xf32>
    %297 = tpu.matmul %295, %296, %cst_168 {dimension_numbers = #tpu.dot_dimension_numbers<[1], [0], [0], [1], [0, 0, 1, 1], [], []>} : vector<2x64xf32>, vector<64x4xf32>, vector<2x4xf32> -> vector<2x4xf32>
    %c0_169 = arith.constant 0 : index
    %c0_170 = arith.constant 0 : index
    %298 = vector.load %arg8[%c0_169, %c0_170] : memref<1x4xf32, #tpu.memory_space<vmem>>, vector<1x4xf32>
    %299 = vector.broadcast %298 : vector<1x4xf32> to vector<2x4xf32>
    %300 = arith.addf %297, %299 : vector<2x4xf32>
    %c0_171 = arith.constant 0 : index
    %c0_172 = arith.constant 0 : index
    %301 = vector.load %arg9[%c0_171, %c0_172] : memref<2x4xf32, #tpu.memory_space<vmem>>, vector<2x4xf32>
    tpu.vector_store %arg9[%c0_171, %c0_172], %300 {strides = array<i32>} : memref<2x4xf32, #tpu.memory_space<vmem>>, vector<2x4xf32>,
    return
  }
}

</mosaic_0001>

<bundles_post_ra>
// kernel: dqn_forward.1
= control target key start
LH: loop header
LB: loop body
LE: loop exit
PB: predicated region body
PF: predicated region fallthrough
CT: control target
= control target key end

     0   :  { %s7134_s11 = smov 127   ;;  %s7135_s12 = smov 126   ;;  %s8828_s0 = inlined_call_operand.vmem [shape: f32[4,256], index: 0, kind: input, shape index: {}]   ;;  %s8829_s1 = inlined_call_operand.vmem [shape: f32[256,4], index: 1, kind: input, shape index: {}]   ;;  %s8830_s2 = inlined_call_operand.vmem [shape: f32[16,1], index: 2, kind: input, shape index: {}]   ;;  %s8831_s3 = inlined_call_operand.vmem [shape: f32[512,16], index: 3, kind: input, shape index: {}]   ;;  %s8832_s4 = inlined_call_operand.vmem [shape: f32[32,1], index: 4, kind: input, shape index: {}]   ;;  %s8833_s5 = inlined_call_operand.vmem [shape: f32[800,64], index: 5, kind: input, shape index: {}]   ;;  %s8834_s6 = inlined_call_operand.vmem [shape: f32[1,64], index: 6, kind: input, shape index: {}]   ;;  %s8835_s7 = inlined_call_operand.vmem [shape: f32[64,4], index: 7, kind: input, shape index: {}]   ;;  %s8836_s8 = inlined_call_operand.vmem [shape: f32[1,4], index: 8, kind: input, shape index: {}]   ;;  %s8837_s9 = inlined_call_operand.hbm [shape: f32[2,4], index: 9, kind: output, shape index: {}]  }
   0x1   :  { %v7207_v0 = vld [vmem:[%s8828_s0] sm:$0xff] }
   0x2   :  { %41 = vrot.lane.b32.xlu0 %v7207_v0, %s7134_s11  ;;  %v7213_v1 = vcombine.high %v7207_v0, %v7207_v0  ;;  %230 = vrot.lane.b32.xlu1 %v7207_v0, %s7135_s12 }
   0x3   :  { %14 = vsyncpa [#allocation3], 0  ;;  %v7136_v2 = vmov 0.0   ;;  %s7137_s0 = smov 125   ;;  %s7138_s13 = smov 117   ;;  %v45_v3 = vlaneseq  ;;  %vm57_vm1 = vcmask 1043456  }
   0x4   :  { %128 = vmatprep.mubr.f32.mxu0 %v7136_v2  ;;  %134 = vmatprep.mubr.f32.mxu1 %v7136_v2  ;;  %s7139_s14 = smov 116   ;;  %s7140_s15 = smov 115   ;;  %v36_v11 = vld [vmem:[%s8829_s1 + $0x10] sm:$0xff]  ;;  %vm50_vm3 = vcmask 31744   ;;  %v7150_v12 = vmov 0   ;;  %v37_v14 = vld [vmem:[%s8829_s1 + $0x18] sm:$0xff] }
   0x5   :  { %s7141_s16 = smov 114   ;;  %s7142_s17 = smov 106   ;;  %v7275_v4 = vand.u32 127, %v45_v3  ;;  %6957 = vset.pattern.permute.xlu0 %v7150_v12  ;;  %v1656_v15 = vld [vmem:[%s8830_s2] sm:$0xff]  ;;  %v1657_v16 = vld [vmem:[%s8830_s2 + $0x8] sm:$0xff]  ;;  %6958 = vset.pattern.permute.xlu1 %v7150_v12  ;;  %v330_v31 = vld [vmem:[%s8829_s1 + $0x30] sm:$0xff] }
   0x6   :  { %43 = vrot.lane.b32.xlu0 %v7213_v1, %s7134_s11  ;;  %232 = vrot.lane.b32.xlu1 %v7213_v1, %s7135_s12  ;;  %s7143_s18 = smov 105   ;;  %s7144_s19 = smov 104   ;;  %v34_v19 = vld [vmem:[%s8829_s1] sm:$0xff]  ;;  %v35_v22 = vld [vmem:[%s8829_s1 + $0x8] sm:$0xff] }
   0x7   :  { %s7145_s20 = smov 103   ;;  %s7146_s21 = smov 95   ;;  %vm47_vm0 = vcmp.lt.s32.totalorder %v7275_v4, 127  ;;  %vm234_vm2 = vcmp.lt.s32.totalorder %v7275_v4, 126  ;;  %vm336_vm4 = vcmp.lt.s32.totalorder %v7275_v4, 125  ;;  %vm438_vm5 = vcmp.lt.s32.totalorder %v7275_v4, 117 }
   0x8   :  { %s7147_s22 = smov 94   ;;  %s7148_s23 = smov 93   ;;  %v228_v25 = vld [vmem:[%s8829_s1 + $0x20] sm:$0xff]  ;;  %v229_v28 = vld [vmem:[%s8829_s1 + $0x28] sm:$0xff]  ;;  %vm540_vm6 = vcmp.lt.s32.totalorder %v7275_v4, 116  ;;  %v331_v34 = vld [vmem:[%s8829_s1 + $0x38] sm:$0xff] }
   0x9   :  { %s7149_s24 = smov 92   ;;  %vm642_vm7 = vcmp.lt.s32.totalorder %v7275_v4, 115  ;;  %v432_v37 = vld [vmem:[%s8829_s1 + $0x40] sm:$0xff]  ;;  %v433_v40 = vld [vmem:[%s8829_s1 + $0x48] sm:$0xff]  ;;  %vm8838_vm8 = vcmp.lt.s32.totalorder %v7275_v4, 114  ;;  %v534_v43 = vld [vmem:[%s8829_s1 + $0x50] sm:$0xff] }
   0xa   :  { %334 = vrot.lane.b32.xlu1 %v7213_v1, %s7137_s0  ;;  %332 = vrot.lane.b32.xlu0 %v7207_v0, %s7137_s0  ;;  %v535_v46 = vld [vmem:[%s8829_s1 + $0x58] sm:$0xff]  ;;  %vm846_vm9 = vcmp.lt.s32.totalorder %v7275_v4, 106  ;;  %v636_v49 = vld [vmem:[%s8829_s1 + $0x60] sm:$0xff]  ;;  %vm948_vm10 = vcmp.lt.s32.totalorder %v7275_v4, 105  ;;  %vm1050_vm11 = vcmp.lt.s32.totalorder %v7275_v4, 104  ;;  %vm1152_vm12 = vcmp.lt.s32.totalorder %v7275_v4, 103 }
   0xb   :  { %v637_v52 = vld [vmem:[%s8829_s1 + $0x68] sm:$0xff]  ;;  %v738_v55 = vld [vmem:[%s8829_s1 + $0x70] sm:$0xff]  ;;  %v739_v58 = vld [vmem:[%s8829_s1 + $0x78] sm:$0xff]  ;;  %vm1254_vm13 = vcmp.lt.s32.totalorder %v7275_v4, 95  ;;  %vm1356_vm14 = vcmp.lt.s32.totalorder %v7275_v4, 94  ;;  %vm1458_vm15 = vcmp.lt.s32.totalorder %v7275_v4, 93 }
   0xc   :  { %v840_v61 = vld [vmem:[%s8829_s1 + $0x80] sm:$0xff]  ;;  %s7153_s25 = smov [#allocation2]  }
   0xd   :  { %s5935_s26 = sshll.u32 %s7153_s25, 4  ;;  %s5936_s26 = int_to_ptr.vmem [resolvable:$true] %s5935_s26 }
   0xe   :  { %436 = vrot.lane.b32.xlu1 %v7213_v1, %s7138_s13  ;;  %434 = vrot.lane.b32.xlu0 %v7207_v0, %s7138_s13  ;;  %s7110_s27 = scalar_lea.vmem %s5936_s26, 32  ;;  %p7115_p1 = scmp.lt.s32.totalorder %s5936_s26, %s5936_s26 }
   0xf   :  { %p7111_p0 = scmp.ne.s32.totalorder %s5936_s26, %s7110_s27  ;;  %p7116_p2 = scmp.lt.s32.totalorder %s7110_s27, %s7110_s27 }
  0x11   :  { %p7117_p3 = por %p7116_p2, %p7115_p1 }
  0x12   :  { %538 = vrot.lane.b32.xlu1 %v7213_v1, %s7139_s14  ;;  %536 = vrot.lane.b32.xlu0 %v7207_v0, %s7139_s14 }
  0x13   :  { %p7118_p4 = pnand %p7117_p3, %p7111_p0 }
  0x16   :  { %640 = vrot.lane.b32.xlu1 %v7213_v1, %s7140_s15  ;;  %638 = vrot.lane.b32.xlu0 %v7207_v0, %s7140_s15 }
  0x1a   :  { %742 = vrot.lane.b32.xlu1 %v7213_v1, %s7141_s16  ;;  %740 = vrot.lane.b32.xlu0 %v7207_v0, %s7141_s16 }
  0x1e   :  { %844 = vrot.lane.b32.xlu1 %v7213_v1, %s7142_s17  ;;  %842 = vrot.lane.b32.xlu0 %v7207_v0, %s7142_s17 }
  0x22   :  { %946 = vrot.lane.b32.xlu1 %v7213_v1, %s7143_s18  ;;  %944 = vrot.lane.b32.xlu0 %v7207_v0, %s7143_s18 }
  0x26   :  { %1048 = vrot.lane.b32.xlu1 %v7213_v1, %s7144_s19  ;;  %1046 = vrot.lane.b32.xlu0 %v7207_v0, %s7144_s19 }
  0x2a   :  { %1150 = vrot.lane.b32.xlu1 %v7213_v1, %s7145_s20  ;;  %1148 = vrot.lane.b32.xlu0 %v7207_v0, %s7145_s20 }
  0x2e   :  { %1252 = vrot.lane.b32.xlu1 %v7213_v1, %s7146_s21  ;;  %1250 = vrot.lane.b32.xlu0 %v7207_v0, %s7146_s21 }
  0x32   :  { %1354 = vrot.lane.b32.xlu1 %v7213_v1, %s7147_s22  ;;  %1352 = vrot.lane.b32.xlu0 %v7207_v0, %s7147_s22 }
  0x36   :  { %1456 = vrot.lane.b32.xlu1 %v7213_v1, %s7148_s23  ;;  %1454 = vrot.lane.b32.xlu0 %v7207_v0, %s7148_s23 }
  0x3a   :  { %1558 = vrot.lane.b32.xlu1 %v7213_v1, %s7149_s24  ;;  %1556 = vrot.lane.b32.xlu0 %v7207_v0, %s7149_s24 }
  0x3e   :  { %1660 = vperm.xlu0 %6957, %v1656_v15   ;;  %1665 = vperm.xlu1 %6958, %v1657_v16  }
  0x74   :  { %v42_v5 = vpop.permute.xlu0 %41  ;;  %v231_v6 = vpop.permute.xlu1 %230 }
  0x78   :  { %v44_v7 = vpop.permute.xlu0 %43  ;;  %v233_v8 = vpop.permute.xlu1 %232 }
  0x79   :  { %v49_v9 = vsel %vm47_vm0, %v44_v7, %v42_v5  ;;  %v48_v10 = vsel %vm47_vm0, %v42_v5, %v44_v7  ;;  %v236_v13 = vsel %vm234_vm2, %v233_v8, %v231_v6  ;;  %v235_v20 = vsel %vm234_vm2, %v231_v6, %v233_v8  ;;  %v942_v5 = vld [vmem:[%s8829_s1 + $0x90] sm:$0xff]  ;;  %v943_v8 = vld [vmem:[%s8829_s1 + $0x98] sm:$0xff] }
  0x7a   :  { %5943 = vmatprep.subr.msk.mxu0 %vm57_vm1, %v49_v9  ;;  %6753 = vmatprep.subr.msk.mxu1 %vm57_vm1, %v49_v9 }
  0x7b   :  { %5944 = vmatpush1.msk.msra.mxu0 %vm57_vm1, %v48_v10  ;;  %6754 = vmatpush1.msk.msra.mxu1 %vm57_vm1, %v48_v10 }
  0x7c   :  { %5945 = vmatmul.mubr.msk.f32.vlgmr.msra.gmra.mrb[0].mxu0 %vm50_vm3, %v36_v11  ;;  %5947 = vmatprep.subr.msk.mxu0 %vm57_vm1, %v7213_v1  ;;  %v335_v17 = vpop.permute.xlu1 %334  ;;  %v333_v18 = vpop.permute.xlu0 %332  ;;  %v1044_v11 = vld [vmem:[%s8829_s1 + $0xa0] sm:$0xff] }
  0x7d   :  { %5948 = vmatpush1.msk.msra.mxu0 %vm57_vm1, %v7207_v0  ;;  %215 = vmatprep.mubr.f32.mxu0 %v7136_v2  ;;  %v338_v21 = vsel %vm336_vm4, %v335_v17, %v333_v18  ;;  %v337_v26 = vsel %vm336_vm4, %v333_v18, %v335_v17  ;;  %v841_v0 = vld [vmem:[%s8829_s1 + $0x88] sm:$0xff]  ;;  %v1146_v17 = vld [vmem:[%s8829_s1 + $0xb0] sm:$0xff] }
  0x7e   :  { %5951 = vmatprep.subr.msk.mxu0 %vm57_vm1, %v236_v13  ;;  %5946 = vmatmul.mubr.msk.f32.vlgmr.msra.gmra.mrb[0].mxu1 %vm50_vm3, %v37_v14  ;;  %v1045_v14 = vld [vmem:[%s8829_s1 + $0xa8] sm:$0xff] }
  0x7f   :  { %1773 = vmatprep.mubr.f32.mxu1 %v7136_v2 }
  0x80   :  { %v437_v23 = vpop.permute.xlu1 %436  ;;  %v435_v24 = vpop.permute.xlu0 %434 }
  0x81   :  { %v440_v27 = vsel %vm438_vm5, %v437_v23, %v435_v24  ;;  %v439_v32 = vsel %vm438_vm5, %v435_v24, %v437_v23  ;;  %v1248_v23 = vld [vmem:[%s8829_s1 + $0xc0] sm:$0xff] }
  0x84   :  { %5949 = vmatmul.mubr.msk.f32.vlgmr.msra.gmra.mrb[0].mxu0 %vm50_vm3, %v34_v19  ;;  %v539_v29 = vpop.permute.xlu1 %538  ;;  %v537_v30 = vpop.permute.xlu0 %536 }
  0x85   :  { %5952 = vmatpush1.msk.msra.mxu0 %vm57_vm1, %v235_v20  ;;  %221 = vmatprep.mubr.f32.mxu0 %v7136_v2  ;;  %v542_v33 = vsel %vm540_vm6, %v539_v29, %v537_v30  ;;  %v541_v38 = vsel %vm540_vm6, %v537_v30, %v539_v29  ;;  %v1147_v20 = vld [vmem:[%s8829_s1 + $0xb8] sm:$0xff]  ;;  %v1350_v29 = vld [vmem:[%s8829_s1 + $0xd0] sm:$0xff] }
  0x86   :  { %5955 = vmatprep.subr.msk.mxu0 %vm57_vm1, %v338_v21 }
  0x88   :  { %5950 = vmatmul.mubr.msk.f32.gmra.mrb[2].mxu0 %vm50_vm3, %v35_v22  ;;  %v641_v35 = vpop.permute.xlu1 %640  ;;  %v639_v36 = vpop.permute.xlu0 %638 }
  0x89   :  { %313 = vmatprep.mubr.f32.mxu0 %v7136_v2  ;;  %v644_v39 = vsel %vm642_vm7, %v641_v35, %v639_v36  ;;  %v643_v44 = vsel %vm642_vm7, %v639_v36, %v641_v35  ;;  %v1453_v35 = vld [vmem:[%s8829_s1 + $0xe8] sm:$0xff]  ;;  %v1554_v36 = vld [vmem:[%s8829_s1 + $0xf0] sm:$0xff] }
  0x8c   :  { %5953 = vmatmul.mubr.msk.f32.vlgmr.msra.gmra.mrb[0].mxu0 %vm50_vm3, %v228_v25  ;;  %v743_v41 = vpop.permute.xlu1 %742  ;;  %v741_v42 = vpop.permute.xlu0 %740 }
  0x8d   :  { %5956 = vmatpush1.msk.msra.mxu0 %vm57_vm1, %v337_v26  ;;  %319 = vmatprep.mubr.f32.mxu0 %v7136_v2  ;;  %v746_v45 = vsel %vm8838_vm8, %v743_v41, %v741_v42  ;;  %v745_v50 = vsel %vm8838_vm8, %v741_v42, %v743_v41  ;;  %v1249_v26 = vld [vmem:[%s8829_s1 + $0xc8] sm:$0xff]  ;;  %vm1560_vm8 = vcmp.lt.s32.totalorder %v7275_v4, 92 }
  0x8e   :  { %5959 = vmatprep.subr.msk.mxu0 %vm57_vm1, %v440_v27 }
  0x90   :  { %5954 = vmatmul.mubr.msk.f32.gmra.mrb[2].mxu0 %vm50_vm3, %v229_v28  ;;  %v845_v47 = vpop.permute.xlu1 %844  ;;  %v843_v48 = vpop.permute.xlu0 %842 }
  0x91   :  { %415 = vmatprep.mubr.f32.mxu0 %v7136_v2  ;;  %v848_v51 = vsel %vm846_vm9, %v845_v47, %v843_v48  ;;  %v847_v56 = vsel %vm846_vm9, %v843_v48, %v845_v47 }
  0x94   :  { %5957 = vmatmul.mubr.msk.f32.vlgmr.msra.gmra.mrb[0].mxu0 %vm50_vm3, %v330_v31  ;;  %v947_v53 = vpop.permute.xlu1 %946  ;;  %v945_v54 = vpop.permute.xlu0 %944 }
  0x95   :  { %5960 = vmatpush1.msk.msra.mxu0 %vm57_vm1, %v439_v32  ;;  %421 = vmatprep.mubr.f32.mxu0 %v7136_v2  ;;  %v950_v57 = vsel %vm948_vm10, %v947_v53, %v945_v54  ;;  %v949_v62 = vsel %vm948_vm10, %v945_v54, %v947_v53  ;;  %v1351_v32 = vld [vmem:[%s8829_s1 + $0xd8] sm:$0xff] }
  0x96   :  { %5963 = vmatprep.subr.msk.mxu0 %vm57_vm1, %v542_v33  ;;  %v1452_v33 = vld [vmem:[%s8829_s1 + $0xe0] sm:$0xff] }
  0x98   :  { %5958 = vmatmul.mubr.msk.f32.gmra.mrb[2].mxu0 %vm50_vm3, %v331_v34  ;;  %v1049_v59 = vpop.permute.xlu1 %1048  ;;  %v1047_v60 = vpop.permute.xlu0 %1046 }
  0x99   :  { %517 = vmatprep.mubr.f32.mxu0 %v7136_v2  ;;  %v1052_v63 = vsel %vm1050_vm11, %v1049_v59, %v1047_v60  ;;  %v1051_v6 = vsel %vm1050_vm11, %v1047_v60, %v1049_v59  ;;  %v3649_v60 = vld [vmem:[%s8832_s4] sm:$0xff] }
  0x9c   :  { %5961 = vmatmul.mubr.msk.f32.vlgmr.msra.gmra.mrb[0].mxu0 %vm50_vm3, %v432_v37  ;;  %v1151_v1 = vpop.permute.xlu1 %1150  ;;  %v1149_v3 = vpop.permute.xlu0 %1148  ;;  %v1555_v37 = vld [vmem:[%s8829_s1 + $0xf8] sm:$0xff] }
  0x9d   :  { %5964 = vmatpush1.msk.msra.mxu0 %vm57_vm1, %v541_v38  ;;  %523 = vmatprep.mubr.f32.mxu0 %v7136_v2  ;;  %v1154_v7 = vsel %vm1152_vm12, %v1151_v1, %v1149_v3  ;;  %v1153_v12 = vsel %vm1152_vm12, %v1149_v3, %v1151_v1 }
  0x9e   :  { %5967 = vmatprep.subr.msk.mxu0 %vm57_vm1, %v644_v39 }
  0xa0   :  { %5962 = vmatmul.mubr.msk.f32.gmra.mrb[2].mxu0 %vm50_vm3, %v433_v40  ;;  %v1253_v9 = vpop.permute.xlu1 %1252  ;;  %v1251_v10 = vpop.permute.xlu0 %1250 }
  0xa1   :  { %619 = vmatprep.mubr.f32.mxu0 %v7136_v2  ;;  %v1256_v13 = vsel %vm1254_vm13, %v1253_v9, %v1251_v10  ;;  %v1255_v18 = vsel %vm1254_vm13, %v1251_v10, %v1253_v9 }
  0xa4   :  { %5965 = vmatmul.mubr.msk.f32.vlgmr.msra.gmra.mrb[0].mxu0 %vm50_vm3, %v534_v43  ;;  %v1355_v15 = vpop.permute.xlu1 %1354  ;;  %v1353_v16 = vpop.permute.xlu0 %1352 }
  0xa5   :  { %5968 = vmatpush1.msk.msra.mxu0 %vm57_vm1, %v643_v44  ;;  %625 = vmatprep.mubr.f32.mxu0 %v7136_v2  ;;  %v1358_v19 = vsel %vm1356_vm14, %v1355_v15, %v1353_v16  ;;  %v1357_v24 = vsel %vm1356_vm14, %v1353_v16, %v1355_v15 }
  0xa6   :  { %5971 = vmatprep.subr.msk.mxu0 %vm57_vm1, %v746_v45 }
  0xa8   :  { %5966 = vmatmul.mubr.msk.f32.gmra.mrb[2].mxu0 %vm50_vm3, %v535_v46  ;;  %v1457_v21 = vpop.permute.xlu1 %1456  ;;  %v1455_v22 = vpop.permute.xlu0 %1454 }
  0xa9   :  { %721 = vmatprep.mubr.f32.mxu0 %v7136_v2  ;;  %v1460_v25 = vsel %vm1458_vm15, %v1457_v21, %v1455_v22  ;;  %v1459_v30 = vsel %vm1458_vm15, %v1455_v22, %v1457_v21  ;;  %v1680_v21 = vld [vmem:[%s8831_s3 + $0x20] sm:$0xff] }
  0xac   :  { %5969 = vmatmul.mubr.msk.f32.vlgmr.msra.gmra.mrb[0].mxu0 %vm50_vm3, %v636_v49  ;;  %v1559_v27 = vpop.permute.xlu1 %1558  ;;  %v1557_v28 = vpop.permute.xlu0 %1556 }
  0xad   :  { %5972 = vmatpush1.msk.msra.mxu0 %vm57_vm1, %v745_v50  ;;  %727 = vmatprep.mubr.f32.mxu0 %v7136_v2  ;;  %v1562_v31 = vsel %vm1560_vm8, %v1559_v27, %v1557_v28  ;;  %v1561_v34 = vsel %vm1560_vm8, %v1557_v28, %v1559_v27  ;;  %v1681_v27 = vld [vmem:[%s8831_s3 + $0x28] sm:$0xff] }
  0xae   :  { %5975 = vmatprep.subr.msk.mxu0 %vm57_vm1, %v848_v51 }
  0xb0   :  { %5970 = vmatmul.mubr.msk.f32.gmra.mrb[2].mxu0 %vm50_vm3, %v637_v52 }
  0xb1   :  { %823 = vmatprep.mubr.f32.mxu0 %v7136_v2 }
  0xb4   :  { %5973 = vmatmul.mubr.msk.f32.vlgmr.msra.gmra.mrb[0].mxu0 %vm50_vm3, %v738_v55 }
  0xb5   :  { %5976 = vmatpush1.msk.msra.mxu0 %vm57_vm1, %v847_v56  ;;  %829 = vmatprep.mubr.f32.mxu0 %v7136_v2 }
  0xb6   :  { %5979 = vmatprep.subr.msk.mxu0 %vm57_vm1, %v950_v57 }
  0xb8   :  { %5974 = vmatmul.mubr.msk.f32.gmra.mrb[2].mxu0 %vm50_vm3, %v739_v58 }
  0xb9   :  { %925 = vmatprep.mubr.f32.mxu0 %v7136_v2 }
  0xbc   :  { %5977 = vmatmul.mubr.msk.f32.vlgmr.msra.gmra.mrb[0].mxu0 %vm50_vm3, %v840_v61  ;;  %v3650_v61 = vld [vmem:[%s8832_s4 + $0x8] sm:$0xff] }
  0xbd   :  { %5980 = vmatpush1.msk.msra.mxu0 %vm57_vm1, %v949_v62  ;;  %931 = vmatprep.mubr.f32.mxu0 %v7136_v2  ;;  %v1661_v42 = vpop.permute.xlu0 %1660  ;;  %v1666_v44 = vpop.permute.xlu1 %1665  ;;  %v3651_v62 = vld [vmem:[%s8832_s4 + $0x10] sm:$0xff] }
  0xbe   :  { %5983 = vmatprep.subr.msk.mxu0 %vm57_vm1, %v1052_v63  ;;  %v3652_v63 = vld [vmem:[%s8832_s4 + $0x18] sm:$0xff] }
  0xc0   :  { %5978 = vmatmul.mubr.msk.f32.gmra.mrb[2].mxu0 %vm50_vm3, %v841_v0 }
  0xc1   :  { %1027 = vmatprep.mubr.f32.mxu0 %v7136_v2 }
  0xc4   :  { %5981 = vmatmul.mubr.msk.f32.vlgmr.msra.gmra.mrb[0].mxu0 %vm50_vm3, %v942_v5 }
  0xc5   :  { %5984 = vmatpush1.msk.msra.mxu0 %vm57_vm1, %v1051_v6  ;;  %1033 = vmatprep.mubr.f32.mxu0 %v7136_v2 }
  0xc6   :  { %5987 = vmatprep.subr.msk.mxu0 %vm57_vm1, %v1154_v7 }
  0xc8   :  { %5982 = vmatmul.mubr.msk.f32.gmra.mrb[2].mxu0 %vm50_vm3, %v943_v8 }
  0xc9   :  { %1129 = vmatprep.mubr.f32.mxu0 %v7136_v2 }
  0xcc   :  { %5985 = vmatmul.mubr.msk.f32.vlgmr.msra.gmra.mrb[0].mxu0 %vm50_vm3, %v1044_v11 }
  0xcd   :  { %5988 = vmatpush1.msk.msra.mxu0 %vm57_vm1, %v1153_v12  ;;  %1135 = vmatprep.mubr.f32.mxu0 %v7136_v2 }
  0xce   :  { %5991 = vmatprep.subr.msk.mxu0 %vm57_vm1, %v1256_v13 }
  0xd0   :  { %5986 = vmatmul.mubr.msk.f32.gmra.mrb[2].mxu0 %vm50_vm3, %v1045_v14 }
  0xd1   :  { %1231 = vmatprep.mubr.f32.mxu0 %v7136_v2 }
  0xd4   :  { %5989 = vmatmul.mubr.msk.f32.vlgmr.msra.gmra.mrb[0].mxu0 %vm50_vm3, %v1146_v17 }
  0xd5   :  { %5992 = vmatpush1.msk.msra.mxu0 %vm57_vm1, %v1255_v18  ;;  %1237 = vmatprep.mubr.f32.mxu0 %v7136_v2 }
  0xd6   :  { %5995 = vmatprep.subr.msk.mxu0 %vm57_vm1, %v1358_v19 }
  0xd8   :  { %5990 = vmatmul.mubr.msk.f32.gmra.mrb[2].mxu0 %vm50_vm3, %v1147_v20 }
  0xd9   :  { %1333 = vmatprep.mubr.f32.mxu0 %v7136_v2 }
  0xdc   :  { %5993 = vmatmul.mubr.msk.f32.vlgmr.msra.gmra.mrb[0].mxu0 %vm50_vm3, %v1248_v23 }
  0xdd   :  { %5996 = vmatpush1.msk.msra.mxu0 %vm57_vm1, %v1357_v24  ;;  %1339 = vmatprep.mubr.f32.mxu0 %v7136_v2 }
  0xde   :  { %5999 = vmatprep.subr.msk.mxu0 %vm57_vm1, %v1460_v25 }
  0xe0   :  { %5994 = vmatmul.mubr.msk.f32.gmra.mrb[2].mxu0 %vm50_vm3, %v1249_v26 }
  0xe1   :  { %1435 = vmatprep.mubr.f32.mxu0 %v7136_v2 }
  0xe4   :  { %5997 = vmatmul.mubr.msk.f32.vlgmr.msra.gmra.mrb[0].mxu0 %vm50_vm3, %v1350_v29 }
  0xe5   :  { %6000 = vmatpush1.msk.msra.mxu0 %vm57_vm1, %v1459_v30  ;;  %1441 = vmatprep.mubr.f32.mxu0 %v7136_v2  ;;  %v1682_v30 = vld [vmem:[%s8831_s3 + $0x30] sm:$0xff] }
  0xe6   :  { %6003 = vmatprep.subr.msk.mxu0 %vm57_vm1, %v1562_v31 }
  0xe8   :  { %5998 = vmatmul.mubr.msk.f32.gmra.mrb[2].mxu0 %vm50_vm3, %v1351_v32 }
  0xe9   :  { %1537 = vmatprep.mubr.f32.mxu0 %v7136_v2 }
  0xec   :  { %6001 = vmatmul.mubr.msk.f32.vlgmr.msra.gmra.mrb[0].mxu0 %vm50_vm3, %v1452_v33 }
  0xed   :  { %6004 = vmatpush1.msk.msra.mxu0 %vm57_vm1, %v1561_v34  ;;  %1543 = vmatprep.mubr.f32.mxu0 %v7136_v2  ;;  %vm1696_vm1 = vcmask 130048  }
  0xf0   :  { %6002 = vmatmul.mubr.msk.f32.gmra.mrb[2].mxu0 %vm50_vm3, %v1453_v35 }
  0xf1   :  { %1639 = vmatprep.mubr.f32.mxu0 %v7136_v2 }
  0xf4   :  { %6005 = vmatmul.mubr.msk.f32.vlgmr.msra.gmra.mrb[0].mxu0 %vm50_vm3, %v1554_v36 }
  0xf5   :  { %1645 = vmatprep.mubr.f32.mxu0 %v7136_v2 }
  0xf8   :  { %6006 = vmatmul.mubr.msk.f32.gmra.mrb[2].mxu0 %vm50_vm3, %v1555_v37  ;;  %v1683_v37 = vld [vmem:[%s8831_s3 + $0x38] sm:$0xff] }
  0xf9   :  { %3616 = vmatprep.mubr.f32.mxu0 %v7136_v2 }
 0x151   :  { %v136_v38 = vpop.f32.mrb[0].mxu1 }
 0x152   :  { %v138_v39 = vpop.f32.mrb[1].mxu1 }
 0x1c7   :  { %v1641_v40 = vpop.f32.mrb[0].mxu0 }
 0x1c8   :  { %v1643_v41 = vpop.f32.mrb[1].mxu0  ;;  %v1668_v45 = vadd.f32 %v1661_v42, %v1641_v40 }
 0x1c9   :  { %v1669_v48 = vadd.f32 %v1661_v42, %v1643_v41  ;;  %v1676_v42 = vld [vmem:[%s8831_s3] sm:$0xff] }
 0x1ca   :  { %v1672_v52 = vmax.f32 %v1668_v45, 0.0 }
 0x1cb   :  { %v1647_v43 = vpop.f32.mrb[2].mxu0  ;;  %v1673_v54 = vmax.f32 %v1669_v48, 0.0 }
 0x1cc   :  { %v6757_v46 = vadd.f32 %v1647_v43, %v136_v38  ;;  %v1649_v47 = vpop.f32.mrb[3].mxu0 }
 0x1cd   :  { %v6758_v49 = vadd.f32 %v1649_v47, %v138_v39 }
 0x1ce   :  { %v1670_v50 = vadd.f32 %v6757_v46, %v1666_v44 }
 0x1cf   :  { %v1671_v51 = vadd.f32 %v6758_v49, %v1666_v44  ;;  %v1677_v49 = vld [vmem:[%s8831_s3 + $0x8] sm:$0xff] }
 0x1d0   :  { %v1674_v53 = vmax.f32 %v1670_v50, 0.0 }
 0x1d1   :  { %v1675_v55 = vmax.f32 %v1671_v51, 0.0 }
 0x1d2   :  { %v6959_v56 = vpack.i.bf16 %v1674_v53, %v1672_v52  ;;  %v7558_v59 = vpack.c.bf16 %v1674_v53, %v1672_v52 }
 0x1d3   :  { %v6964_v57 = vpack.i.bf16 %v1675_v55, %v1673_v54  ;;  %v6531_v58 = vpack.c.bf16 %v1675_v55, %v1673_v54 }
 0x1d4   :  { %6960 = vrot.lane.b32.xlu1 %v6959_v56, %s7134_s11 }
 0x1d5   :  { %6965 = vrot.lane.b32.xlu0 %v6964_v57, %s7134_s11 }
 0x1d8   :  { %6970 = vrot.lane.b32.xlu1 %v6959_v56, %s7135_s12 }
 0x1d9   :  { %6975 = vrot.lane.b32.xlu0 %v6964_v57, %s7135_s12 }
 0x1dc   :  { %6980 = vrot.lane.b32.xlu1 %v6959_v56, %s7137_s0 }
 0x1dd   :  { %6985 = vrot.lane.b32.xlu0 %v6964_v57, %s7137_s0 }
 0x1e0   :  { %6990 = vrot.lane.b32.xlu1 %v6959_v56, %s7138_s13 }
 0x1e1   :  { %6995 = vrot.lane.b32.xlu0 %v6964_v57, %s7138_s13 }
 0x1e4   :  { %7000 = vrot.lane.b32.xlu1 %v6959_v56, %s7139_s14 }
 0x1e5   :  { %7005 = vrot.lane.b32.xlu0 %v6964_v57, %s7139_s14 }
 0x1e8   :  { %7010 = vrot.lane.b32.xlu1 %v6959_v56, %s7140_s15 }
 0x1e9   :  { %7015 = vrot.lane.b32.xlu0 %v6964_v57, %s7140_s15 }
 0x1ec   :  { %7020 = vrot.lane.b32.xlu1 %v6959_v56, %s7141_s16 }
 0x1ed   :  { %7025 = vrot.lane.b32.xlu0 %v6964_v57, %s7141_s16 }
 0x1f0   :  { %7030 = vrot.lane.b32.xlu1 %v6959_v56, %s7142_s17 }
 0x1f1   :  { %7035 = vrot.lane.b32.xlu0 %v6964_v57, %s7142_s17 }
 0x1f4   :  { %7040 = vrot.lane.b32.xlu1 %v6959_v56, %s7143_s18 }
 0x1f5   :  { %7045 = vrot.lane.b32.xlu0 %v6964_v57, %s7143_s18 }
 0x1f8   :  { %7050 = vrot.lane.b32.xlu1 %v6959_v56, %s7144_s19 }
 0x1f9   :  { %7055 = vrot.lane.b32.xlu0 %v6964_v57, %s7144_s19 }
 0x1fc   :  { %7060 = vrot.lane.b32.xlu1 %v6959_v56, %s7145_s20 }
 0x1fd   :  { %7065 = vrot.lane.b32.xlu0 %v6964_v57, %s7145_s20 }
 0x200   :  { %7070 = vrot.lane.b32.xlu1 %v6959_v56, %s7146_s21 }
 0x201   :  { %7075 = vrot.lane.b32.xlu0 %v6964_v57, %s7146_s21 }
 0x204   :  { %7080 = vrot.lane.b32.xlu1 %v6959_v56, %s7147_s22 }
 0x205   :  { %7085 = vrot.lane.b32.xlu0 %v6964_v57, %s7147_s22 }
 0x208   :  { %7090 = vrot.lane.b32.xlu1 %v6959_v56, %s7148_s23 }
 0x209   :  { %7095 = vrot.lane.b32.xlu0 %v6964_v57, %s7148_s23 }
 0x20c   :  { %7100 = vrot.lane.b32.xlu1 %v6959_v56, %s7149_s24 }
 0x20d   :  { %7105 = vrot.lane.b32.xlu0 %v6964_v57, %s7149_s24 }
 0x210   :  { %3655 = vperm.xlu1 %6958, %v3649_v60  }
 0x211   :  { %3660 = vperm.xlu0 %6957, %v3650_v61  }
 0x214   :  { %3665 = vperm.xlu1 %6958, %v3651_v62  }
 0x215   :  { %3670 = vperm.xlu0 %6957, %v3652_v63  }
 0x246   :  { %v6961_v0 = vpop.permute.xlu1 %6960 }
 0x247   :  { %v6963_v1 = vunpack.i.h.bf16 %v6961_v0  ;;  %v6962_v3 = vunpack.i.l.bf16 %v6961_v0  ;;  %v6966_v5 = vpop.permute.xlu0 %6965 }
 0x248   :  { %v6968_v6 = vunpack.i.h.bf16 %v6966_v5  ;;  %v6967_v7 = vunpack.i.l.bf16 %v6966_v5 }
 0x24a   :  { %v1692_v8 = vsel %vm47_vm0, %v6962_v3, %v6967_v7  ;;  %v1693_v9 = vsel %vm47_vm0, %v6963_v1, %v6968_v6  ;;  %v6971_v10 = vpop.permute.xlu1 %6970  ;;  %v1694_v11 = vsel %vm47_vm0, %v6967_v7, %v6962_v3  ;;  %v1695_v12 = vsel %vm47_vm0, %v6968_v6, %v6963_v1 }
 0x24b   :  { %v6529_v13 = vpack.c.bf16 %v1693_v9, %v1692_v8  ;;  %v6973_v14 = vunpack.i.h.bf16 %v6971_v10  ;;  %v6972_v15 = vunpack.i.l.bf16 %v6971_v10  ;;  %v6976_v16 = vpop.permute.xlu0 %6975  ;;  %v6527_v17 = vpack.c.bf16 %v1695_v12, %v1694_v11 }
 0x24c   :  { %v6978_v18 = vunpack.i.h.bf16 %v6976_v16  ;;  %v6977_v19 = vunpack.i.l.bf16 %v6976_v16  ;;  %vm8839_vm0 = vcmp.lt.s32.totalorder %v7275_v4, 114  ;;  %v3524_v4 = vld [vmem:[%s8831_s3 + $0x1e0] sm:$0xff] }
 0x24d   :  { %6528 = vmatprep.subr.bf16.mxu1 %v6527_v17  ;;  %vm8841_vm3 = vmmov %vm8839_vm0 }
 0x24e   :  { %v7606_v20 = vpop.permute.xlu1 %6980  ;;  %6530 = vmatpush1.bf16.msra.mxu1 %v6529_v13  ;;  %v1913_v22 = vsel %vm234_vm2, %v6977_v19, %v6972_v15  ;;  %v1914_v23 = vsel %vm234_vm2, %v6978_v18, %v6973_v14  ;;  %v1911_v39 = vsel %vm234_vm2, %v6972_v15, %v6977_v19  ;;  %v1912_v40 = vsel %vm234_vm2, %v6973_v14, %v6978_v18  ;;  %v1679_v13 = vld [vmem:[%s8831_s3 + $0x18] sm:$0xff]  ;;  %vm8840_vm2 = vmmov %vm8839_vm0 }
 0x24f   :  { %v7615_v24 = vpop.permute.xlu0 %6985  ;;  %6532 = vmatprep.subr.bf16.mxu1 %v6531_v58  ;;  %v6535_v25 = vpack.c.bf16 %v1914_v23, %v1913_v22  ;;  %v6983_v32 = vunpack.i.h.bf16 %v7606_v20  ;;  %v6982_v33 = vunpack.i.l.bf16 %v7606_v20  ;;  %v6537_v46 = vpack.c.bf16 %v1912_v40, %v1911_v39  ;;  %v1678_v58 = vld [vmem:[%s8831_s3 + $0x10] sm:$0xff] }
 0x250   :  { %v6988_v34 = vunpack.i.h.bf16 %v7615_v24  ;;  %v6987_v35 = vunpack.i.l.bf16 %v7615_v24 }
 0x251   :  { %6007 = vmatmul.mubr.msk.f32.vlgmr.msra.gmra.mrb[2].mxu1 %vm1696_vm1, %v1680_v21 }
 0x252   :  { %v7618_v26 = vpop.permute.xlu1 %6990  ;;  %6534 = vmatpush1.bf16.msra.mxu1 %v7558_v59  ;;  %1779 = vmatprep.mubr.f32.mxu1 %v7136_v2  ;;  %v2038_v43 = vsel %vm336_vm4, %v6987_v35, %v6982_v33  ;;  %v2039_v44 = vsel %vm336_vm4, %v6988_v34, %v6983_v32 }
 0x253   :  { %v7625_v28 = vpop.permute.xlu0 %6995  ;;  %6536 = vmatprep.subr.bf16.mxu1 %v6535_v25  ;;  %v6539_v47 = vpack.c.bf16 %v2039_v44, %v2038_v43  ;;  %v6993_v6 = vunpack.i.h.bf16 %v7618_v26  ;;  %v6992_v7 = vunpack.i.l.bf16 %v7618_v26  ;;  %v2036_v25 = vsel %vm336_vm4, %v6982_v33, %v6987_v35 }
 0x254   :  { %v6998_v8 = vunpack.i.h.bf16 %v7625_v28  ;;  %v6997_v9 = vunpack.i.l.bf16 %v7625_v28 }
 0x255   :  { %6008 = vmatmul.mubr.msk.f32.gmra.mrb[4].mxu1 %vm1696_vm1, %v1681_v27  ;;  %v2037_v27 = vsel %vm336_vm4, %v6983_v32, %v6988_v34  ;;  %v1899_v34 = vld [vmem:[%s8831_s3 + $0x40] sm:$0xff]  ;;  %vm8842_vm4 = vmmov %vm8839_vm0 }
 0x256   :  { %v7628_v29 = vpop.permute.xlu1 %7000  ;;  %1785 = vmatprep.mubr.f32.mxu1 %v7136_v2  ;;  %v2164_v24 = vsel %vm438_vm5, %v6998_v8, %v6993_v6 }
 0x257   :  { %v7634_v31 = vpop.permute.xlu0 %7005 }
 0x259   :  { %6009 = vmatmul.mubr.msk.f32.gmra.mrb[6].mxu1 %vm1696_vm1, %v1682_v30  ;;  %v2163_v30 = vsel %vm438_vm5, %v6997_v9, %v6992_v7 }
 0x25a   :  { %v7641_v36 = vpop.permute.xlu1 %7010  ;;  %1791 = vmatprep.mubr.f32.mxu1 %v7136_v2 }
 0x25b   :  { %v7647_v38 = vpop.permute.xlu0 %7015 }
 0x25d   :  { %6010 = vmatmul.mubr.msk.f32.gmra.mrb[8].mxu1 %vm1696_vm1, %v1683_v37 }
 0x25e   :  { %v7654_v41 = vpop.permute.xlu1 %7020  ;;  %1874 = vmatprep.mubr.f32.mxu1 %v7136_v2 }
 0x25f   :  { %v7670_v45 = vpop.permute.xlu0 %7025 }
 0x261   :  { %6011 = vmatmul.mubr.msk.f32.vlgmr.msra.gmra.mrb[2].mxu1 %vm1696_vm1, %v1676_v42 }
 0x262   :  { %6538 = vmatpush1.bf16.msra.mxu1 %v6537_v46  ;;  %v7031_v48 = vpop.permute.xlu1 %7030  ;;  %1880 = vmatprep.mubr.f32.mxu1 %v7136_v2  ;;  %v6541_v46 = vpack.c.bf16 %v2037_v27, %v2036_v25 }
 0x263   :  { %v7033_v50 = vunpack.i.h.bf16 %v7031_v48  ;;  %v7032_v51 = vunpack.i.l.bf16 %v7031_v48  ;;  %6540 = vmatprep.subr.bf16.mxu1 %v6539_v47  ;;  %v7036_v52 = vpop.permute.xlu0 %7035 }
 0x264   :  { %v7038_v53 = vunpack.i.h.bf16 %v7036_v52  ;;  %v7037_v54 = vunpack.i.l.bf16 %v7036_v52 }
 0x265   :  { %6012 = vmatmul.mubr.msk.f32.gmra.mrb[4].mxu1 %vm1696_vm1, %v1677_v49  ;;  %v6543_v49 = vpack.c.bf16 %v2164_v24, %v2163_v30 }
 0x266   :  { %v7680_v55 = vsel %vm846_vm9, %v7032_v51, %v7037_v54  ;;  %v7684_v56 = vsel %vm846_vm9, %v7033_v50, %v7038_v53  ;;  %v7041_v57 = vpop.permute.xlu1 %7040  ;;  %1886 = vmatprep.mubr.f32.mxu1 %v7136_v2  ;;  %v7692_v59 = vsel %vm846_vm9, %v7037_v54, %v7032_v51  ;;  %v7696_v60 = vsel %vm846_vm9, %v7038_v53, %v7033_v50  ;;  %v1900_v53 = vld [vmem:[%s8831_s3 + $0x48] sm:$0xff] }
 0x267   :  { %v6561_v61 = vpack.c.bf16 %v7684_v56, %v7680_v55  ;;  %v7043_v62 = vunpack.i.h.bf16 %v7041_v57  ;;  %v7042_v63 = vunpack.i.l.bf16 %v7041_v57  ;;  %v7046_v0 = vpop.permute.xlu0 %7045  ;;  %v6559_v1 = vpack.c.bf16 %v7696_v60, %v7692_v59  ;;  %v2402_v59 = vld [vmem:[%s8831_s3 + $0xd8] sm:$0xff]  ;;  %v2524_v60 = vld [vmem:[%s8831_s3 + $0xe0] sm:$0xff] }
 0x268   :  { %v7048_v3 = vunpack.i.h.bf16 %v7046_v0  ;;  %v7047_v5 = vunpack.i.l.bf16 %v7046_v0  ;;  %v2527_v55 = vld [vmem:[%s8831_s3 + $0xf8] sm:$0xff]  ;;  %v2649_v56 = vld [vmem:[%s8831_s3 + $0x100] sm:$0xff]  ;;  %vm5927_vm9 = vcmask 25600  }
 0x269   :  { %6013 = vmatmul.mubr.msk.f32.gmra.mrb[6].mxu1 %vm1696_vm1, %v1678_v58 }
 0x26a   :  { %v7709_v10 = vsel %vm948_vm10, %v7042_v63, %v7047_v5  ;;  %v7713_v11 = vsel %vm948_vm10, %v7043_v62, %v7048_v3  ;;  %v7051_v12 = vpop.permute.xlu1 %7050  ;;  %1892 = vmatprep.mubr.f32.mxu1 %v7136_v2  ;;  %v7721_v14 = vsel %vm948_vm10, %v7047_v5, %v7042_v63  ;;  %v7725_v15 = vsel %vm948_vm10, %v7048_v3, %v7043_v62 }
 0x26b   :  { %v6565_v16 = vpack.c.bf16 %v7713_v11, %v7709_v10  ;;  %v7053_v17 = vunpack.i.h.bf16 %v7051_v12  ;;  %v7052_v18 = vunpack.i.l.bf16 %v7051_v12  ;;  %v7056_v19 = vpop.permute.xlu0 %7055  ;;  %v6563_v21 = vpack.c.bf16 %v7725_v15, %v7721_v14  ;;  %v2651_v14 = vld [vmem:[%s8831_s3 + $0x110] sm:$0xff]  ;;  %v2652_v10 = vld [vmem:[%s8831_s3 + $0x118] sm:$0xff]  ;;  %v2774_v11 = vld [vmem:[%s8831_s3 + $0x120] sm:$0xff] }
 0x26c   :  { %v7058_v22 = vunpack.i.h.bf16 %v7056_v19  ;;  %v7057_v23 = vunpack.i.l.bf16 %v7056_v19  ;;  %v1901_v19 = vld [vmem:[%s8831_s3 + $0x50] sm:$0xff]  ;;  %v2775_v15 = vld [vmem:[%s8831_s3 + $0x128] sm:$0xff] }
 0x26d   :  { %6014 = vmatmul.mubr.msk.f32.gmra.mrb[8].mxu1 %vm1696_vm1, %v1679_v13 }
 0x26e   :  { %v7756_v20 = vsel %vm1050_vm11, %v7052_v18, %v7057_v23  ;;  %v7760_v32 = vsel %vm1050_vm11, %v7053_v17, %v7058_v22  ;;  %v7061_v33 = vpop.permute.xlu1 %7060  ;;  %1991 = vmatprep.mubr.f32.mxu1 %v7136_v2  ;;  %v7768_v35 = vsel %vm1050_vm11, %v7057_v23, %v7052_v18  ;;  %v7772_v37 = vsel %vm1050_vm11, %v7058_v22, %v7053_v17 }
 0x26f   :  { %v6569_v39 = vpack.c.bf16 %v7760_v32, %v7756_v20  ;;  %v7063_v40 = vunpack.i.h.bf16 %v7061_v33  ;;  %v7062_v42 = vunpack.i.l.bf16 %v7061_v33  ;;  %v7066_v43 = vpop.permute.xlu0 %7065  ;;  %v6567_v44 = vpack.c.bf16 %v7772_v37, %v7768_v35  ;;  %v2777_v20 = vld [vmem:[%s8831_s3 + $0x138] sm:$0xff]  ;;  %v2899_v32 = vld [vmem:[%s8831_s3 + $0x140] sm:$0xff]  ;;  %v2900_v37 = vld [vmem:[%s8831_s3 + $0x148] sm:$0xff] }
 0x270   :  { %v7068_v47 = vunpack.i.h.bf16 %v7066_v43  ;;  %v7067_v48 = vunpack.i.l.bf16 %v7066_v43  ;;  %v7002_v43 = vunpack.i.l.bf16 %v7628_v29 }
 0x271   :  { %6015 = vmatmul.mubr.msk.f32.vlgmr.msra.gmra.mrb[2].mxu1 %vm1696_vm1, %v1899_v34 }
 0x272   :  { %v7781_v50 = vsel %vm1152_vm12, %v7062_v42, %v7067_v48  ;;  %v7785_v51 = vsel %vm1152_vm12, %v7063_v40, %v7068_v47  ;;  %6542 = vmatpush1.bf16.msra.mxu1 %v6541_v46  ;;  %v7071_v52 = vpop.permute.xlu1 %7070  ;;  %1997 = vmatprep.mubr.f32.mxu1 %v7136_v2  ;;  %v7793_v54 = vsel %vm1152_vm12, %v7067_v48, %v7062_v42  ;;  %v7003_v42 = vunpack.i.h.bf16 %v7628_v29 }
 0x273   :  { %v7073_v58 = vunpack.i.h.bf16 %v7071_v52  ;;  %v7072_v62 = vunpack.i.l.bf16 %v7071_v52  ;;  %6544 = vmatprep.subr.bf16.mxu1 %v6543_v49  ;;  %v7076_v63 = vpop.permute.xlu0 %7075  ;;  %v7799_v0 = vsel %vm1152_vm12, %v7068_v47, %v7063_v40  ;;  %v7008_v46 = vunpack.i.h.bf16 %v7634_v31 }
 0x274   :  { %v7078_v3 = vunpack.i.h.bf16 %v7076_v63  ;;  %v7077_v5 = vunpack.i.l.bf16 %v7076_v63  ;;  %v7007_v47 = vunpack.i.l.bf16 %v7634_v31  ;;  %v8844_v35 = vpack.c.bf16 %v7785_v51, %v7781_v50  ;;  %v2902_v50 = vld [vmem:[%s8831_s3 + $0x158] sm:$0xff]  ;;  %v3024_v51 = vld [vmem:[%s8831_s3 + $0x160] sm:$0xff] }
 0x275   :  { %6016 = vmatmul.mubr.msk.f32.gmra.mrb[4].mxu1 %vm1696_vm1, %v1900_v53  ;;  %v1902_v53 = vld [vmem:[%s8831_s3 + $0x58] sm:$0xff] }
 0x276   :  { %v7806_v13 = vsel %vm1254_vm13, %v7072_v62, %v7077_v5  ;;  %v7810_v17 = vsel %vm1254_vm13, %v7073_v58, %v7078_v3  ;;  %v7081_v18 = vpop.permute.xlu1 %7080  ;;  %2003 = vmatprep.mubr.f32.mxu1 %v7136_v2  ;;  %v7818_v22 = vsel %vm1254_vm13, %v7077_v5, %v7072_v62  ;;  %v7822_v23 = vsel %vm1254_vm13, %v7078_v3, %v7073_v58 }
 0x277   :  { %v7083_v27 = vunpack.i.h.bf16 %v7081_v18  ;;  %v7082_v30 = vunpack.i.l.bf16 %v7081_v18  ;;  %v7086_v24 = vpop.permute.xlu0 %7085 }
 0x278   :  { %v7088_v34 = vunpack.i.h.bf16 %v7086_v24  ;;  %v7087_v40 = vunpack.i.l.bf16 %v7086_v24 }
 0x279   :  { %6017 = vmatmul.mubr.msk.f32.gmra.mrb[6].mxu1 %vm1696_vm1, %v1901_v19 }
 0x27a   :  { %v7835_v48 = vsel %vm1356_vm14, %v7082_v30, %v7087_v40  ;;  %v7839_v49 = vsel %vm1356_vm14, %v7083_v27, %v7088_v34  ;;  %v7091_v52 = vpop.permute.xlu1 %7090  ;;  %2009 = vmatprep.mubr.f32.mxu1 %v7136_v2  ;;  %v7847_v58 = vsel %vm1356_vm14, %v7087_v40, %v7082_v30  ;;  %v7851_v62 = vsel %vm1356_vm14, %v7088_v34, %v7083_v27 }
 0x27b   :  { %v7093_v3 = vunpack.i.h.bf16 %v7091_v52  ;;  %v7092_v5 = vunpack.i.l.bf16 %v7091_v52  ;;  %v7096_v18 = vpop.permute.xlu0 %7095  ;;  %v2161_v30 = vsel %vm438_vm5, %v6992_v7, %v6997_v9  ;;  %v2162_v27 = vsel %vm438_vm5, %v6993_v6, %v6998_v8  ;;  %v2024_v8 = vld [vmem:[%s8831_s3 + $0x60] sm:$0xff] }
 0x27c   :  { %v7098_v24 = vunpack.i.h.bf16 %v7096_v18  ;;  %v7097_v25 = vunpack.i.l.bf16 %v7096_v18  ;;  %v2288_v34 = vsel %vm540_vm6, %v7007_v47, %v7002_v43  ;;  %v2289_v7 = vsel %vm540_vm6, %v7008_v46, %v7003_v42 }
 0x27d   :  { %6018 = vmatmul.mubr.msk.f32.gmra.mrb[8].mxu1 %vm1696_vm1, %v1902_v53  ;;  %v6545_v33 = vpack.c.bf16 %v2162_v27, %v2161_v30  ;;  %vm7152_vm5 = vmmov 0  }
 0x27e   :  { %v7882_v26 = vsel %vm1458_vm15, %v7092_v5, %v7097_v25  ;;  %v7886_v28 = vsel %vm1458_vm15, %v7093_v3, %v7098_v24  ;;  %v7101_v6 = vpop.permute.xlu1 %7100  ;;  %2116 = vmatprep.mubr.f32.mxu1 %v7136_v2  ;;  %v7894_v9 = vsel %vm1458_vm15, %v7097_v25, %v7092_v5  ;;  %v7898_v40 = vsel %vm1458_vm15, %v7098_v24, %v7093_v3  ;;  %v2025_v24 = vld [vmem:[%s8831_s3 + $0x68] sm:$0xff] }
 0x27f   :  { %v6585_v52 = vpack.c.bf16 %v7886_v28, %v7882_v26  ;;  %v7103_v53 = vunpack.i.h.bf16 %v7101_v6  ;;  %v7102_v18 = vunpack.i.l.bf16 %v7101_v6  ;;  %v7106_v63 = vpop.permute.xlu0 %7105  ;;  %v6583_v19 = vpack.c.bf16 %v7898_v40, %v7894_v9  ;;  %v3276_v9 = vld [vmem:[%s8831_s3 + $0x1b0] sm:$0xff]  ;;  %v3277_v26 = vld [vmem:[%s8831_s3 + $0x1b8] sm:$0xff]  ;;  %v3399_v28 = vld [vmem:[%s8831_s3 + $0x1c0] sm:$0xff] }
 0x280   :  { %v7108_v57 = vunpack.i.h.bf16 %v7106_v63  ;;  %v7107_v12 = vunpack.i.l.bf16 %v7106_v63  ;;  %v6547_v25 = vpack.c.bf16 %v2289_v7, %v2288_v34  ;;  %v7018_v7 = vunpack.i.h.bf16 %v7647_v38  ;;  %v3400_v40 = vld [vmem:[%s8831_s3 + $0x1c8] sm:$0xff] }
 0x281   :  { %6019 = vmatmul.mubr.msk.f32.vlgmr.msra.gmra.mrb[2].mxu1 %vm1696_vm1, %v2024_v8  ;;  %v7017_v6 = vunpack.i.l.bf16 %v7647_v38  ;;  %v2027_v8 = vld [vmem:[%s8831_s3 + $0x78] sm:$0xff]  ;;  %v2149_v38 = vld [vmem:[%s8831_s3 + $0x80] sm:$0xff] }
 0x282   :  { %v3536_v5 = vsel %vm1560_vm8, %v7102_v18, %v7107_v12  ;;  %v3537_v3 = vsel %vm1560_vm8, %v7103_v53, %v7108_v57  ;;  %6546 = vmatpush1.bf16.msra.mxu1 %v6545_v33  ;;  %2122 = vmatprep.mubr.f32.mxu1 %v7136_v2  ;;  %v3538_v30 = vsel %vm1560_vm8, %v7107_v12, %v7102_v18  ;;  %v2026_v33 = vld [vmem:[%s8831_s3 + $0x70] sm:$0xff]  ;;  %v7013_v12 = vunpack.i.h.bf16 %v7641_v36 }
 0x283   :  { %v7915_v63 = vpack.c.bf16 %v3537_v3, %v3536_v5  ;;  %6548 = vmatprep.subr.bf16.mxu1 %v6547_v25  ;;  %v3539_v27 = vsel %vm1560_vm8, %v7108_v57, %v7103_v53  ;;  %v7012_v57 = vunpack.i.l.bf16 %v7641_v36  ;;  %v2286_v53 = vsel %vm540_vm6, %v7002_v43, %v7007_v47 }
 0x284   :  { %v7919_v34 = vpack.c.bf16 %v3539_v27, %v3538_v30  ;;  %v2287_v36 = vsel %vm540_vm6, %v7003_v42, %v7008_v46  ;;  %v2414_v43 = vsel %vm642_vm7, %v7018_v7, %v7013_v12  ;;  %v2150_v42 = vld [vmem:[%s8831_s3 + $0x88] sm:$0xff]  ;;  %v2151_v46 = vld [vmem:[%s8831_s3 + $0x90] sm:$0xff]  ;;  %v7023_v47 = vunpack.i.h.bf16 %v7654_v41 }
 0x285   :  { %6020 = vmatmul.mubr.msk.f32.gmra.mrb[4].mxu1 %vm1696_vm1, %v2025_v24  ;;  %v2413_v18 = vsel %vm642_vm7, %v7017_v6, %v7012_v57  ;;  %v6549_v31 = vpack.c.bf16 %v2287_v36, %v2286_v53  ;;  %v7022_v25 = vunpack.i.l.bf16 %v7654_v41  ;;  %v7028_v5 = vunpack.i.h.bf16 %v7670_v45  ;;  %v2152_v24 = vld [vmem:[%s8831_s3 + $0x98] sm:$0xff]  ;;  %v2274_v41 = vld [vmem:[%s8831_s3 + $0xa0] sm:$0xff] }
 0x286   :  { %6588 = vmatprep.subr.bf16.mxu0 %v7919_v34  ;;  %2128 = vmatprep.mubr.f32.mxu1 %v7136_v2  ;;  %v6551_v29 = vpack.c.bf16 %v2414_v43, %v2413_v18  ;;  %v7027_v3 = vunpack.i.l.bf16 %v7670_v45  ;;  %v2411_v30 = vsel %vm642_vm7, %v7012_v57, %v7017_v6  ;;  %v2412_v27 = vsel %vm642_vm7, %v7013_v12, %v7018_v7  ;;  %v2275_v12 = vld [vmem:[%s8831_s3 + $0xa8] sm:$0xff]  ;;  %v2276_v7 = vld [vmem:[%s8831_s3 + $0xb0] sm:$0xff]  ;;  %v2277_v6 = vld [vmem:[%s8831_s3 + $0xb8] sm:$0xff] }
 0x287   :  { %6590 = vmatpush1.bf16.msra.mxu0 %v7915_v63  ;;  %v2537_v36 = vsel %vm8842_vm4, %v7023_v47, %v7028_v5  ;;  %v2400_v43 = vld [vmem:[%s8831_s3 + $0xc8] sm:$0xff]  ;;  %vm3756_vm6 = vcmask 1040384   ;;  %vm3770_vm7 = vcmask 261120   ;;  %vm5853_vm8 = vcmask 523264  }
 0x288   :  { %v2538_v45 = vsel %vm8839_vm0, %v7027_v3, %v7022_v25  ;;  %v2536_v53 = vsel %vm8841_vm3, %v7022_v25, %v7027_v3 }
 0x289   :  { %6021 = vmatmul.mubr.msk.f32.gmra.mrb[6].mxu1 %vm1696_vm1, %v2026_v33  ;;  %v2539_v33 = vsel %vm8840_vm2, %v7028_v5, %v7023_v47  ;;  %v6557_v18 = vpack.c.bf16 %v2537_v36, %v2536_v53  ;;  %v3527_v47 = vld [vmem:[%s8831_s3 + $0x1f8] sm:$0xff] }
 0x28a   :  { %2134 = vmatprep.mubr.f32.mxu1 %v7136_v2  ;;  %v6555_v57 = vpack.c.bf16 %v2539_v33, %v2538_v45  ;;  %6067 = vmatmul.mubr.msk.f32.vlgmr.msra.gmra.mrb[4].mxu0 %vm1696_vm1, %v3524_v4  ;;  %v7151_v45 = vmov 0.0|0.0  }
 0x28b   :  { %3622 = vmatprep.mubr.f32.mxu0 %v7136_v2  ;;  %6591 = vmatprep.subr.bf16.mxu0 %v7151_v45 }
 0x28d   :  { %6022 = vmatmul.mubr.msk.f32.gmra.mrb[8].mxu1 %vm1696_vm1, %v2027_v8  ;;  %v6553_v8 = vpack.c.bf16 %v2412_v27, %v2411_v30  ;;  %v3766_v30 = vld [vmem:[%s8833_s5 + $0x20] sm:$0xff]  ;;  %v3767_v27 = vld [vmem:[%s8833_s5 + $0x28] sm:$0xff] }
 0x28e   :  { %2241 = vmatprep.mubr.f32.mxu1 %v7136_v2  ;;  %v6592_v33 = vpack.c.bf16 %v3767_v27, %v3766_v30 }
 0x28f   :  { %v3656_v53 = vpop.permute.xlu1 %3655 }
 0x290   :  { %6593 = vmatpush3.bf16.msra.mxu0 %v6592_v33 }
 0x291   :  { %6023 = vmatmul.mubr.msk.f32.vlgmr.msra.gmra.mrb[2].mxu1 %vm1696_vm1, %v2149_v38  ;;  %v2399_v38 = vld [vmem:[%s8831_s3 + $0xc0] sm:$0xff]  ;;  %6594 = vmatprep.subr.bf16.mxu0 %v7151_v45 }
 0x292   :  { %6550 = vmatpush1.bf16.msra.mxu1 %v6549_v31  ;;  %2247 = vmatprep.mubr.f32.mxu1 %v7136_v2  ;;  %v3525_v31 = vld [vmem:[%s8831_s3 + $0x1e8] sm:$0xff] }
 0x293   :  { %6552 = vmatprep.subr.bf16.mxu1 %v6551_v29  ;;  %v2401_v29 = vld [vmem:[%s8831_s3 + $0xd0] sm:$0xff]  ;;  %6068 = vmatmul.mubr.msk.f32.gmra.mrb[6].mxu0 %vm1696_vm1, %v3525_v31 }
 0x294   :  { %6241 = vmatprep.mubr.msk.f32.mxu0 %vm7152_vm5, %v7136_v2 }
 0x295   :  { %6024 = vmatmul.mubr.msk.f32.gmra.mrb[4].mxu1 %vm1696_vm1, %v2150_v42  ;;  %v2526_v42 = vld [vmem:[%s8831_s3 + $0xf0] sm:$0xff] }
 0x296   :  { %2253 = vmatprep.mubr.f32.mxu1 %v7136_v2 }
 0x299   :  { %6025 = vmatmul.mubr.msk.f32.gmra.mrb[6].mxu1 %vm1696_vm1, %v2151_v46  ;;  %v3151_v46 = vld [vmem:[%s8831_s3 + $0x190] sm:$0xff] }
 0x29a   :  { %2259 = vmatprep.mubr.f32.mxu1 %v7136_v2 }
 0x29d   :  { %6026 = vmatmul.mubr.msk.f32.gmra.mrb[8].mxu1 %vm1696_vm1, %v2152_v24 }
 0x29e   :  { %2366 = vmatprep.mubr.f32.mxu1 %v7136_v2 }
 0x2a1   :  { %6027 = vmatmul.mubr.msk.f32.vlgmr.msra.gmra.mrb[2].mxu1 %vm1696_vm1, %v2274_v41  ;;  %v3768_v41 = vld [vmem:[%s8833_s5 + $0x30] sm:$0xff] }
 0x2a2   :  { %6554 = vmatpush1.bf16.msra.mxu1 %v6553_v8  ;;  %2372 = vmatprep.mubr.f32.mxu1 %v7136_v2  ;;  %v3769_v8 = vld [vmem:[%s8833_s5 + $0x38] sm:$0xff] }
 0x2a3   :  { %6556 = vmatprep.subr.bf16.mxu1 %v6555_v57  ;;  %v6595_v57 = vpack.c.bf16 %v3769_v8, %v3768_v41 }
 0x2a5   :  { %6028 = vmatmul.mubr.msk.f32.gmra.mrb[4].mxu1 %vm1696_vm1, %v2275_v12  ;;  %6596 = vmatpush3.bf16.msra.mxu0 %v6595_v57  ;;  %v3924_v57 = vld [vmem:[%s8833_s5 + $0x50] sm:$0xff] }
 0x2a6   :  { %2378 = vmatprep.mubr.f32.mxu1 %v7136_v2  ;;  %6597 = vmatprep.subr.bf16.mxu0 %v7151_v45 }
 0x2a9   :  { %6029 = vmatmul.mubr.msk.f32.gmra.mrb[6].mxu1 %vm1696_vm1, %v2276_v7 }
 0x2aa   :  { %2384 = vmatprep.mubr.f32.mxu1 %v7136_v2 }
 0x2ad   :  { %6030 = vmatmul.mubr.msk.f32.gmra.mrb[8].mxu1 %vm1696_vm1, %v2277_v6 }
 0x2ae   :  { %2491 = vmatprep.mubr.f32.mxu1 %v7136_v2 }
 0x2b1   :  { %6031 = vmatmul.mubr.msk.f32.vlgmr.msra.gmra.mrb[2].mxu1 %vm1696_vm1, %v2399_v38 }
 0x2b2   :  { %6558 = vmatpush1.bf16.msra.mxu1 %v6557_v18  ;;  %2497 = vmatprep.mubr.f32.mxu1 %v7136_v2 }
 0x2b3   :  { %6560 = vmatprep.subr.bf16.mxu1 %v6559_v1  ;;  %v2525_v1 = vld [vmem:[%s8831_s3 + $0xe8] sm:$0xff] }
 0x2b5   :  { %6032 = vmatmul.mubr.msk.f32.gmra.mrb[4].mxu1 %vm1696_vm1, %v2400_v43 }
 0x2b6   :  { %2503 = vmatprep.mubr.f32.mxu1 %v7136_v2 }
 0x2b9   :  { %6033 = vmatmul.mubr.msk.f32.gmra.mrb[6].mxu1 %vm1696_vm1, %v2401_v29 }
 0x2ba   :  { %2509 = vmatprep.mubr.f32.mxu1 %v7136_v2 }
 0x2bd   :  { %6034 = vmatmul.mubr.msk.f32.gmra.mrb[8].mxu1 %vm1696_vm1, %v2402_v59  ;;  %v3661_v59 = vpop.permute.xlu0 %3660 }
 0x2be   :  { %2616 = vmatprep.mubr.f32.mxu1 %v7136_v2 }
 0x2c1   :  { %6035 = vmatmul.mubr.msk.f32.vlgmr.msra.gmra.mrb[2].mxu1 %vm1696_vm1, %v2524_v60 }
 0x2c2   :  { %6562 = vmatpush1.bf16.msra.mxu1 %v6561_v61  ;;  %2622 = vmatprep.mubr.f32.mxu1 %v7136_v2  ;;  %v2650_v61 = vld [vmem:[%s8831_s3 + $0x108] sm:$0xff] }
 0x2c3   :  { %6564 = vmatprep.subr.bf16.mxu1 %v6563_v21  ;;  %v2776_v21 = vld [vmem:[%s8831_s3 + $0x130] sm:$0xff] }
 0x2c5   :  { %6036 = vmatmul.mubr.msk.f32.gmra.mrb[4].mxu1 %vm1696_vm1, %v2525_v1 }
 0x2c6   :  { %2628 = vmatprep.mubr.f32.mxu1 %v7136_v2 }
 0x2c9   :  { %6037 = vmatmul.mubr.msk.f32.gmra.mrb[6].mxu1 %vm1696_vm1, %v2526_v42 }
 0x2ca   :  { %2634 = vmatprep.mubr.f32.mxu1 %v7136_v2 }
 0x2cd   :  { %6038 = vmatmul.mubr.msk.f32.gmra.mrb[8].mxu1 %vm1696_vm1, %v2527_v55 }
 0x2ce   :  { %2741 = vmatprep.mubr.f32.mxu1 %v7136_v2 }
 0x2d1   :  { %6039 = vmatmul.mubr.msk.f32.vlgmr.msra.gmra.mrb[2].mxu1 %vm1696_vm1, %v2649_v56 }
 0x2d2   :  { %6566 = vmatpush1.bf16.msra.mxu1 %v6565_v16  ;;  %2747 = vmatprep.mubr.f32.mxu1 %v7136_v2  ;;  %v8843_v16 = vpack.c.bf16 %v7799_v0, %v7793_v54  ;;  %v8846_v54 = vpack.c.bf16 %v7810_v17, %v7806_v13  ;;  %v3025_v0 = vld [vmem:[%s8831_s3 + $0x168] sm:$0xff]  ;;  %v3027_v13 = vld [vmem:[%s8831_s3 + $0x178] sm:$0xff]  ;;  %v3149_v17 = vld [vmem:[%s8831_s3 + $0x180] sm:$0xff] }
 0x2d3   :  { %6568 = vmatprep.subr.bf16.mxu1 %v6567_v44  ;;  %v2901_v44 = vld [vmem:[%s8831_s3 + $0x150] sm:$0xff] }
 0x2d5   :  { %6040 = vmatmul.mubr.msk.f32.gmra.mrb[4].mxu1 %vm1696_vm1, %v2650_v61 }
 0x2d6   :  { %2753 = vmatprep.mubr.f32.mxu1 %v7136_v2 }
 0x2d9   :  { %6041 = vmatmul.mubr.msk.f32.gmra.mrb[6].mxu1 %vm1696_vm1, %v2651_v14  ;;  %v3666_v14 = vpop.permute.xlu1 %3665 }
 0x2da   :  { %2759 = vmatprep.mubr.f32.mxu1 %v7136_v2 }
 0x2dd   :  { %6042 = vmatmul.mubr.msk.f32.gmra.mrb[8].mxu1 %vm1696_vm1, %v2652_v10 }
 0x2de   :  { %2866 = vmatprep.mubr.f32.mxu1 %v7136_v2 }
 0x2e1   :  { %6043 = vmatmul.mubr.msk.f32.vlgmr.msra.gmra.mrb[2].mxu1 %vm1696_vm1, %v2774_v11 }
 0x2e2   :  { %6570 = vmatpush1.bf16.msra.mxu1 %v6569_v39  ;;  %2872 = vmatprep.mubr.f32.mxu1 %v7136_v2  ;;  %v8845_v39 = vpack.c.bf16 %v7822_v23, %v7818_v22  ;;  %v8847_v22 = vpack.c.bf16 %v7851_v62, %v7847_v58  ;;  %v3026_v23 = vld [vmem:[%s8831_s3 + $0x170] sm:$0xff]  ;;  %v8848_v58 = vpack.c.bf16 %v7839_v49, %v7835_v48  ;;  %v3150_v62 = vld [vmem:[%s8831_s3 + $0x188] sm:$0xff]  ;;  %v3152_v48 = vld [vmem:[%s8831_s3 + $0x198] sm:$0xff] }
 0x2e3   :  { %6572 = vmatprep.subr.bf16.mxu1 %v8843_v16  ;;  %v3274_v49 = vld [vmem:[%s8831_s3 + $0x1a0] sm:$0xff] }
 0x2e5   :  { %6044 = vmatmul.mubr.msk.f32.gmra.mrb[4].mxu1 %vm1696_vm1, %v2775_v15 }
 0x2e6   :  { %2878 = vmatprep.mubr.f32.mxu1 %v7136_v2 }
 0x2e9   :  { %6045 = vmatmul.mubr.msk.f32.gmra.mrb[6].mxu1 %vm1696_vm1, %v2776_v21 }
 0x2ea   :  { %2884 = vmatprep.mubr.f32.mxu1 %v7136_v2 }
 0x2ed   :  { %6046 = vmatmul.mubr.msk.f32.gmra.mrb[8].mxu1 %vm1696_vm1, %v2777_v20  ;;  %v3671_v20 = vpop.permute.xlu0 %3670 }
 0x2ee   :  { %2991 = vmatprep.mubr.f32.mxu1 %v7136_v2 }
 0x2f1   :  { %6047 = vmatmul.mubr.msk.f32.vlgmr.msra.gmra.mrb[2].mxu1 %vm1696_vm1, %v2899_v32 }
 0x2f2   :  { %6574 = vmatpush1.bf16.msra.mxu1 %v8844_v35  ;;  %2997 = vmatprep.mubr.f32.mxu1 %v7136_v2 }
 0x2f3   :  { %6576 = vmatprep.subr.bf16.mxu1 %v8845_v39 }
 0x2f5   :  { %6048 = vmatmul.mubr.msk.f32.gmra.mrb[4].mxu1 %vm1696_vm1, %v2900_v37 }
 0x2f6   :  { %3003 = vmatprep.mubr.f32.mxu1 %v7136_v2 }
 0x2f9   :  { %6049 = vmatmul.mubr.msk.f32.gmra.mrb[6].mxu1 %vm1696_vm1, %v2901_v44 }
 0x2fa   :  { %3009 = vmatprep.mubr.f32.mxu1 %v7136_v2 }
 0x2fd   :  { %6050 = vmatmul.mubr.msk.f32.gmra.mrb[8].mxu1 %vm1696_vm1, %v2902_v50 }
 0x2fe   :  { %3116 = vmatprep.mubr.f32.mxu1 %v7136_v2 }
 0x301   :  { %6051 = vmatmul.mubr.msk.f32.vlgmr.msra.gmra.mrb[2].mxu1 %vm1696_vm1, %v3024_v51 }
 0x302   :  { %6578 = vmatpush1.bf16.msra.mxu1 %v8846_v54  ;;  %3122 = vmatprep.mubr.f32.mxu1 %v7136_v2  ;;  %v5169_v54 = vld [vmem:[%s8833_s5 + $0x220] sm:$0xff] }
 0x303   :  { %6580 = vmatprep.subr.bf16.mxu1 %v8847_v22 }
 0x305   :  { %6052 = vmatmul.mubr.msk.f32.gmra.mrb[4].mxu1 %vm1696_vm1, %v3025_v0  ;;  %v5170_v0 = vld [vmem:[%s8833_s5 + $0x228] sm:$0xff] }
 0x306   :  { %3128 = vmatprep.mubr.f32.mxu1 %v7136_v2  ;;  %v6694_v22 = vpack.c.bf16 %v5170_v0, %v5169_v54 }
 0x309   :  { %6053 = vmatmul.mubr.msk.f32.gmra.mrb[6].mxu1 %vm1696_vm1, %v3026_v23  ;;  %v5171_v23 = vld [vmem:[%s8833_s5 + $0x230] sm:$0xff] }
 0x30a   :  { %3134 = vmatprep.mubr.f32.mxu1 %v7136_v2 }
 0x30d   :  { %6054 = vmatmul.mubr.msk.f32.gmra.mrb[8].mxu1 %vm1696_vm1, %v3027_v13  ;;  %v5172_v13 = vld [vmem:[%s8833_s5 + $0x238] sm:$0xff] }
 0x30e   :  { %3241 = vmatprep.mubr.f32.mxu1 %v7136_v2 }
 0x311   :  { %6055 = vmatmul.mubr.msk.f32.vlgmr.msra.gmra.mrb[2].mxu1 %vm1696_vm1, %v3149_v17  ;;  %v6697_v17 = vpack.c.bf16 %v5172_v13, %v5171_v23  ;;  %v5337_v13 = vld [vmem:[%s8833_s5 + $0x270] sm:$0xff] }
 0x312   :  { %6582 = vmatpush1.bf16.msra.mxu1 %v8848_v58  ;;  %3247 = vmatprep.mubr.f32.mxu1 %v7136_v2  ;;  %v3758_v58 = vld [vmem:[%s8833_s5] sm:$0xff] }
 0x313   :  { %6584 = vmatprep.subr.bf16.mxu1 %v6583_v19  ;;  %v3275_v19 = vld [vmem:[%s8831_s3 + $0x1a8] sm:$0xff] }
 0x315   :  { %6056 = vmatmul.mubr.msk.f32.gmra.mrb[4].mxu1 %vm1696_vm1, %v3150_v62  ;;  %v3759_v62 = vld [vmem:[%s8833_s5 + $0x8] sm:$0xff] }
 0x316   :  { %3253 = vmatprep.mubr.f32.mxu1 %v7136_v2 }
 0x319   :  { %6057 = vmatmul.mubr.msk.f32.gmra.mrb[6].mxu1 %vm1696_vm1, %v3151_v46 }
 0x31a   :  { %3259 = vmatprep.mubr.f32.mxu1 %v7136_v2 }
 0x31d   :  { %6058 = vmatmul.mubr.msk.f32.gmra.mrb[8].mxu1 %vm1696_vm1, %v3152_v48 }
 0x31e   :  { %3366 = vmatprep.mubr.f32.mxu1 %v7136_v2 }
 0x321   :  { %6059 = vmatmul.mubr.msk.f32.vlgmr.msra.gmra.mrb[2].mxu1 %vm1696_vm1, %v3274_v49 }
 0x322   :  { %6586 = vmatpush1.bf16.msra.mxu1 %v6585_v52  ;;  %3372 = vmatprep.mubr.f32.mxu1 %v7136_v2  ;;  %v3401_v52 = vld [vmem:[%s8831_s3 + $0x1d0] sm:$0xff] }
 0x323   :  { %6755 = vmatprep.subr.bf16.mxu1 %v7919_v34  ;;  %v3526_v34 = vld [vmem:[%s8831_s3 + $0x1f0] sm:$0xff] }
 0x325   :  { %6060 = vmatmul.mubr.msk.f32.gmra.mrb[4].mxu1 %vm1696_vm1, %v3275_v19  ;;  %v6598_v19 = vpack.c.bf16 %v3759_v62, %v3758_v58 }
 0x326   :  { %3378 = vmatprep.mubr.f32.mxu1 %v7136_v2 }
 0x329   :  { %6061 = vmatmul.mubr.msk.f32.gmra.mrb[6].mxu1 %vm1696_vm1, %v3276_v9  ;;  %v3760_v9 = vld [vmem:[%s8833_s5 + $0x10] sm:$0xff] }
 0x32a   :  { %3384 = vmatprep.mubr.f32.mxu1 %v7136_v2 }
 0x32d   :  { %6062 = vmatmul.mubr.msk.f32.gmra.mrb[8].mxu1 %vm1696_vm1, %v3277_v26  ;;  %v3761_v26 = vld [vmem:[%s8833_s5 + $0x18] sm:$0xff] }
 0x32e   :  { %3491 = vmatprep.mubr.f32.mxu1 %v7136_v2 }
 0x331   :  { %6063 = vmatmul.mubr.msk.f32.vlgmr.msra.gmra.mrb[2].mxu1 %vm1696_vm1, %v3399_v28 }
 0x332   :  { %6756 = vmatpush1.bf16.msra.mxu1 %v7915_v63  ;;  %3497 = vmatprep.mubr.f32.mxu1 %v7136_v2  ;;  %v3402_v63 = vld [vmem:[%s8831_s3 + $0x1d8] sm:$0xff] }
 0x333   :  { %6693 = vmatprep.subr.bf16.mxu1 %v7151_v45 }
 0x335   :  { %6064 = vmatmul.mubr.msk.f32.gmra.mrb[4].mxu1 %vm1696_vm1, %v3400_v40 }
 0x336   :  { %3503 = vmatprep.mubr.f32.mxu1 %v7136_v2 }
 0x339   :  { %6065 = vmatmul.mubr.msk.f32.gmra.mrb[6].mxu1 %vm1696_vm1, %v3401_v52  ;;  %v6601_v52 = vpack.c.bf16 %v3761_v26, %v3760_v9 }
 0x33a   :  { %3509 = vmatprep.mubr.f32.mxu1 %v7136_v2 }
 0x33d   :  { %6066 = vmatmul.mubr.msk.f32.gmra.mrb[8].mxu1 %vm1696_vm1, %v3402_v63 }
 0x33e   :  { %3628 = vmatprep.mubr.f32.mxu1 %v7136_v2 }
 0x341   :  { %6069 = vmatmul.mubr.msk.f32.vlgmr.msra.gmra.mrb[6].mxu1 %vm1696_vm1, %v3526_v34  ;;  %v3922_v34 = vld [vmem:[%s8833_s5 + $0x40] sm:$0xff] }
 0x342   :  { %3634 = vmatprep.mubr.f32.mxu1 %v7136_v2  ;;  %6695 = vmatpush3.bf16.msra.mxu1 %v6694_v22 }
 0x343   :  { %6696 = vmatprep.subr.bf16.mxu1 %v7151_v45 }
 0x345   :  { %6070 = vmatmul.mubr.msk.f32.gmra.mrb[8].mxu1 %vm1696_vm1, %v3527_v47  ;;  %v3923_v47 = vld [vmem:[%s8833_s5 + $0x48] sm:$0xff] }
 0x346   :  { %6428 = vmatprep.mubr.msk.f32.mxu1 %vm7152_vm5, %v7136_v2  ;;  %6698 = vmatpush3.bf16.msra.mxu1 %v6697_v17  ;;  %v6604_v30 = vpack.c.bf16 %v3923_v47, %v3922_v34  ;;  %v5338_v17 = vld [vmem:[%s8833_s5 + $0x278] sm:$0xff]  ;;  %v4088_v47 = vld [vmem:[%s8833_s5 + $0x80] sm:$0xff] }
 0x347   :  { %6705 = vmatprep.subr.bf16.mxu1 %v7151_v45 }
 0x35d   :  { %v3618_v25 = vpop.f32.mrb[4].mxu0 }
 0x35e   :  { %v3620_v5 = vpop.f32.mrb[5].mxu0 }
 0x366   :  { %v3624_v3 = vpop.f32.mrb[6].mxu0 }
 0x367   :  { %v3626_v24 = vpop.f32.mrb[7].mxu0 }
 0x404   :  { %v3493_v12 = vpop.f32.mrb[2].mxu1 }
 0x405   :  { %v6759_v7 = vadd.f32 %v3618_v25, %v3493_v12  ;;  %v3495_v6 = vpop.f32.mrb[3].mxu1  ;;  %v3925_v12 = vld [vmem:[%s8833_s5 + $0x58] sm:$0xff] }
 0x406   :  { %v6760_v36 = vadd.f32 %v3620_v5, %v3495_v6 }
 0x407   :  { %v3673_v38 = vadd.f32 %v6759_v7, %v3656_v53 }
 0x408   :  { %v3674_v18 = vadd.f32 %v6760_v36, %v3656_v53  ;;  %v3499_v43 = vpop.f32.mrb[4].mxu1 }
 0x409   :  { %v3681_v4 = vmax.f32 %v3673_v38, 0.0  ;;  %v6761_v31 = vadd.f32 %v3624_v3, %v3499_v43  ;;  %v3501_v29 = vpop.f32.mrb[5].mxu1  ;;  %v6607_v43 = vpack.c.bf16 %v3925_v12, %v3924_v57  ;;  %v5503_v57 = vld [vmem:[%s8833_s5 + $0x2a0] sm:$0xff]  ;;  %v5504_v12 = vld [vmem:[%s8833_s5 + $0x2a8] sm:$0xff] }
 0x40a   :  { %v3682_v60 = vmax.f32 %v3674_v18, 0.0  ;;  %v6762_v1 = vadd.f32 %v3626_v24, %v3501_v29 }
 0x40b   :  { %v3675_v42 = vadd.f32 %v6761_v31, %v3661_v59  ;;  %3689 = vxpose.xlu1.b32.start [1/4] (short) (narrow) %v3681_v4, 56  ;;  %v4005_v4 = vld [vmem:[%s8833_s5 + $0x60] sm:$0xff]  ;;  %v4006_v31 = vld [vmem:[%s8833_s5 + $0x68] sm:$0xff] }
 0x40c   :  { %v3676_v55 = vadd.f32 %v6762_v1, %v3661_v59  ;;  %3721 = vxpose.xlu0.b32.start [1/4] (short) (narrow) %v3682_v60, 56 }
 0x40d   :  { %v3683_v56 = vmax.f32 %v3675_v42, 0.0 }
 0x40e   :  { %v3684_v61 = vmax.f32 %v3676_v55, 0.0 }
 0x40f   :  { %3690 = vxpose.xlu1.b32.cont [2/4] (short) (narrow) %v3683_v56, 56 }
 0x410   :  { %3722 = vxpose.xlu0.b32.cont [2/4] (short) (narrow) %v3684_v61, 56 }
 0x414   :  { %v3630_v10 = vpop.f32.mrb[6].mxu1 }
 0x415   :  { %v3677_v11 = vadd.f32 %v3666_v14, %v3630_v10  ;;  %v3632_v15 = vpop.f32.mrb[7].mxu1 }
 0x416   :  { %v3678_v16 = vadd.f32 %v3666_v14, %v3632_v15  ;;  %v6610_v14 = vpack.c.bf16 %v4006_v31, %v4005_v4 }
 0x417   :  { %v3685_v21 = vmax.f32 %v3677_v11, 0.0 }
 0x418   :  { %v3686_v32 = vmax.f32 %v3678_v16, 0.0  ;;  %v3636_v35 = vpop.f32.mrb[8].mxu1  ;;  %v5335_v16 = vld [vmem:[%s8833_s5 + $0x260] sm:$0xff] }
 0x419   :  { %v3679_v37 = vadd.f32 %v3671_v20, %v3636_v35  ;;  %3691 = vxpose.xlu1.b32.cont [3/4] (short) (narrow) %v3685_v21, 56  ;;  %v3638_v39 = vpop.f32.mrb[9].mxu1  ;;  %v5336_v21 = vld [vmem:[%s8833_s5 + $0x268] sm:$0xff] }
 0x41a   :  { %v3680_v44 = vadd.f32 %v3671_v20, %v3638_v39  ;;  %3723 = vxpose.xlu0.b32.cont [3/4] (short) (narrow) %v3686_v32, 56  ;;  %v6706_v23 = vpack.c.bf16 %v5336_v21, %v5335_v16  ;;  %v5669_v21 = vld [vmem:[%s8833_s5 + $0x2e0] sm:$0xff] }
 0x41b   :  { %v3687_v50 = vmax.f32 %v3679_v37, 0.0 }
 0x41c   :  { %v3688_v51 = vmax.f32 %v3680_v44, 0.0  ;;  %v4007_v44 = vld [vmem:[%s8833_s5 + $0x70] sm:$0xff] }
 0x41d   :  { %3692 = vxpose.xlu1.b32.end [4/4] (short) (narrow) %v3687_v50, 56  ;;  %v4008_v50 = vld [vmem:[%s8833_s5 + $0x78] sm:$0xff] }
 0x41e   :  { %3724 = vxpose.xlu0.b32.end [4/4] (short) (narrow) %v3688_v51, 56  ;;  %v6613_v26 = vpack.c.bf16 %v4008_v50, %v4007_v44  ;;  %v5671_v50 = vld [vmem:[%s8833_s5 + $0x2f0] sm:$0xff] }
 0x491   :  { %v8291_v46 = vpop.trf.xlu1 }
 0x492   :  { %v3763_v48 = vrot.slane %v8291_v46, 1  ;;  %v8294_v49 = vpop.trf.xlu0  ;;  %v3917_v55 = vrot.slane %v8291_v46, 2 }
 0x493   :  { %v3754_v5 = vrot.slane %v8294_v49, 7  ;;  %v3919_v56 = vrot.slane %v8294_v49, 1 }
 0x494   :  { %v3765_v28 = vsel %vm3756_vm6, %v3763_v48, %v8294_v49 }
 0x495   :  { %6242 = vmatmul.mubr.msk.f32.vlgmr.msra.gmra.mrb[8].mxu0 %vm3770_vm7, %v3765_v28  ;;  %v8305_v40 = vpop.trf.xlu1  ;;  %v3757_v53 = vsel %vm3756_vm6, %v8291_v46, %v3754_v5  ;;  %v3921_v22 = vsel %vm3756_vm6, %v3917_v55, %v3919_v56  ;;  %v6709_v5 = vpack.c.bf16 %v5338_v17, %v5337_v13  ;;  %v4173_v55 = vld [vmem:[%s8833_s5 + $0xa0] sm:$0xff]  ;;  %v4174_v56 = vld [vmem:[%s8833_s5 + $0xa8] sm:$0xff] }
 0x496   :  { %6599 = vmatpush3.bf16.msra.mxu0 %v6598_v19  ;;  %6252 = vmatprep.mubr.msk.f32.mxu0 %vm7152_vm5, %v7136_v2  ;;  %v8309_v63 = vpop.trf.xlu0  ;;  %v4500_v25 = vrot.slane %v8305_v40, 7  ;;  %v4257_v13 = vld [vmem:[%s8833_s5 + $0xc8] sm:$0xff] }
 0x497   :  { %6600 = vmatprep.subr.bf16.mxu0 %v7151_v45  ;;  %v4502_v3 = vrot.slane %v8309_v63, 6 }
 0x499   :  { %v3707_v24 = vpop.trf.xlu1  ;;  %v8322_v27 = vsel %vm3756_vm6, %v4500_v25, %v4502_v3  ;;  %v4089_v25 = vld [vmem:[%s8833_s5 + $0x88] sm:$0xff] }
 0x49a   :  { %6602 = vmatpush3.bf16.msra.mxu0 %v6601_v52  ;;  %v4584_v41 = vrot.slane %v3707_v24, 6  ;;  %v4668_v33 = vrot.slane %v3707_v24, 7  ;;  %v3739_v8 = vpop.trf.xlu0 }
 0x49b   :  { %6603 = vmatprep.subr.bf16.mxu0 %v7151_v45  ;;  %v4587_v7 = vrot.slane %v3739_v8, 5  ;;  %v4670_v6 = vrot.slane %v3739_v8, 6 }
 0x49d   :  { %6253 = vmatmul.mubr.msk.f32.vlgmr.msra.gmra.mrb[10].mxu0 %vm3770_vm7, %v3757_v53  ;;  %v8335_v36 = vsel %vm3756_vm6, %v4584_v41, %v4587_v7  ;;  %v8338_v38 = vsel %vm3756_vm6, %v4668_v33, %v4670_v6  ;;  %v3708_v18 = vpop.trf.xlu1  ;;  %v4002_v41 = vrot.slane %v8294_v49, 2  ;;  %v6616_v6 = vpack.c.bf16 %v4089_v25, %v4088_v47  ;;  %v4258_v47 = vld [vmem:[%s8833_s5 + $0xd0] sm:$0xff] }
 0x49e   :  { %6605 = vmatpush3.bf16.msra.mxu0 %v6604_v30  ;;  %6263 = vmatprep.mubr.msk.f32.mxu0 %vm7152_vm5, %v7136_v2  ;;  %v4834_v29 = vrot.slane %v3708_v18, 1  ;;  %v4915_v59 = vrot.slane %v3708_v18, 2  ;;  %v3740_v60 = vpop.trf.xlu0  ;;  %v4000_v30 = vrot.slane %v8291_v46, 3 }
 0x49f   :  { %6606 = vmatprep.subr.bf16.mxu0 %v7151_v45  ;;  %v4752_v1 = vrot.slane %v3740_v60, 7  ;;  %v4917_v42 = vrot.slane %v3740_v60, 1 }
 0x4a0   :  { %v8352_v61 = vsel %vm3756_vm6, %v4834_v29, %v3740_v60  ;;  %v4004_v4 = vsel %vm3756_vm6, %v4000_v30, %v4002_v41  ;;  %v6718_v29 = vpack.c.bf16 %v5504_v12, %v5503_v57  ;;  %v5506_v60 = vld [vmem:[%s8833_s5 + $0x2b8] sm:$0xff]  ;;  %v4253_v30 = vrot.slane %v8309_v63, 3 }
 0x4a1   :  { %v8355_v10 = vsel %vm3756_vm6, %v3708_v18, %v4752_v1  ;;  %v3709_v11 = vpop.trf.xlu1  ;;  %v8358_v15 = vsel %vm3756_vm6, %v4915_v59, %v4917_v42  ;;  %v4090_v18 = vld [vmem:[%s8833_s5 + $0x90] sm:$0xff]  ;;  %v4083_v42 = vrot.slane %v8291_v46, 4 }
 0x4a2   :  { %6608 = vmatpush3.bf16.msra.mxu0 %v6607_v43  ;;  %v4999_v20 = vrot.slane %v3709_v11, 1  ;;  %v5080_v32 = vrot.slane %v3709_v11, 2  ;;  %v5164_v35 = vrot.slane %v3709_v11, 3  ;;  %v5247_v37 = vrot.slane %v3709_v11, 4  ;;  %v3741_v39 = vpop.trf.xlu0  ;;  %v4091_v43 = vld [vmem:[%s8833_s5 + $0x98] sm:$0xff]  ;;  %v5505_v59 = vld [vmem:[%s8833_s5 + $0x2b0] sm:$0xff] }
 0x4a3   :  { %6609 = vmatprep.subr.bf16.mxu0 %v7151_v45  ;;  %v5083_v51 = vrot.slane %v3741_v39, 1  ;;  %v5166_v54 = vrot.slane %v3741_v39, 2  ;;  %v5249_v0 = vrot.slane %v3741_v39, 3  ;;  %v5330_v33 = vrot.slane %v3709_v11, 5 }
 0x4a4   :  { %v8381_v58 = vsel %vm3756_vm6, %v4999_v20, %v3741_v39  ;;  %v5332_v8 = vrot.slane %v3741_v39, 4  ;;  %v6619_v1 = vpack.c.bf16 %v4091_v43, %v4090_v18  ;;  %v6721_v16 = vpack.c.bf16 %v5506_v60, %v5505_v59  ;;  %v5670_v20 = vld [vmem:[%s8833_s5 + $0x2e8] sm:$0xff]  ;;  %v4425_v59 = vld [vmem:[%s8833_s5 + $0x118] sm:$0xff] }
 0x4a5   :  { %6264 = vmatmul.mubr.msk.f32.vlgmr.msra.gmra.mrb[12].mxu0 %vm3770_vm7, %v3921_v22  ;;  %v5168_v62 = vsel %vm3756_vm6, %v5164_v35, %v5166_v54  ;;  %v8386_v48 = vsel %vm3756_vm6, %v5080_v32, %v5083_v51  ;;  %v8388_v19 = vpop.trf.xlu1  ;;  %v8391_v9 = vsel %vm3756_vm6, %v5247_v37, %v5249_v0  ;;  %v4175_v32 = vld [vmem:[%s8833_s5 + $0xb0] sm:$0xff]  ;;  %v4176_v35 = vld [vmem:[%s8833_s5 + $0xb8] sm:$0xff]  ;;  %v6730_v44 = vpack.c.bf16 %v5670_v20, %v5669_v21  ;;  %v4423_v18 = vld [vmem:[%s8833_s5 + $0x108] sm:$0xff] }
 0x4a6   :  { %6611 = vmatpush3.bf16.msra.mxu0 %v6610_v14  ;;  %6274 = vmatprep.mubr.msk.f32.mxu0 %vm7152_vm5, %v7136_v2  ;;  %v5414_v28 = vrot.slane %v8388_v19, 4  ;;  %v5581_v52 = vrot.slane %v8388_v19, 6  ;;  %v8397_v34 = vpop.trf.xlu0  ;;  %v5334_v31 = vsel %vm3756_vm6, %v5330_v33, %v5332_v8  ;;  %v4085_v14 = vrot.slane %v8294_v49, 3  ;;  %v5672_v51 = vld [vmem:[%s8833_s5 + $0x2f8] sm:$0xff]  ;;  %v4341_v33 = vld [vmem:[%s8833_s5 + $0xf0] sm:$0xff]  ;;  %v4591_v20 = vld [vmem:[%s8833_s5 + $0x148] sm:$0xff] }
 0x4a7   :  { %6612 = vmatprep.subr.bf16.mxu0 %v7151_v45  ;;  %6429 = vmatmul.mubr.msk.f32.vlgmr.msra.gmra.mrb[10].mxu1 %vm3770_vm7, %v5168_v62  ;;  %v5417_v3 = vrot.slane %v8397_v34, 3  ;;  %v5583_v24 = vrot.slane %v8397_v34, 5  ;;  %v5498_v11 = vrot.slane %v8388_v19, 5  ;;  %v5500_v46 = vrot.slane %v8397_v34, 4  ;;  %v4342_v8 = vld [vmem:[%s8833_s5 + $0xf8] sm:$0xff] }
 0x4a8   :  { %6707 = vmatpush3.bf16.msra.mxu1 %v6706_v23  ;;  %6450 = vmatprep.mubr.msk.f32.mxu1 %vm7152_vm5, %v7136_v2  ;;  %v6622_v49 = vpack.c.bf16 %v4174_v56, %v4173_v55  ;;  %v4087_v37 = vsel %vm3756_vm6, %v4083_v42, %v4085_v14  ;;  %v4167_v54 = vrot.slane %v8305_v40, 3  ;;  %v4170_v0 = vrot.slane %v8309_v63, 2  ;;  %v4256_v23 = vld [vmem:[%s8833_s5 + $0xc0] sm:$0xff]  ;;  %v4506_v55 = vld [vmem:[%s8833_s5 + $0x128] sm:$0xff] }
 0x4a9   :  { %6708 = vmatprep.subr.bf16.mxu1 %v7151_v45  ;;  %v8421_v7 = vsel %vm3756_vm6, %v5414_v28, %v5417_v3  ;;  %v8424_v53 = vsel %vm3756_vm6, %v5581_v52, %v5583_v24  ;;  %v5502_v39 = vsel %vm3756_vm6, %v5498_v11, %v5500_v46  ;;  %v6625_v22 = vpack.c.bf16 %v4176_v35, %v4175_v32  ;;  %v4340_v3 = vld [vmem:[%s8833_s5 + $0xe8] sm:$0xff]  ;;  %v4505_v42 = vld [vmem:[%s8833_s5 + $0x120] sm:$0xff]  ;;  %v4508_v46 = vld [vmem:[%s8833_s5 + $0x138] sm:$0xff] }
 0x4aa   :  { %6614 = vmatpush3.bf16.msra.mxu0 %v6613_v26  ;;  %v5664_v17 = vrot.slane %v8388_v19, 7  ;;  %v5666_v62 = vrot.slane %v8397_v34, 6  ;;  %v6733_v26 = vpack.c.bf16 %v5672_v51, %v5671_v50  ;;  %v4172_v28 = vsel %vm3756_vm6, %v4167_v54, %v4170_v0  ;;  %v4259_v19 = vld [vmem:[%s8833_s5 + $0xd8] sm:$0xff]  ;;  %v4592_v32 = vld [vmem:[%s8833_s5 + $0x150] sm:$0xff]  ;;  %v4755_v0 = vld [vmem:[%s8833_s5 + $0x180] sm:$0xff] }
 0x4ab   :  { %6615 = vmatprep.subr.bf16.mxu0 %v7151_v45  ;;  %v6628_v52 = vpack.c.bf16 %v4257_v13, %v4256_v23  ;;  %v6631_v25 = vpack.c.bf16 %v4259_v19, %v4258_v47  ;;  %v4251_v24 = vrot.slane %v8305_v40, 4  ;;  %v6637_v12 = vpack.c.bf16 %v4342_v8, %v4341_v33  ;;  %v4593_v35 = vld [vmem:[%s8833_s5 + $0x158] sm:$0xff]  ;;  %v4920_v19 = vld [vmem:[%s8833_s5 + $0x1c0] sm:$0xff] }
 0x4ac   :  { %6710 = vmatpush3.bf16.msra.mxu1 %v6709_v5  ;;  %v5668_v34 = vsel %vm3756_vm6, %v5664_v17, %v5666_v62  ;;  %v4339_v5 = vld [vmem:[%s8833_s5 + $0xe0] sm:$0xff]  ;;  %v4334_v43 = vrot.slane %v8305_v40, 5  ;;  %v4417_v56 = vrot.slane %v8305_v40, 6  ;;  %v4419_v14 = vrot.slane %v8309_v63, 5  ;;  %v4676_v51 = vld [vmem:[%s8833_s5 + $0x178] sm:$0xff] }
 0x4ad   :  { %6275 = vmatmul.mubr.msk.f32.vlgmr.msra.gmra.mrb[14].mxu0 %vm3770_vm7, %v4004_v4  ;;  %6717 = vmatprep.subr.bf16.mxu1 %v7151_v45  ;;  %v6634_v41 = vpack.c.bf16 %v4340_v3, %v4339_v5  ;;  %v4255_v57 = vsel %vm3756_vm6, %v4251_v24, %v4253_v30  ;;  %v4336_v4 = vrot.slane %v8309_v63, 4  ;;  %v6646_v11 = vpack.c.bf16 %v4506_v55, %v4505_v42  ;;  %v4590_v63 = vld [vmem:[%s8833_s5 + $0x140] sm:$0xff]  ;;  %v4758_v13 = vld [vmem:[%s8833_s5 + $0x198] sm:$0xff]  ;;  %v5003_v30 = vld [vmem:[%s8833_s5 + $0x1e8] sm:$0xff] }
 0x4ae   :  { %6617 = vmatpush3.bf16.msra.mxu0 %v6616_v6  ;;  %6285 = vmatprep.mubr.msk.f32.mxu0 %vm7152_vm5, %v7136_v2  ;;  %v4422_v6 = vld [vmem:[%s8833_s5 + $0x100] sm:$0xff]  ;;  %v4421_v21 = vsel %vm3756_vm6, %v4417_v56, %v4419_v14  ;;  %v4923_v5 = vld [vmem:[%s8833_s5 + $0x1d8] sm:$0xff]  ;;  %v5421_v42 = vld [vmem:[%s8833_s5 + $0x288] sm:$0xff] }
 0x4af   :  { %6618 = vmatprep.subr.bf16.mxu0 %v7151_v45  ;;  %6451 = vmatmul.mubr.msk.f32.vlgmr.msra.gmra.mrb[12].mxu1 %vm3770_vm7, %v5334_v31  ;;  %v6640_v31 = vpack.c.bf16 %v4423_v18, %v4422_v6  ;;  %v4338_v60 = vsel %vm3756_vm6, %v4334_v43, %v4336_v4  ;;  %v4837_v62 = vld [vmem:[%s8833_s5 + $0x1a0] sm:$0xff]  ;;  %v5005_v33 = vld [vmem:[%s8833_s5 + $0x1f8] sm:$0xff] }
 0x4b0   :  { %6719 = vmatpush3.bf16.msra.mxu1 %v6718_v29  ;;  %6472 = vmatprep.mubr.msk.f32.mxu1 %vm7152_vm5, %v7136_v2  ;;  %v4424_v29 = vld [vmem:[%s8833_s5 + $0x110] sm:$0xff]  ;;  %v5002_v24 = vld [vmem:[%s8833_s5 + $0x1e0] sm:$0xff]  ;;  %v5089_v18 = vld [vmem:[%s8833_s5 + $0x218] sm:$0xff] }
 0x4b1   :  { %6720 = vmatprep.subr.bf16.mxu1 %v7151_v45  ;;  %v5252_v4 = vld [vmem:[%s8833_s5 + $0x240] sm:$0xff]  ;;  %v5423_v56 = vld [vmem:[%s8833_s5 + $0x298] sm:$0xff] }
 0x4b2   :  { %6620 = vmatpush3.bf16.msra.mxu0 %v6619_v1  ;;  %v6643_v1 = vpack.c.bf16 %v4425_v59, %v4424_v29  ;;  %v5255_v59 = vld [vmem:[%s8833_s5 + $0x258] sm:$0xff] }
 0x4b3   :  { %6621 = vmatprep.subr.bf16.mxu0 %v7151_v45 }
 0x4b4   :  { %6722 = vmatpush3.bf16.msra.mxu1 %v6721_v16  ;;  %v4507_v16 = vld [vmem:[%s8833_s5 + $0x130] sm:$0xff] }
 0x4b5   :  { %6286 = vmatmul.mubr.msk.f32.vlgmr.msra.gmra.mrb[16].mxu0 %vm3770_vm7, %v4087_v37  ;;  %6729 = vmatprep.subr.bf16.mxu1 %v7151_v45  ;;  %v6649_v40 = vpack.c.bf16 %v4508_v46, %v4507_v16  ;;  %v6655_v37 = vpack.c.bf16 %v4593_v35, %v4592_v32  ;;  %v5587_v16 = vld [vmem:[%s8833_s5 + $0x2c8] sm:$0xff]  ;;  %v5753_v32 = vld [vmem:[%s8833_s5 + $0x310] sm:$0xff]  ;;  %v5754_v35 = vld [vmem:[%s8833_s5 + $0x318] sm:$0xff] }
 0x4b6   :  { %6623 = vmatpush3.bf16.msra.mxu0 %v6622_v49  ;;  %6296 = vmatprep.mubr.msk.f32.mxu0 %vm7152_vm5, %v7136_v2  ;;  %v6652_v49 = vpack.c.bf16 %v4591_v20, %v4590_v63  ;;  %v5751_v63 = vld [vmem:[%s8833_s5 + $0x300] sm:$0xff]  ;;  %v5752_v20 = vld [vmem:[%s8833_s5 + $0x308] sm:$0xff] }
 0x4b7   :  { %6624 = vmatprep.subr.bf16.mxu0 %v7151_v45  ;;  %6473 = vmatmul.mubr.msk.f32.vlgmr.msra.gmra.mrb[14].mxu1 %vm3770_vm7, %v5502_v39  ;;  %v4673_v39 = vld [vmem:[%s8833_s5 + $0x160] sm:$0xff] }
 0x4b8   :  { %6731 = vmatpush3.bf16.msra.mxu1 %v6730_v44  ;;  %6494 = vmatprep.mubr.msk.f32.mxu1 %vm7152_vm5, %v7136_v2  ;;  %v4674_v44 = vld [vmem:[%s8833_s5 + $0x168] sm:$0xff] }
 0x4b9   :  { %6732 = vmatprep.subr.bf16.mxu1 %v7151_v45  ;;  %v6658_v50 = vpack.c.bf16 %v4674_v44, %v4673_v39  ;;  %v6739_v39 = vpack.c.bf16 %v5754_v35, %v5753_v32  ;;  %v3711_v44 = vpop.trf.xlu1 }
 0x4ba   :  { %6626 = vmatpush3.bf16.msra.mxu0 %v6625_v22  ;;  %v4756_v22 = vld [vmem:[%s8833_s5 + $0x188] sm:$0xff] }
 0x4bb   :  { %6627 = vmatprep.subr.bf16.mxu0 %v7151_v45  ;;  %v6664_v23 = vpack.c.bf16 %v4756_v22, %v4755_v0 }
 0x4bc   :  { %6734 = vmatpush3.bf16.msra.mxu1 %v6733_v26  ;;  %v4838_v26 = vld [vmem:[%s8833_s5 + $0x1a8] sm:$0xff] }
 0x4bd   :  { %6297 = vmatmul.mubr.msk.f32.vlgmr.msra.gmra.mrb[18].mxu0 %vm3770_vm7, %v4172_v28  ;;  %6741 = vmatprep.subr.bf16.mxu1 %v7151_v45  ;;  %v6670_v28 = vpack.c.bf16 %v4838_v26, %v4837_v62 }
 0x4be   :  { %6629 = vmatpush3.bf16.msra.mxu0 %v6628_v52  ;;  %6307 = vmatprep.mubr.msk.f32.mxu0 %vm7152_vm5, %v7136_v2  ;;  %v4840_v52 = vld [vmem:[%s8833_s5 + $0x1b8] sm:$0xff] }
 0x4bf   :  { %6630 = vmatprep.subr.bf16.mxu0 %v7151_v45  ;;  %6495 = vmatmul.mubr.msk.f32.vlgmr.msra.gmra.mrb[16].mxu1 %vm3770_vm7, %v5668_v34  ;;  %v4921_v34 = vld [vmem:[%s8833_s5 + $0x1c8] sm:$0xff] }
 0x4c0   :  { %6524 = vmatprep.mubr.msk.f32.mxu1 %vm7152_vm5, %v7136_v2 }
 0x4c2   :  { %6632 = vmatpush3.bf16.msra.mxu0 %v6631_v25  ;;  %v6676_v25 = vpack.c.bf16 %v4921_v34, %v4920_v19  ;;  %v5841_v34 = vld [vmem:[%s8835_s7 + $0x18] sm:$0xff] }
 0x4c3   :  { %6633 = vmatprep.subr.bf16.mxu0 %v7151_v45 }
 0x4c5   :  { %6308 = vmatmul.mubr.msk.f32.vlgmr.msra.gmra.mrb[20].mxu0 %vm3770_vm7, %v4255_v57  ;;  %v5086_v57 = vld [vmem:[%s8833_s5 + $0x200] sm:$0xff] }
 0x4c6   :  { %6635 = vmatpush3.bf16.msra.mxu0 %v6634_v41  ;;  %6318 = vmatprep.mubr.msk.f32.mxu0 %vm7152_vm5, %v7136_v2  ;;  %v6682_v41 = vpack.c.bf16 %v5003_v30, %v5002_v24 }
 0x4c7   :  { %6636 = vmatprep.subr.bf16.mxu0 %v7151_v45 }
 0x4ca   :  { %6638 = vmatpush3.bf16.msra.mxu0 %v6637_v12  ;;  %v5087_v12 = vld [vmem:[%s8833_s5 + $0x208] sm:$0xff] }
 0x4cb   :  { %6639 = vmatprep.subr.bf16.mxu0 %v7151_v45  ;;  %v6688_v6 = vpack.c.bf16 %v5087_v12, %v5086_v57  ;;  %v5844_v57 = vld [vmem:[%s8835_s7 + $0x30] sm:$0xff]  ;;  %v5845_v12 = vld [vmem:[%s8835_s7 + $0x38] sm:$0xff] }
 0x4cd   :  { %6319 = vmatmul.mubr.msk.f32.vlgmr.msra.gmra.mrb[22].mxu0 %vm3770_vm7, %v4338_v60 }
 0x4ce   :  { %6641 = vmatpush3.bf16.msra.mxu0 %v6640_v31  ;;  %6329 = vmatprep.mubr.msk.f32.mxu0 %vm7152_vm5, %v7136_v2  ;;  %v5253_v31 = vld [vmem:[%s8833_s5 + $0x248] sm:$0xff] }
 0x4cf   :  { %6642 = vmatprep.subr.bf16.mxu0 %v7151_v45  ;;  %v6700_v29 = vpack.c.bf16 %v5253_v31, %v5252_v4 }
 0x4d2   :  { %6644 = vmatpush3.bf16.msra.mxu0 %v6643_v1  ;;  %v5420_v1 = vld [vmem:[%s8833_s5 + $0x280] sm:$0xff] }
 0x4d3   :  { %6645 = vmatprep.subr.bf16.mxu0 %v7151_v45  ;;  %v6712_v55 = vpack.c.bf16 %v5421_v42, %v5420_v1 }
 0x4d5   :  { %6330 = vmatmul.mubr.msk.f32.vlgmr.msra.gmra.mrb[24].mxu0 %vm3770_vm7, %v4421_v21  ;;  %v5589_v21 = vld [vmem:[%s8833_s5 + $0x2d8] sm:$0xff] }
 0x4d6   :  { %6647 = vmatpush3.bf16.msra.mxu0 %v6646_v11  ;;  %6340 = vmatprep.mubr.msk.f32.mxu0 %vm7152_vm5, %v7136_v2  ;;  %v5586_v11 = vld [vmem:[%s8833_s5 + $0x2c0] sm:$0xff] }
 0x4d7   :  { %6648 = vmatprep.subr.bf16.mxu0 %v7151_v45  ;;  %v6724_v46 = vpack.c.bf16 %v5587_v16, %v5586_v11 }
 0x4da   :  { %6650 = vmatpush3.bf16.msra.mxu0 %v6649_v40 }
 0x4db   :  { %6651 = vmatprep.subr.bf16.mxu0 %v7151_v45 }
 0x4dd   :  { %6341 = vmatmul.mubr.msk.f32.vlgmr.msra.gmra.mrb[26].mxu0 %vm3770_vm7, %v8322_v27  ;;  %v4675_v27 = vld [vmem:[%s8833_s5 + $0x170] sm:$0xff] }
 0x4de   :  { %6653 = vmatpush3.bf16.msra.mxu0 %v6652_v49  ;;  %6351 = vmatprep.mubr.msk.f32.mxu0 %vm7152_vm5, %v7136_v2  ;;  %v6661_v54 = vpack.c.bf16 %v4676_v51, %v4675_v27  ;;  %v6736_v49 = vpack.c.bf16 %v5752_v20, %v5751_v63 }
 0x4df   :  { %6654 = vmatprep.subr.bf16.mxu0 %v7151_v45 }
 0x4e2   :  { %6656 = vmatpush3.bf16.msra.mxu0 %v6655_v37 }
 0x4e3   :  { %6657 = vmatprep.subr.bf16.mxu0 %v7151_v45 }
 0x4e5   :  { %6352 = vmatmul.mubr.msk.f32.vlgmr.msra.gmra.mrb[28].mxu0 %vm3770_vm7, %v8335_v36  ;;  %v4757_v36 = vld [vmem:[%s8833_s5 + $0x190] sm:$0xff] }
 0x4e6   :  { %6659 = vmatpush3.bf16.msra.mxu0 %v6658_v50  ;;  %6362 = vmatprep.mubr.msk.f32.mxu0 %vm7152_vm5, %v7136_v2  ;;  %v6667_v17 = vpack.c.bf16 %v4758_v13, %v4757_v36 }
 0x4e7   :  { %6660 = vmatprep.subr.bf16.mxu0 %v7151_v45 }
 0x4ea   :  { %6662 = vmatpush3.bf16.msra.mxu0 %v6661_v54 }
 0x4eb   :  { %6663 = vmatprep.subr.bf16.mxu0 %v7151_v45 }
 0x4ed   :  { %6363 = vmatmul.mubr.msk.f32.vlgmr.msra.gmra.mrb[30].mxu0 %vm3770_vm7, %v8338_v38  ;;  %v4839_v38 = vld [vmem:[%s8833_s5 + $0x1b0] sm:$0xff] }
 0x4ee   :  { %6665 = vmatpush3.bf16.msra.mxu0 %v6664_v23  ;;  %6373 = vmatprep.mubr.msk.f32.mxu0 %vm7152_vm5, %v7136_v2  ;;  %v6673_v47 = vpack.c.bf16 %v4840_v52, %v4839_v38  ;;  %v5839_v38 = vld [vmem:[%s8835_s7 + $0x8] sm:$0xff]  ;;  %v5840_v52 = vld [vmem:[%s8835_s7 + $0x10] sm:$0xff] }
 0x4ef   :  { %6666 = vmatprep.subr.bf16.mxu0 %v7151_v45 }
 0x4f2   :  { %6668 = vmatpush3.bf16.msra.mxu0 %v6667_v17 }
 0x4f3   :  { %6669 = vmatprep.subr.bf16.mxu0 %v7151_v45 }
 0x4f5   :  { %6374 = vmatmul.mubr.msk.f32.vlgmr.msra.gmra.mrb[32].mxu0 %vm3770_vm7, %v8355_v10  ;;  %v4922_v10 = vld [vmem:[%s8833_s5 + $0x1d0] sm:$0xff] }
 0x4f6   :  { %6671 = vmatpush3.bf16.msra.mxu0 %v6670_v28  ;;  %6384 = vmatprep.mubr.msk.f32.mxu0 %vm7152_vm5, %v7136_v2  ;;  %v6679_v3 = vpack.c.bf16 %v4923_v5, %v4922_v10  ;;  %v5838_v28 = vld [vmem:[%s8835_s7] sm:$0xff]  ;;  %v6745_v10 = vpack.c.bf16 %v5841_v34, %v5840_v52 }
 0x4f7   :  { %6672 = vmatprep.subr.bf16.mxu0 %v7151_v45  ;;  %v6742_v19 = vpack.c.bf16 %v5839_v38, %v5838_v28 }
 0x4f9   :  { %6743 = vmatpush3.bf16.msra.mxu1 %v6742_v19 }
 0x4fa   :  { %6674 = vmatpush3.bf16.msra.mxu0 %v6673_v47  ;;  %6744 = vmatprep.subr.bf16.mxu1 %v7151_v45 }
 0x4fb   :  { %6675 = vmatprep.subr.bf16.mxu0 %v7151_v45 }
 0x4fd   :  { %6385 = vmatmul.mubr.msk.f32.vlgmr.msra.gmra.mrb[34].mxu0 %vm3770_vm7, %v8352_v61  ;;  %v5004_v61 = vld [vmem:[%s8833_s5 + $0x1f0] sm:$0xff]  ;;  %6746 = vmatpush3.bf16.msra.mxu1 %v6745_v10 }
 0x4fe   :  { %6677 = vmatpush3.bf16.msra.mxu0 %v6676_v25  ;;  %6395 = vmatprep.mubr.msk.f32.mxu0 %vm7152_vm5, %v7136_v2  ;;  %v6685_v8 = vpack.c.bf16 %v5005_v33, %v5004_v61  ;;  %v5842_v61 = vld [vmem:[%s8835_s7 + $0x20] sm:$0xff]  ;;  %v5843_v33 = vld [vmem:[%s8835_s7 + $0x28] sm:$0xff] }
 0x4ff   :  { %6678 = vmatprep.subr.bf16.mxu0 %v7151_v45  ;;  %6747 = vmatprep.subr.bf16.mxu1 %v7151_v45 }
 0x502   :  { %6680 = vmatpush3.bf16.msra.mxu0 %v6679_v3 }
 0x503   :  { %6681 = vmatprep.subr.bf16.mxu0 %v7151_v45 }
 0x505   :  { %6396 = vmatmul.mubr.msk.f32.vlgmr.msra.gmra.mrb[36].mxu0 %vm3770_vm7, %v8358_v15  ;;  %v5088_v15 = vld [vmem:[%s8833_s5 + $0x210] sm:$0xff] }
 0x506   :  { %6683 = vmatpush3.bf16.msra.mxu0 %v6682_v41  ;;  %6406 = vmatprep.mubr.msk.f32.mxu0 %vm7152_vm5, %v7136_v2  ;;  %v6691_v43 = vpack.c.bf16 %v5089_v18, %v5088_v15 }
 0x507   :  { %6684 = vmatprep.subr.bf16.mxu0 %v7151_v45 }
 0x50a   :  { %6686 = vmatpush3.bf16.msra.mxu0 %v6685_v8  ;;  %v6748_v8 = vpack.c.bf16 %v5843_v33, %v5842_v61 }
 0x50b   :  { %6687 = vmatprep.subr.bf16.mxu0 %v7151_v45 }
 0x50c   :  { %6749 = vmatpush3.bf16.msra.mxu1 %v6748_v8 }
 0x50d   :  { %6407 = vmatmul.mubr.msk.f32.vlgmr.msra.gmra.mrb[38].mxu0 %vm3770_vm7, %v8381_v58  ;;  %v5254_v58 = vld [vmem:[%s8833_s5 + $0x250] sm:$0xff]  ;;  %6750 = vmatprep.subr.bf16.mxu1 %v7151_v45 }
 0x50e   :  { %6689 = vmatpush3.bf16.msra.mxu0 %v6688_v6  ;;  %6417 = vmatprep.mubr.msk.f32.mxu0 %vm7152_vm5, %v7136_v2  ;;  %v6703_v60 = vpack.c.bf16 %v5255_v59, %v5254_v58  ;;  %v6751_v6 = vpack.c.bf16 %v5845_v12, %v5844_v57 }
 0x50f   :  { %6690 = vmatprep.subr.bf16.mxu0 %v7151_v45 }
 0x510   :  { %6752 = vmatpush3.bf16.msra.mxu1 %v6751_v6 }
 0x512   :  { %6692 = vmatpush3.bf16.msra.mxu0 %v6691_v43 }
 0x513   :  { %6699 = vmatprep.subr.bf16.mxu0 %v7151_v45 }
 0x515   :  { %6418 = vmatmul.mubr.msk.f32.vlgmr.msra.gmra.mrb[40].mxu0 %vm3770_vm7, %v8386_v48  ;;  %v5422_v48 = vld [vmem:[%s8833_s5 + $0x290] sm:$0xff] }
 0x516   :  { %6701 = vmatpush3.bf16.msra.mxu0 %v6700_v29  ;;  %6439 = vmatprep.mubr.msk.f32.mxu0 %vm7152_vm5, %v7136_v2  ;;  %v6715_v14 = vpack.c.bf16 %v5423_v56, %v5422_v48 }
 0x517   :  { %6702 = vmatprep.subr.bf16.mxu0 %v7151_v45 }
 0x51a   :  { %6704 = vmatpush3.bf16.msra.mxu0 %v6703_v60 }
 0x51b   :  { %6711 = vmatprep.subr.bf16.mxu0 %v7151_v45 }
 0x51d   :  { %6440 = vmatmul.mubr.msk.f32.vlgmr.msra.gmra.mrb[42].mxu0 %vm3770_vm7, %v8391_v9  ;;  %v5588_v9 = vld [vmem:[%s8833_s5 + $0x2d0] sm:$0xff] }
 0x51e   :  { %6713 = vmatpush3.bf16.msra.mxu0 %v6712_v55  ;;  %6461 = vmatprep.mubr.msk.f32.mxu0 %vm7152_vm5, %v7136_v2  ;;  %v6727_v40 = vpack.c.bf16 %v5589_v21, %v5588_v9 }
 0x51f   :  { %6714 = vmatprep.subr.bf16.mxu0 %v7151_v45 }
 0x522   :  { %6716 = vmatpush3.bf16.msra.mxu0 %v6715_v14 }
 0x523   :  { %6723 = vmatprep.subr.bf16.mxu0 %v7151_v45 }
 0x525   :  { %6462 = vmatmul.mubr.msk.f32.vlgmr.msra.gmra.mrb[44].mxu0 %vm3770_vm7, %v8421_v7  ;;  %v3743_v7 = vpop.trf.xlu0 }
 0x526   :  { %6725 = vmatpush3.bf16.msra.mxu0 %v6724_v46  ;;  %6483 = vmatprep.mubr.msk.f32.mxu0 %vm7152_vm5, %v7136_v2  ;;  %v5748_v37 = vrot.slane %v3743_v7, 7 }
 0x527   :  { %6726 = vmatprep.subr.bf16.mxu0 %v7151_v45 }
 0x528   :  { %v5750_v50 = vsel %vm3756_vm6, %v3711_v44, %v5748_v37 }
 0x52a   :  { %6728 = vmatpush3.bf16.msra.mxu0 %v6727_v40 }
 0x52b   :  { %6735 = vmatprep.subr.bf16.mxu0 %v7151_v45 }
 0x52d   :  { %6484 = vmatmul.mubr.msk.f32.vlgmr.msra.gmra.mrb[46].mxu0 %vm3770_vm7, %v8424_v53 }
 0x52e   :  { %6737 = vmatpush3.bf16.msra.mxu0 %v6736_v49  ;;  %6505 = vmatprep.mubr.msk.f32.mxu0 %vm7152_vm5, %v7136_v2 }
 0x52f   :  { %6738 = vmatprep.subr.bf16.mxu0 %v7151_v45 }
 0x532   :  { %6740 = vmatpush3.bf16.msra.mxu0 %v6739_v39 }
 0x535   :  { %6506 = vmatmul.mubr.msk.f32.vlgmr.msra.gmra.mrb[48].mxu0 %vm3770_vm7, %v5750_v50 }
 0x568   :  { %v3840_v27 = vpop.f32.mrb[8].mxu0 }
 0x569   :  { %v6243_v51 = vpop.f32.mrb[9].mxu0 }
 0x570   :  { %v3913_v54 = vpop.f32.mrb[10].mxu0 }
 0x571   :  { %v3914_v0 = vadd.f32 %v3913_v54, %v3840_v27  ;;  %v6254_v22 = vpop.f32.mrb[11].mxu0 }
 0x578   :  { %v3995_v53 = vpop.f32.mrb[12].mxu0 }
 0x579   :  { %v3999_v23 = vadd.f32 %v3995_v53, %v3914_v0  ;;  %v6265_v36 = vpop.f32.mrb[13].mxu0 }
 0x57a   :  { %v8777_v13 = vpop.f32.mrb[10].mxu1 }
 0x57b   :  { %v6430_v17 = vpop.f32.mrb[11].mxu1 }
 0x580   :  { %v4078_v2 = vpop.f32.mrb[14].mxu0 }
 0x581   :  { %v4082_v62 = vadd.f32 %v4078_v2, %v3999_v23  ;;  %v6276_v26 = vpop.f32.mrb[15].mxu0 }
 0x582   :  { %v8788_v47 = vpop.f32.mrb[12].mxu1 }
 0x583   :  { %v6452_v25 = vpop.f32.mrb[13].mxu1 }
 0x588   :  { %v4161_v5 = vpop.f32.mrb[16].mxu0 }
 0x589   :  { %v4165_v3 = vadd.f32 %v4161_v5, %v4082_v62  ;;  %v6287_v24 = vpop.f32.mrb[17].mxu0 }
 0x58a   :  { %v5576_v30 = vpop.f32.mrb[14].mxu1 }
 0x58b   :  { %v6474_v41 = vpop.f32.mrb[15].mxu1 }
 0x590   :  { %v4246_v15 = vpop.f32.mrb[18].mxu0 }
 0x591   :  { %v4250_v18 = vadd.f32 %v4246_v15, %v4165_v3  ;;  %v6298_v43 = vpop.f32.mrb[19].mxu0  ;;  %v6096_v3 = vld [vmem:[%s8834_s6] ss:$0 sm:$0xff] }
 0x592   :  { %v5742_v4 = vpop.f32.mrb[16].mxu1 }
 0x593   :  { %v6496_v31 = vpop.f32.mrb[17].mxu1 }
 0x598   :  { %v4329_v29 = vpop.f32.mrb[20].mxu0 }
 0x599   :  { %v4333_v58 = vadd.f32 %v4329_v29, %v4250_v18  ;;  %v6309_v59 = vpop.f32.mrb[21].mxu0 }
 0x5a0   :  { %v4412_v60 = vpop.f32.mrb[22].mxu0 }
 0x5a1   :  { %v4416_v1 = vadd.f32 %v4412_v60, %v4333_v58  ;;  %v6320_v42 = vpop.f32.mrb[23].mxu0 }
 0x5a8   :  { %v4495_v55 = vpop.f32.mrb[24].mxu0 }
 0x5a9   :  { %v4499_v48 = vadd.f32 %v4495_v55, %v4416_v1  ;;  %v6331_v56 = vpop.f32.mrb[25].mxu0 }
 0x5b0   :  { %v4578_v14 = vpop.f32.mrb[26].mxu0 }
 0x5b1   :  { %v4582_v11 = vadd.f32 %v4578_v14, %v4499_v48  ;;  %v6342_v16 = vpop.f32.mrb[27].mxu0 }
 0x5b8   :  { %v4663_v46 = vpop.f32.mrb[28].mxu0 }
 0x5b9   :  { %v4667_v9 = vadd.f32 %v4663_v46, %v4582_v11  ;;  %v6353_v45 = vpop.f32.mrb[29].mxu0 }
 0x5c0   :  { %v4746_v21 = vpop.f32.mrb[30].mxu0 }
 0x5c1   :  { %v4750_v40 = vadd.f32 %v4746_v21, %v4667_v9  ;;  %v6364_v63 = vpop.f32.mrb[31].mxu0 }
 0x5c8   :  { %v4828_v20 = vpop.f32.mrb[32].mxu0 }
 0x5c9   :  { %v4832_v49 = vadd.f32 %v4828_v20, %v4750_v40  ;;  %v6375_v7 = vpop.f32.mrb[33].mxu0 }
 0x5d0   :  { %v4910_v32 = vpop.f32.mrb[34].mxu0 }
 0x5d1   :  { %v4914_v35 = vadd.f32 %v4910_v32, %v4832_v49  ;;  %v6386_v37 = vpop.f32.mrb[35].mxu0 }
 0x5d8   :  { %v4993_v39 = vpop.f32.mrb[36].mxu0 }
 0x5d9   :  { %v4997_v44 = vadd.f32 %v4993_v39, %v4914_v35  ;;  %v6397_v50 = vpop.f32.mrb[37].mxu0 }
 0x5e0   :  { %v5075_v27 = vpop.f32.mrb[38].mxu0 }
 0x5e1   :  { %v5079_v51 = vadd.f32 %v5075_v27, %v4997_v44  ;;  %v6408_v54 = vpop.f32.mrb[39].mxu0 }
 0x5e8   :  { %v5159_v0 = vpop.f32.mrb[40].mxu0 }
 0x5e9   :  { %v5163_v22 = vadd.f32 %v5159_v0, %v5079_v51  ;;  %v6419_v53 = vpop.f32.mrb[41].mxu0 }
 0x5eb   :  { %v5246_v23 = vadd.f32 %v8777_v13, %v5163_v22 }
 0x5f0   :  { %v5325_v36 = vpop.f32.mrb[42].mxu0 }
 0x5f1   :  { %v5329_v17 = vadd.f32 %v5325_v36, %v5246_v23  ;;  %v6441_v2 = vpop.f32.mrb[43].mxu0 }
 0x5f3   :  { %v5412_v62 = vadd.f32 %v8788_v47, %v5329_v17  ;;  %v6097_v47 = vld [vmem:[%s8836_s8] ss:$0 sm:$0xff] }
 0x5f8   :  { %v5493_v26 = vpop.f32.mrb[44].mxu0 }
 0x5f9   :  { %v5497_v28 = vadd.f32 %v5493_v26, %v5412_v62  ;;  %v6463_v38 = vpop.f32.mrb[45].mxu0 }
 0x5fb   :  { %v5580_v52 = vadd.f32 %v5576_v30, %v5497_v28 }
 0x600   :  { %v5659_v19 = vpop.f32.mrb[46].mxu0 }
 0x601   :  { %v5663_v34 = vadd.f32 %v5659_v19, %v5580_v52  ;;  %v6485_v25 = vpop.f32.mrb[47].mxu0 }
 0x603   :  { %v5746_v10 = vadd.f32 %v5742_v4, %v5663_v34 }
 0x608   :  { %v5824_v5 = vpop.f32.mrb[48].mxu0 }
 0x609   :  { %v5828_v24 = vadd.f32 %v5824_v5, %v5746_v10  ;;  %v6507_v13 = vpop.f32.mrb[49].mxu0 }
 0x60b   :  { %v5836_v41 = vadd.f32 %v6096_v3, %v5828_v24 }
 0x60d   :  { %v5837_v61 = vmax.f32 %v5836_v41, 0.0 }
 0x60f   :  { %6525 = vmatmul.mubr.msk.f32.vlgmr.msra.gmra.mrb[18].mxu1 %vm5853_vm8, %v5837_v61 }
 0x6e2   :  { %v5923_v30 = vpop.f32.mrb[18].mxu1 }
 0x6e3   :  { %v5924_v33 = vadd.f32 %v6097_v47, %v5923_v30  ;;  %v6526_v8 = vpop.f32.mrb[19].mxu1 }
 0x6e5   :  { %5928 = vst.msk [vmem:[#allocation2] sm:$0x3] %vm5927_vm9, %v5924_v33 }
 0x6e6   :  { %7121 = shalt.err (!%p7118_p4)
}
 0x6e7   :  { %s7122_s28 = scalar_lea.hbm %s8837_s9, 32 }
 0x6e8   :  { %p7123_p5 = scmp.ne.s32.totalorder %s8837_s9, %s7122_s28  ;;  %p7126_p6 = scmp.lt.u32.totalorder %s7122_s28, %s8837_s9 }
 0x6ea   :  { %p7128_p7 = pnand %p7126_p6, %p7123_p5 }
 0x6ec   :  { %7131 = shalt.err (!%p7128_p7)
}
 0x6ed   :  { %5938 = dma.vmem_to_hbm [thread:$0]  %s5936_s26, 32, %s8837_s9, [#allocation3]  }
 0x6ee   :  { %7132 = dma.done.wait [#allocation3], 32  }
 0x6ef   :  { %7133 = vsyncadd [#allocation3], 4294967264 }
 0x6f0   :  { %5942 = vsyncpa [#allocation3], 1 }

</bundles_post_ra>
